<compile_context>
chip_gen: v6e
topology: v6e:2x2x1
jax: 0.10.0
libtpu: 0.0.40
codegen_flags: <defaults>
</compile_context>

<pallas_src>
import functools

import jax
import jax.numpy as jnp
import numpy as np
from jax.experimental import pallas as pl
from jax.experimental.pallas import tpu as pltpu

C_IN, C1, C2, C3 = 768, 256, 64, 32
MAX_TB = 512                       # max batch-rows per grid step


def _round_up(n, m):
    return -(-n // m) * m


# ----------------------------- Pallas kernel ------------------------------- #

def separator_kernel(B, Bp, TB, L1, k1, k2,
                     x_ref, w1_ref, w2_ref, w3_ref, w4_ref, vec_ref,
                     out_ref, y1_ref, sum_ref, sq_ref):
    f32 = jnp.float32
    bf16 = jnp.bfloat16
    eps = 1e-5

    i = pl.program_id(0)
    nsteps = pl.num_programs(0)

    @pl.when(i == 0)
    def _():
        sum_ref[...] = jnp.zeros_like(sum_ref)
        sq_ref[...] = jnp.zeros_like(sq_ref)

    # ---- block1 / Conv1d(768 -> 256, k1) for this batch tile ----------------
    # Batch-major channels-last layout: output position l uses the contiguous,
    # 128-aligned lane slice [l*768, (l+k1)*768) -> one K = k1*768 matmul.
    # Padded batch rows of x are zero, so their pre-bias conv output is zero
    # and contributes nothing to the BN sums (mask-free statistics).
    r0 = pl.multiple_of(i * TB, TB)
    for l in range(L1):                                       # static & tiny
        y = jnp.dot(x_ref[:, l * C_IN:(l + k1) * C_IN], w1_ref[...],
                    preferred_element_type=f32)               # (TB, 256) f32
        y1_ref[pl.ds(r0, TB), l * C1:(l + 1) * C1] = y
        sum_ref[...] += jnp.sum(y, axis=0, keepdims=True)
        sq_ref[...] += jnp.sum(y * y, axis=0, keepdims=True)

    # ---- epilogue on the last batch tile: BN1 + conv2 + block2 + linear -----
    @pl.when(i == nsteps - 1)
    def _():
        # Training-mode BatchNorm, biased variance over the L1*B valid samples.
        # NOTE: E[x^2]-E[x]^2 loses precision when |mean| >> std; the conv
        # bias is dropped (it cancels under BN), so the pre-bias activations
        # are near zero-mean and this is well within tolerance here.
        n1 = float(L1 * B)
        mean1 = sum_ref[...] * (1.0 / n1)                     # (1, 256)
        var1 = jnp.maximum(sq_ref[...] * (1.0 / n1) - mean1 * mean1, 0.0)
        g1, be1 = vec_ref[0:1, :], vec_ref[1:2, :]
        scale1 = g1 * jax.lax.rsqrt(var1 + eps)
        shift1 = be1 - mean1 * scale1                         # b1 cancels

        # Row-validity mask for the per-batch BatchNorms (padded rows carry
        # nonzero garbage after BN1's affine shift, so they must be masked
        # out of the y2 / y3 statistics; their outputs are sliced off later).
        ridx = jax.lax.broadcasted_iota(jnp.int32, (Bp, 1), 0)
        mask = (ridx < B).astype(f32)

        # Conv1d(256 -> 64, k2): output length 1, k2 == L1 taps, bf16 operands.
        y2 = jnp.zeros((Bp, C2), f32)
        for t in range(k2):
            seg = y1_ref[:, t * C1:(t + 1) * C1]              # (Bp, 256) f32
            segn = jnp.maximum(seg * scale1 + shift1, 0.0)    # BN1 + ReLU
            y2 = y2 + jnp.dot(segn.astype(bf16),
                              w2_ref[t * C1:(t + 1) * C1, :],
                              preferred_element_type=f32)     # (Bp, 64) f32

        def bn_relu_masked(y, gamma, beta, n):
            # Single-pass masked training-mode BN (biased var) + ReLU.
            s = jnp.sum(y * mask, axis=0, keepdims=True)
            q = jnp.sum(y * y * mask, axis=0, keepdims=True)
            m = s * (1.0 / n)
            v = jnp.maximum(q * (1.0 / n) - m * m, 0.0)
            sc = gamma * jax.lax.rsqrt(v + eps)
            return jnp.maximum(y * sc + (beta - m * sc), 0.0)

        g2, be2 = vec_ref[2:3, :C2], vec_ref[3:4, :C2]
        y2n = bn_relu_masked(y2, g2, be2, float(B))           # (Bp, 64)

        # block2: Linear(64 -> 32) + BN + ReLU (tiny -> keep f32).
        y3 = jnp.dot(y2n, w3_ref[...], preferred_element_type=f32)
        g3, be3 = vec_ref[4:5, :C3], vec_ref[5:6, :C3]
        y3n = bn_relu_masked(y3, g3, be3, float(B))           # (Bp, 32)

        # linear_block: Linear(32 -> 1), lane-major output (1, Bp).
        b4 = vec_ref[6:7, 0:1]
        y4 = jax.lax.dot_general(w4_ref[...], y3n,
                                 (((1,), (1,)), ((), ())),
                                 preferred_element_type=f32) + b4
        out_ref[...] = y4                                     # (1, Bp)


# ------------------------------ JAX wrapper -------------------------------- #

def make_params(window_size, key):
    """Random parameters in PyTorch layout (Conv1d: (out,in,k); Linear: (out,in))."""
    if window_size == 1:
        k1, k2 = 2, 1
    else:
        k1, k2 = 2 * window_size - 2, 3
    ks = jax.random.split(key, 14)
    n = lambda k, s, sc: (sc * jax.random.normal(k, s)).astype(jnp.float32)
    params = dict(
        w1=n(ks[0], (C1, C_IN, k1), 0.02), b1=n(ks[1], (C1,), 0.01),
        g1=1.0 + n(ks[2], (C1,), 0.1),     be1=n(ks[3], (C1,), 0.05),
        w2=n(ks[4], (C2, C1, k2), 0.05),   b2=n(ks[5], (C2,), 0.01),
        g2=1.0 + n(ks[6], (C2,), 0.1),     be2=n(ks[7], (C2,), 0.05),
        w3=n(ks[8], (C3, C2), 0.1),        b3=n(ks[9], (C3,), 0.01),
        g3=1.0 + n(ks[10], (C3,), 0.1),    be3=n(ks[11], (C3,), 0.05),
        w4=n(ks[12], (1, C3), 0.1),        b4=n(ks[13], (1,), 0.01),
    )
    return params, k1, k2


def prepare_params(params, window_size):
    """One-time repack of the weights into the kernel's layout."""
    k1 = 2 if window_size == 1 else 2 * window_size - 2
    k2 = 1 if window_size == 1 else 3
    # Tap-major rows, (in_channel) x (out_channel) per tap.
    w1p = jnp.transpose(params['w1'], (2, 1, 0)).reshape(k1 * C_IN, C1).astype(jnp.bfloat16)
    w2p = jnp.transpose(params['w2'], (2, 1, 0)).reshape(k2 * C1, C2).astype(jnp.bfloat16)
    w3p = params['w3'].T.astype(jnp.float32)                  # (64, 32)
    w4p = params['w4'].astype(jnp.float32)                    # (1, 32)

    def row(v):
        v = v.reshape(-1).astype(jnp.float32)
        return jnp.pad(v, (0, C1 - v.shape[0]))

    # b1/b2/b3 cancel exactly under the following training-mode BatchNorms, so
    # only the BN affine parameters and the final bias are packed (one DMA).
    vecs = jnp.stack([row(params[nm]) for nm in
                      ('g1', 'be1', 'g2', 'be2', 'g3', 'be3', 'b4')]
                     + [jnp.zeros((C1,), jnp.float32)], axis=0)   # (8, 256)
    return dict(w1p=w1p, w2p=w2p, w3p=w3p, w4p=w4p, vecs=vecs)


def _vmem_limit_bytes():
    # ~56 MiB on v7x (64 MiB VMEM), ~112 MiB on v5e / v6e (128 MiB VMEM).
    try:
        cap = int(pltpu.get_tpu_info().vmem_capacity_bytes)
    except Exception:
        cap = 64 * 1024 * 1024
    return max(32 * 1024 * 1024, min(cap * 7 // 8, 120 * 1024 * 1024))


def separator_forward(x, prep, window_size):
    """x: (B, 768, L) float32 (PyTorch NCL layout).  Returns (B,) float32."""
    B, Cin, L = x.shape
    assert Cin == C_IN
    k1 = 2 if window_size == 1 else 2 * window_size - 2
    k2 = 1 if window_size == 1 else 3
    L1 = L - k1 + 1
    assert L1 == k2, "sequence length must reduce to 1 after block1"

    # Batch tiling: rows padded to a multiple of 16 (bf16 sublane tile); tiles
    # of at most MAX_TB rows; padding waste bounded by 15 rows per tile.
    B16 = _round_up(B, 16)
    num_tiles = -(-B16 // MAX_TB)
    TB = _round_up(-(-B16 // num_tiles), 16)
    Bp = TB * num_tiles

    # Batch-major, channels-last rows, zero-padded batch, bf16.
    # TODO(synk): avoid this wrapper-side HBM round trip of the dominant tensor
    # by emitting channels-last bf16 upstream (or DMA-transposing from ANY).
    xt = jnp.transpose(x, (0, 2, 1)).reshape(B, L * C_IN)
    x2 = jnp.pad(xt, ((0, Bp - B), (0, 0))).astype(jnp.bfloat16)   # (Bp, L*768)

    vmem_limit = _vmem_limit_bytes()
    need = (Bp * L1 * C1 * 4                     # persistent y1 scratch (f32)
            + 2 * TB * L * C_IN * 2              # double-buffered x tile (bf16)
            + prep['w1p'].size * 2 + prep['w2p'].size * 2
            + prep['w3p'].size * 4 + prep['w4p'].size * 4
            + prep['vecs'].size * 4 + Bp * 4 + (1 << 20))
    assert need <= vmem_limit, (
        f"batch too large for single-pass BatchNorm kernel: ~{need >> 20} MiB VMEM "
        f"needed, limit {vmem_limit >> 20} MiB")

    flops = (2 * L1 * Bp * (k1 * C_IN) * C1      # conv1 (dominant)
             + 2 * Bp * (k2 * C1) * C2           # conv2
             + 2 * Bp * C2 * C3 + 2 * Bp * C3)   # block2 + linear
    bytes_accessed = (x2.size * 2 + prep['w1p'].size * 2 + prep['w2p'].size * 2
                      + prep['w3p'].size * 4 + prep['w4p'].size * 4
                      + prep['vecs'].size * 4 + Bp * 4)

    out = pl.pallas_call(
        functools.partial(separator_kernel, B, Bp, TB, L1, k1, k2),
        out_shape=jax.ShapeDtypeStruct((1, Bp), jnp.float32),
        grid_spec=pltpu.PrefetchScalarGridSpec(
            num_scalar_prefetch=0,
            grid=(num_tiles,),
            in_specs=[
                pl.BlockSpec((TB, L * C_IN), lambda i: (i, 0)),     # streamed x
                pl.BlockSpec((k1 * C_IN, C1), lambda i: (0, 0)),    # w1 (resident)
                pl.BlockSpec((k2 * C1, C2), lambda i: (0, 0)),      # w2
                pl.BlockSpec((C2, C3), lambda i: (0, 0)),           # w3
                pl.BlockSpec((1, C3), lambda i: (0, 0)),            # w4
                pl.BlockSpec((8, C1), lambda i: (0, 0)),            # packed vecs
            ],
            out_specs=pl.BlockSpec((1, Bp), lambda i: (0, 0)),
            scratch_shapes=[
                pltpu.VMEM((Bp, L1 * C1), jnp.float32),   # persistent pre-BN y1
                pltpu.VMEM((1, C1), jnp.float32),         # per-channel sum
                pltpu.VMEM((1, C1), jnp.float32),         # per-channel sum of sq
            ]),
        compiler_params=pltpu.CompilerParams(
            dimension_semantics=("arbitrary",),           # reduction over tiles
            vmem_limit_bytes=vmem_limit),
        cost_estimate=pl.CostEstimate(flops=flops, transcendentals=0,
                                      bytes_accessed=bytes_accessed),
    )(x2, prep['w1p'], prep['w2p'], prep['w3p'], prep['w4p'], prep['vecs'])
    return out[0, :B]


# --------------------------- pure-JAX reference ----------------------------- #

def reference_forward(x, params, window_size):
    eps = 1e-5
    hp = jax.lax.Precision.HIGHEST

    def bn(y, g, b, axes):
        m = jnp.mean(y, axis=axes, keepdims=True)
        v = jnp.mean(jnp.square(y - m), axis=axes, keepdims=True)
        shape = [1] * y.ndim
        shape[1] = -1
        return (y - m) * jax.lax.rsqrt(v + eps) * g.reshape(shape) + b.reshape(shape)

    y = jax.lax.conv_general_dilated(
        x, params['w1'], (1,), 'VALID',
        dimension_numbers=('NCH', 'OIH', 'NCH'), precision=hp)
    y = y + params['b1'][None, :, None]
    y = jnp.maximum(bn(y, params['g1'], params['be1'], (0, 2)), 0.0)

    y = jax.lax.conv_general_dilated(
        y, params['w2'], (1,), 'VALID',
        dimension_numbers=('NCH', 'OIH', 'NCH'), precision=hp)
    y = y + params['b2'][None, :, None]
    y = jnp.maximum(bn(y, params['g2'], params['be2'], (0, 2)), 0.0)

    y = y.reshape(y.shape[0], -1)                            # (B, 64)
    y = jnp.dot(y, params['w3'].T, precision=hp) + params['b3']
    y = jnp.maximum(bn(y, params['g3'], params['be3'], (0,)), 0.0)
    y = jnp.dot(y, params['w4'].T, precision=hp) + params['b4']
    return y.reshape(-1)


# ----------------------------------- main ----------------------------------- #

if __name__ == "__main__":
    window_size = 3                  # -> conv_kernel_size=4, linear_channel=3
    B = 12                           # not a multiple of 16: exercises pad/mask path
    L = 2 * window_size              # length that collapses to 1 after block1

    key = jax.random.PRNGKey(0)
    kp, kx = jax.random.split(key)
    params, k1, k2 = make_params(window_size, kp)
    x = jax.random.normal(kx, (B, C_IN, L), dtype=jnp.float32)

    prep = prepare_params(params, window_size)               # one-time weight repack

    fwd = jax.jit(separator_forward, static_argnums=2)
    out = jax.block_until_ready(fwd(x, prep, window_size))
    ref = jax.block_until_ready(reference_forward(x, params, window_size))

    assert out.shape == (B,)
    # bf16 operands for conv1 and conv2 (f32 accumulation / BN math) -> slightly
    # looser tolerance than a pure-f32 pipeline.
    np.testing.assert_allclose(np.asarray(out), np.asarray(ref), rtol=3e-2, atol=3e-2)
    print("KERNEL_OK")
</pallas_src>

<mosaic_0001>
module attributes {stable_mosaic.version = 11 : i64} {
  func.func @separator_kernel(%arg0: i32, %arg1: memref<16x4608xbf16, #tpu.memory_space<vmem>>, %arg2: memref<3072x256xbf16, #tpu.memory_space<vmem>>, %arg3: memref<768x64xbf16, #tpu.memory_space<vmem>>, %arg4: memref<64x32xf32, #tpu.memory_space<vmem>>, %arg5: memref<1x32xf32, #tpu.memory_space<vmem>>, %arg6: memref<8x256xf32, #tpu.memory_space<vmem>>, %arg7: memref<1x16xf32, #tpu.memory_space<vmem>>, %arg8: memref<16x768xf32, #tpu.memory_space<vmem>>, %arg9: memref<1x256xf32, #tpu.memory_space<vmem>>, %arg10: memref<1x256xf32, #tpu.memory_space<vmem>>) attributes {dimension_semantics = [#tpu.dimension_semantics<arbitrary>], iteration_bounds = array<i64: 1>, scalar_prefetch = 0 : i64, scratch_operands = 3 : i64, tpu.core_type = #tpu.core_type<tc>, window_params = [{transform_indices = @transform_0, window_bounds = array<i64: 16, 4608>}, {pipeline_mode = #tpu.pipeline_mode<synchronous>, transform_indices = @transform_1, window_bounds = array<i64: 3072, 256>}, {pipeline_mode = #tpu.pipeline_mode<synchronous>, transform_indices = @transform_2, window_bounds = array<i64: 768, 64>}, {pipeline_mode = #tpu.pipeline_mode<synchronous>, transform_indices = @transform_3, window_bounds = array<i64: 64, 32>}, {pipeline_mode = #tpu.pipeline_mode<synchronous>, transform_indices = @transform_4, window_bounds = array<i64: 1, 32>}, {pipeline_mode = #tpu.pipeline_mode<synchronous>, transform_indices = @transform_5, window_bounds = array<i64: 8, 256>}, {pipeline_mode = #tpu.pipeline_mode<synchronous>, transform_indices = @transform_6, window_bounds = array<i64: 1, 16>}]} {
    %c0_i32 = arith.constant 0 : i32
    %0 = arith.cmpi eq, %arg0, %c0_i32 : i32
    %1 = arith.extui %0 : i1 to i32
    %c0_i32_0 = arith.constant 0 : i32
    %2 = arith.cmpi ne, %1, %c0_i32_0 : i32
    scf.if %2 {
      %cst_45 = arith.constant 0.000000e+00 : f32
      %56 = vector.broadcast %cst_45 : f32 to vector<1x256xf32>
      %c0_46 = arith.constant 0 : index
      %c0_47 = arith.constant 0 : index
      %57 = vector.load %arg9[%c0_46, %c0_47] : memref<1x256xf32, #tpu.memory_space<vmem>>, vector<1x256xf32>
      tpu.vector_store %arg9[%c0_46, %c0_47], %56 {strides = array<i32>} : memref<1x256xf32, #tpu.memory_space<vmem>>, vector<1x256xf32>,
      %cst_48 = arith.constant 0.000000e+00 : f32
      %58 = vector.broadcast %cst_48 : f32 to vector<1x256xf32>
      %c0_49 = arith.constant 0 : index
      %c0_50 = arith.constant 0 : index
      %59 = vector.load %arg10[%c0_49, %c0_50] : memref<1x256xf32, #tpu.memory_space<vmem>>, vector<1x256xf32>
      tpu.vector_store %arg10[%c0_49, %c0_50], %58 {strides = array<i32>} : memref<1x256xf32, #tpu.memory_space<vmem>>, vector<1x256xf32>,
    } else {
    }
    %c16_i32 = arith.constant 16 : i32
    %3 = arith.muli %arg0, %c16_i32 : i32
    %4 = tpu.assume_multiple %3, 16 : i32
    %c0 = arith.constant 0 : index
    %c0_1 = arith.constant 0 : index
    %5 = vector.load %arg1[%c0, %c0_1] : memref<16x4608xbf16, #tpu.memory_space<vmem>>, vector<16x3072xbf16>
    %c0_2 = arith.constant 0 : index
    %c0_3 = arith.constant 0 : index
    %6 = vector.load %arg2[%c0_2, %c0_3] : memref<3072x256xbf16, #tpu.memory_space<vmem>>, vector<3072x256xbf16>
    %cst = arith.constant dense<0.000000e+00> : vector<16x256xf32>
    %7 = tpu.matmul %5, %6, %cst {dimension_numbers = #tpu.dot_dimension_numbers<[1], [0], [0], [1], [0, 0, 1, 1], [], []>} : vector<16x3072xbf16>, vector<3072x256xbf16>, vector<16x256xf32> -> vector<16x256xf32>
    %8 = arith.index_cast %4 : i32 to index
    %c0_4 = arith.constant 0 : index
    %9 = vector.load %arg8[%8, %c0_4] : memref<16x768xf32, #tpu.memory_space<vmem>>, vector<16x256xf32>
    tpu.vector_store %arg8[%8, %c0_4], %7 {strides = array<i32>} : memref<16x768xf32, #tpu.memory_space<vmem>>, vector<16x256xf32>,
    %c0_5 = arith.constant 0 : index
    %c0_6 = arith.constant 0 : index
    %10 = vector.load %arg9[%c0_5, %c0_6] : memref<1x256xf32, #tpu.memory_space<vmem>>, vector<1x256xf32>
    %cst_7 = arith.constant dense<0.000000e+00> : vector<256xf32>
    %11 = vector.multi_reduction <add>, %7, %cst_7 [0] : vector<16x256xf32> to vector<256xf32>
    %12 = vector.shape_cast %11 : vector<256xf32> to vector<1x256xf32>
    %13 = arith.addf %10, %12 : vector<1x256xf32>
    %c0_8 = arith.constant 0 : index
    %c0_9 = arith.constant 0 : index
    %14 = vector.load %arg9[%c0_8, %c0_9] : memref<1x256xf32, #tpu.memory_space<vmem>>, vector<1x256xf32>
    tpu.vector_store %arg9[%c0_8, %c0_9], %13 {strides = array<i32>} : memref<1x256xf32, #tpu.memory_space<vmem>>, vector<1x256xf32>,
    %c0_10 = arith.constant 0 : index
    %c0_11 = arith.constant 0 : index
    %15 = vector.load %arg10[%c0_10, %c0_11] : memref<1x256xf32, #tpu.memory_space<vmem>>, vector<1x256xf32>
    %16 = arith.mulf %7, %7 : vector<16x256xf32>
    %cst_12 = arith.constant dense<0.000000e+00> : vector<256xf32>
    %17 = vector.multi_reduction <add>, %16, %cst_12 [0] : vector<16x256xf32> to vector<256xf32>
    %18 = vector.shape_cast %17 : vector<256xf32> to vector<1x256xf32>
    %19 = arith.addf %15, %18 : vector<1x256xf32>
    %c0_13 = arith.constant 0 : index
    %c0_14 = arith.constant 0 : index
    %20 = vector.load %arg10[%c0_13, %c0_14] : memref<1x256xf32, #tpu.memory_space<vmem>>, vector<1x256xf32>
    tpu.vector_store %arg10[%c0_13, %c0_14], %19 {strides = array<i32>} : memref<1x256xf32, #tpu.memory_space<vmem>>, vector<1x256xf32>,
    %c0_15 = arith.constant 0 : index
    %c768 = arith.constant 768 : index
    %21 = vector.load %arg1[%c0_15, %c768] : memref<16x4608xbf16, #tpu.memory_space<vmem>>, vector<16x3072xbf16>
    %c0_16 = arith.constant 0 : index
    %c0_17 = arith.constant 0 : index
    %22 = vector.load %arg2[%c0_16, %c0_17] : memref<3072x256xbf16, #tpu.memory_space<vmem>>, vector<3072x256xbf16>
    %cst_18 = arith.constant dense<0.000000e+00> : vector<16x256xf32>
    %23 = tpu.matmul %21, %22, %cst_18 {dimension_numbers = #tpu.dot_dimension_numbers<[1], [0], [0], [1], [0, 0, 1, 1], [], []>} : vector<16x3072xbf16>, vector<3072x256xbf16>, vector<16x256xf32> -> vector<16x256xf32>
    %24 = arith.index_cast %4 : i32 to index
    %c256 = arith.constant 256 : index
    %25 = vector.load %arg8[%24, %c256] : memref<16x768xf32, #tpu.memory_space<vmem>>, vector<16x256xf32>
    tpu.vector_store %arg8[%24, %c256], %23 {strides = array<i32>} : memref<16x768xf32, #tpu.memory_space<vmem>>, vector<16x256xf32>,
    %c0_19 = arith.constant 0 : index
    %c0_20 = arith.constant 0 : index
    %26 = vector.load %arg9[%c0_19, %c0_20] : memref<1x256xf32, #tpu.memory_space<vmem>>, vector<1x256xf32>
    %cst_21 = arith.constant dense<0.000000e+00> : vector<256xf32>
    %27 = vector.multi_reduction <add>, %23, %cst_21 [0] : vector<16x256xf32> to vector<256xf32>
    %28 = vector.shape_cast %27 : vector<256xf32> to vector<1x256xf32>
    %29 = arith.addf %26, %28 : vector<1x256xf32>
    %c0_22 = arith.constant 0 : index
    %c0_23 = arith.constant 0 : index
    %30 = vector.load %arg9[%c0_22, %c0_23] : memref<1x256xf32, #tpu.memory_space<vmem>>, vector<1x256xf32>
    tpu.vector_store %arg9[%c0_22, %c0_23], %29 {strides = array<i32>} : memref<1x256xf32, #tpu.memory_space<vmem>>, vector<1x256xf32>,
    %c0_24 = arith.constant 0 : index
    %c0_25 = arith.constant 0 : index
    %31 = vector.load %arg10[%c0_24, %c0_25] : memref<1x256xf32, #tpu.memory_space<vmem>>, vector<1x256xf32>
    %32 = arith.mulf %23, %23 : vector<16x256xf32>
    %cst_26 = arith.constant dense<0.000000e+00> : vector<256xf32>
    %33 = vector.multi_reduction <add>, %32, %cst_26 [0] : vector<16x256xf32> to vector<256xf32>
    %34 = vector.shape_cast %33 : vector<256xf32> to vector<1x256xf32>
    %35 = arith.addf %31, %34 : vector<1x256xf32>
    %c0_27 = arith.constant 0 : index
    %c0_28 = arith.constant 0 : index
    %36 = vector.load %arg10[%c0_27, %c0_28] : memref<1x256xf32, #tpu.memory_space<vmem>>, vector<1x256xf32>
    tpu.vector_store %arg10[%c0_27, %c0_28], %35 {strides = array<i32>} : memref<1x256xf32, #tpu.memory_space<vmem>>, vector<1x256xf32>,
    %c0_29 = arith.constant 0 : index
    %c1536 = arith.constant 1536 : index
    %37 = vector.load %arg1[%c0_29, %c1536] : memref<16x4608xbf16, #tpu.memory_space<vmem>>, vector<16x3072xbf16>
    %c0_30 = arith.constant 0 : index
    %c0_31 = arith.constant 0 : index
    %38 = vector.load %arg2[%c0_30, %c0_31] : memref<3072x256xbf16, #tpu.memory_space<vmem>>, vector<3072x256xbf16>
    %cst_32 = arith.constant dense<0.000000e+00> : vector<16x256xf32>
    %39 = tpu.matmul %37, %38, %cst_32 {dimension_numbers = #tpu.dot_dimension_numbers<[1], [0], [0], [1], [0, 0, 1, 1], [], []>} : vector<16x3072xbf16>, vector<3072x256xbf16>, vector<16x256xf32> -> vector<16x256xf32>
    %40 = arith.index_cast %4 : i32 to index
    %c512 = arith.constant 512 : index
    %41 = vector.load %arg8[%40, %c512] : memref<16x768xf32, #tpu.memory_space<vmem>>, vector<16x256xf32>
    tpu.vector_store %arg8[%40, %c512], %39 {strides = array<i32>} : memref<16x768xf32, #tpu.memory_space<vmem>>, vector<16x256xf32>,
    %c0_33 = arith.constant 0 : index
    %c0_34 = arith.constant 0 : index
    %42 = vector.load %arg9[%c0_33, %c0_34] : memref<1x256xf32, #tpu.memory_space<vmem>>, vector<1x256xf32>
    %cst_35 = arith.constant dense<0.000000e+00> : vector<256xf32>
    %43 = vector.multi_reduction <add>, %39, %cst_35 [0] : vector<16x256xf32> to vector<256xf32>
    %44 = vector.shape_cast %43 : vector<256xf32> to vector<1x256xf32>
    %45 = arith.addf %42, %44 : vector<1x256xf32>
    %c0_36 = arith.constant 0 : index
    %c0_37 = arith.constant 0 : index
    %46 = vector.load %arg9[%c0_36, %c0_37] : memref<1x256xf32, #tpu.memory_space<vmem>>, vector<1x256xf32>
    tpu.vector_store %arg9[%c0_36, %c0_37], %45 {strides = array<i32>} : memref<1x256xf32, #tpu.memory_space<vmem>>, vector<1x256xf32>,
    %c0_38 = arith.constant 0 : index
    %c0_39 = arith.constant 0 : index
    %47 = vector.load %arg10[%c0_38, %c0_39] : memref<1x256xf32, #tpu.memory_space<vmem>>, vector<1x256xf32>
    %48 = arith.mulf %39, %39 : vector<16x256xf32>
    %cst_40 = arith.constant dense<0.000000e+00> : vector<256xf32>
    %49 = vector.multi_reduction <add>, %48, %cst_40 [0] : vector<16x256xf32> to vector<256xf32>
    %50 = vector.shape_cast %49 : vector<256xf32> to vector<1x256xf32>
    %51 = arith.addf %47, %50 : vector<1x256xf32>
    %c0_41 = arith.constant 0 : index
    %c0_42 = arith.constant 0 : index
    %52 = vector.load %arg10[%c0_41, %c0_42] : memref<1x256xf32, #tpu.memory_space<vmem>>, vector<1x256xf32>
    tpu.vector_store %arg10[%c0_41, %c0_42], %51 {strides = array<i32>} : memref<1x256xf32, #tpu.memory_space<vmem>>, vector<1x256xf32>,
    %c0_i32_43 = arith.constant 0 : i32
    %53 = arith.cmpi eq, %arg0, %c0_i32_43 : i32
    %54 = arith.extui %53 : i1 to i32
    %c0_i32_44 = arith.constant 0 : i32
    %55 = arith.cmpi ne, %54, %c0_i32_44 : i32
    scf.if %55 {
      %c0_45 = arith.constant 0 : index
      %c0_46 = arith.constant 0 : index
      %56 = vector.load %arg9[%c0_45, %c0_46] : memref<1x256xf32, #tpu.memory_space<vmem>>, vector<1x256xf32>
      %cst_47 = arith.constant 0.027777778 : f32
      %57 = vector.broadcast %cst_47 : f32 to vector<1x256xf32>
      %58 = arith.mulf %56, %57 : vector<1x256xf32>
      %c0_48 = arith.constant 0 : index
      %c0_49 = arith.constant 0 : index
      %59 = vector.load %arg10[%c0_48, %c0_49] : memref<1x256xf32, #tpu.memory_space<vmem>>, vector<1x256xf32>
      %cst_50 = arith.constant 0.027777778 : f32
      %60 = vector.broadcast %cst_50 : f32 to vector<1x256xf32>
      %61 = arith.mulf %59, %60 : vector<1x256xf32>
      %62 = arith.mulf %58, %58 : vector<1x256xf32>
      %63 = arith.subf %61, %62 : vector<1x256xf32>
      %cst_51 = arith.constant 0.000000e+00 : f32
      %64 = vector.broadcast %cst_51 : f32 to vector<1x256xf32>
      %65 = arith.maximumf %63, %64 : vector<1x256xf32>
      %c0_52 = arith.constant 0 : index
      %c0_53 = arith.constant 0 : index
      %66 = vector.load %arg6[%c0_52, %c0_53] : memref<8x256xf32, #tpu.memory_space<vmem>>, vector<1x256xf32>
      %c1 = arith.constant 1 : index
      %c0_54 = arith.constant 0 : index
      %67 = vector.load %arg6[%c1, %c0_54] : memref<8x256xf32, #tpu.memory_space<vmem>>, vector<1x256xf32>
      %cst_55 = arith.constant 9.99999974E-6 : f32
      %68 = vector.broadcast %cst_55 : f32 to vector<1x256xf32>
      %69 = arith.addf %65, %68 : vector<1x256xf32>
      %70 = math.rsqrt %69 : vector<1x256xf32>
      %71 = arith.mulf %66, %70 : vector<1x256xf32>
      %72 = arith.mulf %58, %71 : vector<1x256xf32>
      %73 = arith.subf %67, %72 : vector<1x256xf32>
      %74 = tpu.iota {dimensions = array<i32: 0>} : vector<16x1xi32>
      %c12_i32 = arith.constant 12 : i32
      %75 = vector.broadcast %c12_i32 : i32 to vector<16x1xi32>
      %76 = arith.cmpi slt, %74, %75 : vector<16x1xi32>
      %77 = arith.extui %76 : vector<16x1xi1> to vector<16x1xi32>
      %78 = arith.sitofp %77 : vector<16x1xi32> to vector<16x1xf32>
      %cst_56 = arith.constant 0.000000e+00 : f32
      %79 = vector.broadcast %cst_56 : f32 to vector<16x64xf32>
      %c0_57 = arith.constant 0 : index
      %c0_58 = arith.constant 0 : index
      %80 = vector.load %arg8[%c0_57, %c0_58] : memref<16x768xf32, #tpu.memory_space<vmem>>, vector<16x256xf32>
      %81 = vector.broadcast %71 : vector<1x256xf32> to vector<16x256xf32>
      %82 = arith.mulf %80, %81 : vector<16x256xf32>
      %83 = vector.broadcast %73 : vector<1x256xf32> to vector<16x256xf32>
      %84 = arith.addf %82, %83 : vector<16x256xf32>
      %cst_59 = arith.constant 0.000000e+00 : f32
      %85 = vector.broadcast %cst_59 : f32 to vector<16x256xf32>
      %86 = arith.maximumf %84, %85 : vector<16x256xf32>
      %87 = arith.truncf %86 : vector<16x256xf32> to vector<16x256xbf16>
      %c0_60 = arith.constant 0 : index
      %c0_61 = arith.constant 0 : index
      %88 = vector.load %arg3[%c0_60, %c0_61] : memref<768x64xbf16, #tpu.memory_space<vmem>>, vector<256x64xbf16>
      %cst_62 = arith.constant dense<0.000000e+00> : vector<16x64xf32>
      %89 = tpu.matmul %87, %88, %cst_62 {dimension_numbers = #tpu.dot_dimension_numbers<[1], [0], [0], [1], [0, 0, 1, 1], [], []>} : vector<16x256xbf16>, vector<256x64xbf16>, vector<16x64xf32> -> vector<16x64xf32>
      %90 = arith.addf %79, %89 : vector<16x64xf32>
      %c0_63 = arith.constant 0 : index
      %c256_64 = arith.constant 256 : index
      %91 = vector.load %arg8[%c0_63, %c256_64] : memref<16x768xf32, #tpu.memory_space<vmem>>, vector<16x256xf32>
      %92 = vector.broadcast %71 : vector<1x256xf32> to vector<16x256xf32>
      %93 = arith.mulf %91, %92 : vector<16x256xf32>
      %94 = vector.broadcast %73 : vector<1x256xf32> to vector<16x256xf32>
      %95 = arith.addf %93, %94 : vector<16x256xf32>
      %cst_65 = arith.constant 0.000000e+00 : f32
      %96 = vector.broadcast %cst_65 : f32 to vector<16x256xf32>
      %97 = arith.maximumf %95, %96 : vector<16x256xf32>
      %98 = arith.truncf %97 : vector<16x256xf32> to vector<16x256xbf16>
      %c256_66 = arith.constant 256 : index
      %c0_67 = arith.constant 0 : index
      %99 = vector.load %arg3[%c256_66, %c0_67] : memref<768x64xbf16, #tpu.memory_space<vmem>>, vector<256x64xbf16>
      %cst_68 = arith.constant dense<0.000000e+00> : vector<16x64xf32>
      %100 = tpu.matmul %98, %99, %cst_68 {dimension_numbers = #tpu.dot_dimension_numbers<[1], [0], [0], [1], [0, 0, 1, 1], [], []>} : vector<16x256xbf16>, vector<256x64xbf16>, vector<16x64xf32> -> vector<16x64xf32>
      %101 = arith.addf %90, %100 : vector<16x64xf32>
      %c0_69 = arith.constant 0 : index
      %c512_70 = arith.constant 512 : index
      %102 = vector.load %arg8[%c0_69, %c512_70] : memref<16x768xf32, #tpu.memory_space<vmem>>, vector<16x256xf32>
      %103 = vector.broadcast %71 : vector<1x256xf32> to vector<16x256xf32>
      %104 = arith.mulf %102, %103 : vector<16x256xf32>
      %105 = vector.broadcast %73 : vector<1x256xf32> to vector<16x256xf32>
      %106 = arith.addf %104, %105 : vector<16x256xf32>
      %cst_71 = arith.constant 0.000000e+00 : f32
      %107 = vector.broadcast %cst_71 : f32 to vector<16x256xf32>
      %108 = arith.maximumf %106, %107 : vector<16x256xf32>
      %109 = arith.truncf %108 : vector<16x256xf32> to vector<16x256xbf16>
      %c512_72 = arith.constant 512 : index
      %c0_73 = arith.constant 0 : index
      %110 = vector.load %arg3[%c512_72, %c0_73] : memref<768x64xbf16, #tpu.memory_space<vmem>>, vector<256x64xbf16>
      %cst_74 = arith.constant dense<0.000000e+00> : vector<16x64xf32>
      %111 = tpu.matmul %109, %110, %cst_74 {dimension_numbers = #tpu.dot_dimension_numbers<[1], [0], [0], [1], [0, 0, 1, 1], [], []>} : vector<16x256xbf16>, vector<256x64xbf16>, vector<16x64xf32> -> vector<16x64xf32>
      %112 = arith.addf %101, %111 : vector<16x64xf32>
      %c2 = arith.constant 2 : index
      %c0_75 = arith.constant 0 : index
      %113 = vector.load %arg6[%c2, %c0_75] : memref<8x256xf32, #tpu.memory_space<vmem>>, vector<1x64xf32>
      %c3 = arith.constant 3 : index
      %c0_76 = arith.constant 0 : index
      %114 = vector.load %arg6[%c3, %c0_76] : memref<8x256xf32, #tpu.memory_space<vmem>>, vector<1x64xf32>
      %115 = vector.broadcast %78 : vector<16x1xf32> to vector<16x64xf32>
      %116 = arith.mulf %112, %115 : vector<16x64xf32>
      %cst_77 = arith.constant dense<0.000000e+00> : vector<64xf32>
      %117 = vector.multi_reduction <add>, %116, %cst_77 [0] : vector<16x64xf32> to vector<64xf32>
      %118 = vector.shape_cast %117 : vector<64xf32> to vector<1x64xf32>
      %119 = arith.mulf %112, %112 : vector<16x64xf32>
      %120 = vector.broadcast %78 : vector<16x1xf32> to vector<16x64xf32>
      %121 = arith.mulf %119, %120 : vector<16x64xf32>
      %cst_78 = arith.constant dense<0.000000e+00> : vector<64xf32>
      %122 = vector.multi_reduction <add>, %121, %cst_78 [0] : vector<16x64xf32> to vector<64xf32>
      %123 = vector.shape_cast %122 : vector<64xf32> to vector<1x64xf32>
      %cst_79 = arith.constant 0.0833333358 : f32
      %124 = vector.broadcast %cst_79 : f32 to vector<1x64xf32>
      %125 = arith.mulf %118, %124 : vector<1x64xf32>
      %cst_80 = arith.constant 0.0833333358 : f32
      %126 = vector.broadcast %cst_80 : f32 to vector<1x64xf32>
      %127 = arith.mulf %123, %126 : vector<1x64xf32>
      %128 = arith.mulf %125, %125 : vector<1x64xf32>
      %129 = arith.subf %127, %128 : vector<1x64xf32>
      %cst_81 = arith.constant 0.000000e+00 : f32
      %130 = vector.broadcast %cst_81 : f32 to vector<1x64xf32>
      %131 = arith.maximumf %129, %130 : vector<1x64xf32>
      %cst_82 = arith.constant 9.99999974E-6 : f32
      %132 = vector.broadcast %cst_82 : f32 to vector<1x64xf32>
      %133 = arith.addf %131, %132 : vector<1x64xf32>
      %134 = math.rsqrt %133 : vector<1x64xf32>
      %135 = arith.mulf %113, %134 : vector<1x64xf32>
      %136 = vector.broadcast %135 : vector<1x64xf32> to vector<16x64xf32>
      %137 = arith.mulf %112, %136 : vector<16x64xf32>
      %138 = arith.mulf %125, %135 : vector<1x64xf32>
      %139 = arith.subf %114, %138 : vector<1x64xf32>
      %140 = vector.broadcast %139 : vector<1x64xf32> to vector<16x64xf32>
      %141 = arith.addf %137, %140 : vector<16x64xf32>
      %cst_83 = arith.constant 0.000000e+00 : f32
      %142 = vector.broadcast %cst_83 : f32 to vector<16x64xf32>
      %143 = arith.maximumf %141, %142 : vector<16x64xf32>
      %c0_84 = arith.constant 0 : index
      %c0_85 = arith.constant 0 : index
      %144 = vector.load %arg4[%c0_84, %c0_85] : memref<64x32xf32, #tpu.memory_space<vmem>>, vector<64x32xf32>
      %cst_86 = arith.constant dense<0.000000e+00> : vector<16x32xf32>
      %145 = tpu.matmul %143, %144, %cst_86 {dimension_numbers = #tpu.dot_dimension_numbers<[1], [0], [0], [1], [0, 0, 1, 1], [], []>} : vector<16x64xf32>, vector<64x32xf32>, vector<16x32xf32> -> vector<16x32xf32>
      %c4 = arith.constant 4 : index
      %c0_87 = arith.constant 0 : index
      %146 = vector.load %arg6[%c4, %c0_87] : memref<8x256xf32, #tpu.memory_space<vmem>>, vector<1x32xf32>
      %c5 = arith.constant 5 : index
      %c0_88 = arith.constant 0 : index
      %147 = vector.load %arg6[%c5, %c0_88] : memref<8x256xf32, #tpu.memory_space<vmem>>, vector<1x32xf32>
      %148 = vector.broadcast %78 : vector<16x1xf32> to vector<16x32xf32>
      %149 = arith.mulf %145, %148 : vector<16x32xf32>
      %cst_89 = arith.constant dense<0.000000e+00> : vector<32xf32>
      %150 = vector.multi_reduction <add>, %149, %cst_89 [0] : vector<16x32xf32> to vector<32xf32>
      %151 = vector.shape_cast %150 : vector<32xf32> to vector<1x32xf32>
      %152 = arith.mulf %145, %145 : vector<16x32xf32>
      %153 = vector.broadcast %78 : vector<16x1xf32> to vector<16x32xf32>
      %154 = arith.mulf %152, %153 : vector<16x32xf32>
      %cst_90 = arith.constant dense<0.000000e+00> : vector<32xf32>
      %155 = vector.multi_reduction <add>, %154, %cst_90 [0] : vector<16x32xf32> to vector<32xf32>
      %156 = vector.shape_cast %155 : vector<32xf32> to vector<1x32xf32>
      %cst_91 = arith.constant 0.0833333358 : f32
      %157 = vector.broadcast %cst_91 : f32 to vector<1x32xf32>
      %158 = arith.mulf %151, %157 : vector<1x32xf32>
      %cst_92 = arith.constant 0.0833333358 : f32
      %159 = vector.broadcast %cst_92 : f32 to vector<1x32xf32>
      %160 = arith.mulf %156, %159 : vector<1x32xf32>
      %161 = arith.mulf %158, %158 : vector<1x32xf32>
      %162 = arith.subf %160, %161 : vector<1x32xf32>
      %cst_93 = arith.constant 0.000000e+00 : f32
      %163 = vector.broadcast %cst_93 : f32 to vector<1x32xf32>
      %164 = arith.maximumf %162, %163 : vector<1x32xf32>
      %cst_94 = arith.constant 9.99999974E-6 : f32
      %165 = vector.broadcast %cst_94 : f32 to vector<1x32xf32>
      %166 = arith.addf %164, %165 : vector<1x32xf32>
      %167 = math.rsqrt %166 : vector<1x32xf32>
      %168 = arith.mulf %146, %167 : vector<1x32xf32>
      %169 = vector.broadcast %168 : vector<1x32xf32> to vector<16x32xf32>
      %170 = arith.mulf %145, %169 : vector<16x32xf32>
      %171 = arith.mulf %158, %168 : vector<1x32xf32>
      %172 = arith.subf %147, %171 : vector<1x32xf32>
      %173 = vector.broadcast %172 : vector<1x32xf32> to vector<16x32xf32>
      %174 = arith.addf %170, %173 : vector<16x32xf32>
      %cst_95 = arith.constant 0.000000e+00 : f32
      %175 = vector.broadcast %cst_95 : f32 to vector<16x32xf32>
      %176 = arith.maximumf %174, %175 : vector<16x32xf32>
      %c6 = arith.constant 6 : index
      %c0_96 = arith.constant 0 : index
      %177 = vector.load %arg6[%c6, %c0_96] : memref<8x256xf32, #tpu.memory_space<vmem>>, vector<1x1xf32>
      %c0_97 = arith.constant 0 : index
      %c0_98 = arith.constant 0 : index
      %178 = vector.load %arg5[%c0_97, %c0_98] : memref<1x32xf32, #tpu.memory_space<vmem>>, vector<1x32xf32>
      %cst_99 = arith.constant dense<0.000000e+00> : vector<1x16xf32>
      %179 = tpu.matmul %178, %176, %cst_99 {dimension_numbers = #tpu.dot_dimension_numbers<[1], [1], [0], [0], [0, 0, 1, 0], [], []>} : vector<1x32xf32>, vector<16x32xf32>, vector<1x16xf32> -> vector<1x16xf32>
      %180 = vector.broadcast %177 : vector<1x1xf32> to vector<1x16xf32>
      %181 = arith.addf %179, %180 : vector<1x16xf32>
      %c0_100 = arith.constant 0 : index
      %c0_101 = arith.constant 0 : index
      %182 = vector.load %arg7[%c0_100, %c0_101] : memref<1x16xf32, #tpu.memory_space<vmem>>, vector<1x16xf32>
      tpu.vector_store %arg7[%c0_100, %c0_101], %181 {strides = array<i32>} : memref<1x16xf32, #tpu.memory_space<vmem>>, vector<1x16xf32>,
    } else {
    }
    return
  }
  func.func @transform_0(%arg0: i32) -> (i32, i32) {
    %c0_i32 = arith.constant 0 : i32
    %c0_i32_0 = arith.constant 0 : i32
    return %arg0, %c0_i32 : i32, i32
  }
  func.func @transform_1(%arg0: i32) -> (i32, i32) {
    %c0_i32 = arith.constant 0 : i32
    %c0_i32_0 = arith.constant 0 : i32
    %c0_i32_1 = arith.constant 0 : i32
    return %c0_i32, %c0_i32_0 : i32, i32
  }
  func.func @transform_2(%arg0: i32) -> (i32, i32) {
    %c0_i32 = arith.constant 0 : i32
    %c0_i32_0 = arith.constant 0 : i32
    %c0_i32_1 = arith.constant 0 : i32
    return %c0_i32, %c0_i32_0 : i32, i32
  }
  func.func @transform_3(%arg0: i32) -> (i32, i32) {
    %c0_i32 = arith.constant 0 : i32
    %c0_i32_0 = arith.constant 0 : i32
    %c0_i32_1 = arith.constant 0 : i32
    return %c0_i32, %c0_i32_0 : i32, i32
  }
  func.func @transform_4(%arg0: i32) -> (i32, i32) {
    %c0_i32 = arith.constant 0 : i32
    %c0_i32_0 = arith.constant 0 : i32
    %c0_i32_1 = arith.constant 0 : i32
    return %c0_i32, %c0_i32_0 : i32, i32
  }
  func.func @transform_5(%arg0: i32) -> (i32, i32) {
    %c0_i32 = arith.constant 0 : i32
    %c0_i32_0 = arith.constant 0 : i32
    %c0_i32_1 = arith.constant 0 : i32
    return %c0_i32, %c0_i32_0 : i32, i32
  }
  func.func @transform_6(%arg0: i32) -> (i32, i32) {
    %c0_i32 = arith.constant 0 : i32
    %c0_i32_0 = arith.constant 0 : i32
    %c0_i32_1 = arith.constant 0 : i32
    return %c0_i32, %c0_i32_0 : i32, i32
  }
}

</mosaic_0001>

<bundles_post_ra>
// kernel: separator_forward.1
= control target key start
LH: loop header
LB: loop body
LE: loop exit
PB: predicated region body
PF: predicated region fallthrough
CT: control target
= control target key end

     0   :  { %vm9786_vm2 = vcmask 523264   ;;  %vm13332_vm3 = vmmov 0   ;;  %vm9918_vm4 = vcmask 261120   ;;  %vm10043_vm5 = vcmask 122880   ;;  %s17550_s1 = inlined_call_operand.vmem [shape: bf16[3072,256], index: 1, kind: input, shape index: {}]   ;;  %s17551_s0 = inlined_call_operand.vmem [shape: bf16[16,4608], index: 0, kind: input, shape index: {}]   ;;  %s17552_s2 = inlined_call_operand.vmem [shape: bf16[768,64], index: 2, kind: input, shape index: {}]   ;;  %s17553_s5 = inlined_call_operand.vmem [shape: f32[8,256], index: 5, kind: input, shape index: {}]   ;;  %s17554_s3 = inlined_call_operand.vmem [shape: f32[64,32], index: 3, kind: input, shape index: {}]   ;;  %s17555_s4 = inlined_call_operand.vmem [shape: f32[1,32], index: 4, kind: input, shape index: {}]   ;;  %s17556_s6 = inlined_call_operand.vmem [shape: f32[1,16], index: 6, kind: output, shape index: {}]  }
   0x1   :  { %v11440_v0 = vld [vmem:[%s17550_s1 + $0x74] ss:$8 sps:$4 sm:$0xff]   ;;  %v11444_v2 = vld [vmem:[%s17550_s1 + $0x70] ss:$8 sps:$4 sm:$0xff]   ;;  %v11446_v4 = vld [vmem:[%s17550_s1 + $0x64] ss:$8 sps:$4 sm:$0xff]  }
   0x2   :  { %v11442_v1 = vld [vmem:[%s17550_s1 + $0x174] ss:$8 sps:$4 sm:$0xff]   ;;  %2483 = vmatprep.subr.bf16.mxu0 %v11440_v0  ;;  %v11445_v3 = vld [vmem:[%s17550_s1 + $0x170] ss:$8 sps:$4 sm:$0xff]   ;;  %v11448_v5 = vld [vmem:[%s17550_s1 + $0x164] ss:$8 sps:$4 sm:$0xff]  }
   0x3   :  { %2526 = vmatprep.subr.bf16.mxu1 %v11442_v1  ;;  %2484 = vmatpush1.bf16.msra.mxu0 %v11444_v2  ;;  %v11450_v6 = vld [vmem:[%s17550_s1 + $0x60] ss:$8 sps:$4 sm:$0xff]   ;;  %v11452_v8 = vld [vmem:[%s17550_s1 + $0x54] ss:$8 sps:$4 sm:$0xff]   ;;  %v11456_v10 = vld [vmem:[%s17550_s1 + $0x50] ss:$8 sps:$4 sm:$0xff]  }
   0x4   :  { %2527 = vmatpush1.bf16.msra.mxu1 %v11445_v3  ;;  %2485 = vmatprep.subr.bf16.mxu0 %v11446_v4  ;;  %v11451_v7 = vld [vmem:[%s17550_s1 + $0x160] ss:$8 sps:$4 sm:$0xff]   ;;  %v11454_v9 = vld [vmem:[%s17550_s1 + $0x154] ss:$8 sps:$4 sm:$0xff]   ;;  %v11457_v11 = vld [vmem:[%s17550_s1 + $0x150] ss:$8 sps:$4 sm:$0xff]  }
   0x5   :  { %2528 = vmatprep.subr.bf16.mxu1 %v11448_v5  ;;  %v11458_v12 = vld [vmem:[%s17550_s1 + $0x44] ss:$8 sps:$4 sm:$0xff]   ;;  %v11462_v14 = vld [vmem:[%s17550_s1 + $0x40] ss:$8 sps:$4 sm:$0xff]   ;;  %v11464_v16 = vld [vmem:[%s17550_s1 + $0x34] ss:$8 sps:$4 sm:$0xff]  }
   0x6   :  { %v11460_v13 = vld [vmem:[%s17550_s1 + $0x144] ss:$8 sps:$4 sm:$0xff]   ;;  %v11463_v15 = vld [vmem:[%s17550_s1 + $0x140] ss:$8 sps:$4 sm:$0xff]   ;;  %v11466_v17 = vld [vmem:[%s17550_s1 + $0x134] ss:$8 sps:$4 sm:$0xff]  }
   0x7   :  { %2486 = vmatpush1.bf16.msra.mxu0 %v11450_v6  ;;  %v11468_v18 = vld [vmem:[%s17550_s1 + $0x30] ss:$8 sps:$4 sm:$0xff]   ;;  %v11470_v20 = vld [vmem:[%s17550_s1 + $0x24] ss:$8 sps:$4 sm:$0xff]   ;;  %v11474_v22 = vld [vmem:[%s17550_s1 + $0x20] ss:$8 sps:$4 sm:$0xff]  }
   0x8   :  { %2529 = vmatpush1.bf16.msra.mxu1 %v11451_v7  ;;  %2487 = vmatprep.subr.bf16.mxu0 %v11452_v8  ;;  %v11469_v19 = vld [vmem:[%s17550_s1 + $0x130] ss:$8 sps:$4 sm:$0xff]   ;;  %v11472_v21 = vld [vmem:[%s17550_s1 + $0x124] ss:$8 sps:$4 sm:$0xff]   ;;  %v11475_v23 = vld [vmem:[%s17550_s1 + $0x120] ss:$8 sps:$4 sm:$0xff]  }
   0x9   :  { %2530 = vmatprep.subr.bf16.mxu1 %v11454_v9  ;;  %v11476_v24 = vld [vmem:[%s17550_s1 + $0x14] ss:$8 sps:$4 sm:$0xff]   ;;  %v11480_v26 = vld [vmem:[%s17550_s1 + $0x10] ss:$8 sps:$4 sm:$0xff]   ;;  %v11482_v28 = vld [vmem:[%s17550_s1 + $0x4] ss:$8 sps:$4 sm:$0xff]  }
   0xa   :  { %v11478_v25 = vld [vmem:[%s17550_s1 + $0x114] ss:$8 sps:$4 sm:$0xff]   ;;  %v11481_v27 = vld [vmem:[%s17550_s1 + $0x110] ss:$8 sps:$4 sm:$0xff]   ;;  %v11484_v29 = vld [vmem:[%s17550_s1 + $0x104] ss:$8 sps:$4 sm:$0xff]  }
   0xb   :  { %2488 = vmatpush1.bf16.msra.mxu0 %v11456_v10  ;;  %v11486_v30 = vld [vmem:[%s17550_s1] ss:$8 sps:$4 sm:$0xff]   ;;  %v11488_v32 = vld [vmem:[%s17550_s1 + $0xf4] ss:$8 sps:$4 sm:$0xff]   ;;  %v11492_v34 = vld [vmem:[%s17550_s1 + $0xf0] ss:$8 sps:$4 sm:$0xff]  }
   0xc   :  { %2531 = vmatpush1.bf16.msra.mxu1 %v11457_v11  ;;  %2489 = vmatprep.subr.bf16.mxu0 %v11458_v12  ;;  %v11487_v31 = vld [vmem:[%s17550_s1 + $0x100] ss:$8 sps:$4 sm:$0xff]   ;;  %v11490_v33 = vld [vmem:[%s17550_s1 + $0x1f4] ss:$8 sps:$4 sm:$0xff]   ;;  %v11493_v35 = vld [vmem:[%s17550_s1 + $0x1f0] ss:$8 sps:$4 sm:$0xff]  }
   0xd   :  { %2532 = vmatprep.subr.bf16.mxu1 %v11460_v13  ;;  %v11494_v36 = vld [vmem:[%s17550_s1 + $0xe4] ss:$8 sps:$4 sm:$0xff]   ;;  %v11498_v38 = vld [vmem:[%s17550_s1 + $0xe0] ss:$8 sps:$4 sm:$0xff]   ;;  %v11500_v40 = vld [vmem:[%s17550_s1 + $0xd4] ss:$8 sps:$4 sm:$0xff]  }
   0xe   :  { %v11496_v37 = vld [vmem:[%s17550_s1 + $0x1e4] ss:$8 sps:$4 sm:$0xff]   ;;  %v11499_v39 = vld [vmem:[%s17550_s1 + $0x1e0] ss:$8 sps:$4 sm:$0xff]   ;;  %v11502_v41 = vld [vmem:[%s17550_s1 + $0x1d4] ss:$8 sps:$4 sm:$0xff]  }
   0xf   :  { %2490 = vmatpush1.bf16.msra.mxu0 %v11462_v14  ;;  %v11504_v42 = vld [vmem:[%s17550_s1 + $0xd0] ss:$8 sps:$4 sm:$0xff]   ;;  %v11506_v44 = vld [vmem:[%s17550_s1 + $0xc4] ss:$8 sps:$4 sm:$0xff]   ;;  %v11510_v46 = vld [vmem:[%s17550_s1 + $0xc0] ss:$8 sps:$4 sm:$0xff]  }
  0x10   :  { %2533 = vmatpush1.bf16.msra.mxu1 %v11463_v15  ;;  %2491 = vmatprep.subr.bf16.mxu0 %v11464_v16  ;;  %v11505_v43 = vld [vmem:[%s17550_s1 + $0x1d0] ss:$8 sps:$4 sm:$0xff]   ;;  %v11508_v45 = vld [vmem:[%s17550_s1 + $0x1c4] ss:$8 sps:$4 sm:$0xff]   ;;  %v11511_v47 = vld [vmem:[%s17550_s1 + $0x1c0] ss:$8 sps:$4 sm:$0xff]  }
  0x11   :  { %2534 = vmatprep.subr.bf16.mxu1 %v11466_v17  ;;  %v11512_v48 = vld [vmem:[%s17550_s1 + $0xb4] ss:$8 sps:$4 sm:$0xff]   ;;  %v11516_v52 = vld [vmem:[%s17550_s1 + $0xb0] ss:$8 sps:$4 sm:$0xff]   ;;  %v11518_v54 = vld [vmem:[%s17550_s1 + $0xa4] ss:$8 sps:$4 sm:$0xff]  }
  0x12   :  { %v11538_v49 = vld [vmem:[%s17551_s0 + $0x4] ss:$144 sps:$4 sm:$0xff]   ;;  %v11541_v51 = vld [vmem:[%s17551_s0 + $0xc] ss:$144 sps:$4 sm:$0xff]   ;;  %v11517_v53 = vld [vmem:[%s17550_s1 + $0x1b0] ss:$8 sps:$4 sm:$0xff]  }
  0x13   :  { %2492 = vmatpush1.bf16.msra.mxu0 %v11468_v18  ;;  %v11514_v50 = vld [vmem:[%s17550_s1 + $0x1b4] ss:$8 sps:$4 sm:$0xff]   ;;  %2515 = vmatprep.mubr.bf16.mxu0 %v11538_v49  ;;  %v11520_v55 = vld [vmem:[%s17550_s1 + $0x1a4] ss:$8 sps:$4 sm:$0xff]   ;;  %v11522_v56 = vld [vmem:[%s17550_s1 + $0xa0] ss:$8 sps:$4 sm:$0xff]  }
  0x14   :  { %2535 = vmatpush1.bf16.msra.mxu1 %v11469_v19  ;;  %2493 = vmatprep.subr.bf16.mxu0 %v11470_v20  ;;  %v11523_v57 = vld [vmem:[%s17550_s1 + $0x1a0] ss:$8 sps:$4 sm:$0xff]   ;;  %v11524_v58 = vld [vmem:[%s17550_s1 + $0x94] ss:$8 sps:$4 sm:$0xff]   ;;  %v11528_v60 = vld [vmem:[%s17550_s1 + $0x90] ss:$8 sps:$4 sm:$0xff]  }
  0x15   :  { %2536 = vmatprep.subr.bf16.mxu1 %v11472_v21  ;;  %2558 = vmatprep.mubr.bf16.mxu1 %v11541_v51  ;;  %v11526_v59 = vld [vmem:[%s17550_s1 + $0x194] ss:$8 sps:$4 sm:$0xff]   ;;  %v11529_v61 = vld [vmem:[%s17550_s1 + $0x190] ss:$8 sps:$4 sm:$0xff]   ;;  %v11530_v62 = vld [vmem:[%s17550_s1 + $0x84] ss:$8 sps:$4 sm:$0xff]  }
  0x16   :  { %v11532_v63 = vld [vmem:[%s17550_s1 + $0x184] ss:$8 sps:$4 sm:$0xff]   ;;  %v11534_v0 = vld [vmem:[%s17550_s1 + $0x80] ss:$8 sps:$4 sm:$0xff]   ;;  %v11544_v2 = vld [vmem:[%s17550_s1 + $0x274] ss:$8 sps:$4 sm:$0xff]  }
  0x17   :  { %2494 = vmatpush1.bf16.msra.mxu0 %v11474_v22  ;;  %v11535_v1 = vld [vmem:[%s17550_s1 + $0x180] ss:$8 sps:$4 sm:$0xff]   ;;  %v11547_v3 = vld [vmem:[%s17550_s1 + $0x374] ss:$8 sps:$4 sm:$0xff]   ;;  %v11542_v6 = vld [vmem:[%s17550_s1 + $0x270] ss:$8 sps:$4 sm:$0xff]  }
  0x18   :  { %2537 = vmatpush1.bf16.msra.mxu1 %v11475_v23  ;;  %2495 = vmatprep.subr.bf16.mxu0 %v11476_v24  ;;  %v11536_v4 = vld [vmem:[%s17551_s0] ss:$144 sps:$4 sm:$0xff]   ;;  %v11539_v5 = vld [vmem:[%s17551_s0 + $0x8] ss:$144 sps:$4 sm:$0xff]   ;;  %v11550_v8 = vld [vmem:[%s17550_s1 + $0x264] ss:$8 sps:$4 sm:$0xff]  }
  0x19   :  { %2538 = vmatprep.subr.bf16.mxu1 %v11478_v25  ;;  %v11545_v7 = vld [vmem:[%s17550_s1 + $0x370] ss:$8 sps:$4 sm:$0xff]   ;;  %v11553_v9 = vld [vmem:[%s17550_s1 + $0x364] ss:$8 sps:$4 sm:$0xff]   ;;  %v11548_v10 = vld [vmem:[%s17550_s1 + $0x260] ss:$8 sps:$4 sm:$0xff]  }
  0x1a   :  { %v11551_v11 = vld [vmem:[%s17550_s1 + $0x360] ss:$8 sps:$4 sm:$0xff]   ;;  %v11556_v12 = vld [vmem:[%s17550_s1 + $0x254] ss:$8 sps:$4 sm:$0xff]   ;;  %v11554_v14 = vld [vmem:[%s17550_s1 + $0x250] ss:$8 sps:$4 sm:$0xff]  }
  0x1b   :  { %2496 = vmatpush1.bf16.msra.mxu0 %v11480_v26  ;;  %v11559_v13 = vld [vmem:[%s17550_s1 + $0x354] ss:$8 sps:$4 sm:$0xff]   ;;  %v11557_v15 = vld [vmem:[%s17550_s1 + $0x350] ss:$8 sps:$4 sm:$0xff]   ;;  %v11562_v16 = vld [vmem:[%s17550_s1 + $0x244] ss:$8 sps:$4 sm:$0xff]  }
  0x1c   :  { %2539 = vmatpush1.bf16.msra.mxu1 %v11481_v27  ;;  %2497 = vmatprep.subr.bf16.mxu0 %v11482_v28  ;;  %v11565_v17 = vld [vmem:[%s17550_s1 + $0x344] ss:$8 sps:$4 sm:$0xff]   ;;  %v11560_v18 = vld [vmem:[%s17550_s1 + $0x240] ss:$8 sps:$4 sm:$0xff]   ;;  %v11568_v20 = vld [vmem:[%s17550_s1 + $0x234] ss:$8 sps:$4 sm:$0xff]  }
  0x1d   :  { %2540 = vmatprep.subr.bf16.mxu1 %v11484_v29  ;;  %v11563_v19 = vld [vmem:[%s17550_s1 + $0x340] ss:$8 sps:$4 sm:$0xff]   ;;  %v11571_v21 = vld [vmem:[%s17550_s1 + $0x334] ss:$8 sps:$4 sm:$0xff]   ;;  %v11566_v22 = vld [vmem:[%s17550_s1 + $0x230] ss:$8 sps:$4 sm:$0xff]  }
  0x1e   :  { %v11569_v23 = vld [vmem:[%s17550_s1 + $0x330] ss:$8 sps:$4 sm:$0xff]   ;;  %v11574_v24 = vld [vmem:[%s17550_s1 + $0x224] ss:$8 sps:$4 sm:$0xff]   ;;  %v11572_v26 = vld [vmem:[%s17550_s1 + $0x220] ss:$8 sps:$4 sm:$0xff]  }
  0x1f   :  { %2498 = vmatpush1.bf16.msra.mxu0 %v11486_v30  ;;  %v11577_v25 = vld [vmem:[%s17550_s1 + $0x324] ss:$8 sps:$4 sm:$0xff]   ;;  %v11575_v27 = vld [vmem:[%s17550_s1 + $0x320] ss:$8 sps:$4 sm:$0xff]   ;;  %v11580_v28 = vld [vmem:[%s17550_s1 + $0x214] ss:$8 sps:$4 sm:$0xff]  }
  0x20   :  { %2541 = vmatpush1.bf16.msra.mxu1 %v11487_v31  ;;  %2499 = vmatprep.subr.bf16.mxu0 %v11488_v32  ;;  %v11583_v29 = vld [vmem:[%s17550_s1 + $0x314] ss:$8 sps:$4 sm:$0xff]   ;;  %v11578_v30 = vld [vmem:[%s17550_s1 + $0x210] ss:$8 sps:$4 sm:$0xff]   ;;  %v11586_v32 = vld [vmem:[%s17550_s1 + $0x204] ss:$8 sps:$4 sm:$0xff]  }
  0x21   :  { %2542 = vmatprep.subr.bf16.mxu1 %v11490_v33  ;;  %v11581_v31 = vld [vmem:[%s17550_s1 + $0x310] ss:$8 sps:$4 sm:$0xff]   ;;  %v11589_v33 = vld [vmem:[%s17550_s1 + $0x304] ss:$8 sps:$4 sm:$0xff]  }
  0x22   :  { %v11605_v49 = vld [vmem:[%s17550_s1 + $0x3d0] ss:$8 sps:$4 sm:$0xff]   ;;  %v11613_v51 = vld [vmem:[%s17550_s1 + $0x3c4] ss:$8 sps:$4 sm:$0xff]  }
  0x23   :  { %2500 = vmatpush2.bf16.msra.mxu0 %v11492_v34  ;;  %v11640_v34 = vld [vmem:[%s17551_s0 + $0x14] ss:$144 sps:$4 sm:$0xff]  }
  0x24   :  { %2543 = vmatpush2.bf16.msra.mxu1 %v11493_v35  ;;  %2501 = vmatprep.subr.bf16.mxu0 %v11494_v36  ;;  %v11643_v35 = vld [vmem:[%s17551_s0 + $0x1c] ss:$144 sps:$4 sm:$0xff]   ;;  %v11584_v36 = vld [vmem:[%s17550_s1 + $0x200] ss:$8 sps:$4 sm:$0xff]  }
  0x25   :  { %2544 = vmatprep.subr.bf16.mxu1 %v11496_v37  ;;  %v11587_v37 = vld [vmem:[%s17550_s1 + $0x300] ss:$8 sps:$4 sm:$0xff]  }
  0x27   :  { %2502 = vmatpush2.bf16.msra.mxu0 %v11498_v38  ;;  %v11592_v38 = vld [vmem:[%s17550_s1 + $0x2f4] ss:$8 sps:$4 sm:$0xff]  }
  0x28   :  { %2545 = vmatpush2.bf16.msra.mxu1 %v11499_v39  ;;  %2503 = vmatprep.subr.bf16.mxu0 %v11500_v40  ;;  %v11595_v39 = vld [vmem:[%s17550_s1 + $0x3f4] ss:$8 sps:$4 sm:$0xff]   ;;  %v11590_v40 = vld [vmem:[%s17550_s1 + $0x2f0] ss:$8 sps:$4 sm:$0xff]  }
  0x29   :  { %2546 = vmatprep.subr.bf16.mxu1 %v11502_v41  ;;  %v11593_v41 = vld [vmem:[%s17550_s1 + $0x3f0] ss:$8 sps:$4 sm:$0xff]  }
  0x2b   :  { %2504 = vmatpush2.bf16.msra.mxu0 %v11504_v42  ;;  %v11598_v42 = vld [vmem:[%s17550_s1 + $0x2e4] ss:$8 sps:$4 sm:$0xff]  }
  0x2c   :  { %2547 = vmatpush2.bf16.msra.mxu1 %v11505_v43  ;;  %2505 = vmatprep.subr.bf16.mxu0 %v11506_v44  ;;  %v11601_v43 = vld [vmem:[%s17550_s1 + $0x3e4] ss:$8 sps:$4 sm:$0xff]   ;;  %v11596_v44 = vld [vmem:[%s17550_s1 + $0x2e0] ss:$8 sps:$4 sm:$0xff]  }
  0x2d   :  { %2548 = vmatprep.subr.bf16.mxu1 %v11508_v45  ;;  %v11599_v45 = vld [vmem:[%s17550_s1 + $0x3e0] ss:$8 sps:$4 sm:$0xff]  }
  0x2f   :  { %2506 = vmatpush2.bf16.msra.mxu0 %v11510_v46  ;;  %v11604_v46 = vld [vmem:[%s17550_s1 + $0x2d4] ss:$8 sps:$4 sm:$0xff]  }
  0x30   :  { %2549 = vmatpush2.bf16.msra.mxu1 %v11511_v47  ;;  %2507 = vmatprep.subr.bf16.mxu0 %v11512_v48  ;;  %v11607_v47 = vld [vmem:[%s17550_s1 + $0x3d4] ss:$8 sps:$4 sm:$0xff]   ;;  %v11602_v48 = vld [vmem:[%s17550_s1 + $0x2d0] ss:$8 sps:$4 sm:$0xff]  }
  0x31   :  { %2550 = vmatprep.subr.bf16.mxu1 %v11514_v50  ;;  %v11610_v50 = vld [vmem:[%s17550_s1 + $0x2c4] ss:$8 sps:$4 sm:$0xff]  }
  0x33   :  { %2508 = vmatpush2.bf16.msra.mxu0 %v11516_v52  ;;  %v11608_v52 = vld [vmem:[%s17550_s1 + $0x2c0] ss:$8 sps:$4 sm:$0xff]  }
  0x34   :  { %2551 = vmatpush2.bf16.msra.mxu1 %v11517_v53  ;;  %2509 = vmatprep.subr.bf16.mxu0 %v11518_v54  ;;  %v11611_v53 = vld [vmem:[%s17550_s1 + $0x3c0] ss:$8 sps:$4 sm:$0xff]   ;;  %v11616_v54 = vld [vmem:[%s17550_s1 + $0x2b4] ss:$8 sps:$4 sm:$0xff]  }
  0x35   :  { %2552 = vmatprep.subr.bf16.mxu1 %v11520_v55  ;;  %v11619_v55 = vld [vmem:[%s17550_s1 + $0x3b4] ss:$8 sps:$4 sm:$0xff]  }
  0x37   :  { %2510 = vmatpush2.bf16.msra.mxu0 %v11522_v56  ;;  %v11614_v56 = vld [vmem:[%s17550_s1 + $0x2b0] ss:$8 sps:$4 sm:$0xff]  }
  0x38   :  { %2553 = vmatpush2.bf16.msra.mxu1 %v11523_v57  ;;  %2511 = vmatprep.subr.bf16.mxu0 %v11524_v58  ;;  %v11617_v57 = vld [vmem:[%s17550_s1 + $0x3b0] ss:$8 sps:$4 sm:$0xff]   ;;  %v11622_v58 = vld [vmem:[%s17550_s1 + $0x2a4] ss:$8 sps:$4 sm:$0xff]  }
  0x39   :  { %2554 = vmatprep.subr.bf16.mxu1 %v11526_v59  ;;  %v11625_v59 = vld [vmem:[%s17550_s1 + $0x3a4] ss:$8 sps:$4 sm:$0xff]  }
  0x3b   :  { %2512 = vmatpush2.bf16.msra.mxu0 %v11528_v60  ;;  %v11620_v60 = vld [vmem:[%s17550_s1 + $0x2a0] ss:$8 sps:$4 sm:$0xff]  }
  0x3c   :  { %2555 = vmatpush2.bf16.msra.mxu1 %v11529_v61  ;;  %2513 = vmatprep.subr.bf16.mxu0 %v11530_v62  ;;  %v11623_v61 = vld [vmem:[%s17550_s1 + $0x3a0] ss:$8 sps:$4 sm:$0xff]   ;;  %v11628_v62 = vld [vmem:[%s17550_s1 + $0x294] ss:$8 sps:$4 sm:$0xff]  }
  0x3d   :  { %2556 = vmatprep.subr.bf16.mxu1 %v11532_v63  ;;  %v11631_v63 = vld [vmem:[%s17550_s1 + $0x394] ss:$8 sps:$4 sm:$0xff]  }
  0x3f   :  { %2514 = vmatpush2.bf16.msra.mxu0 %v11534_v0  ;;  %v11626_v0 = vld [vmem:[%s17550_s1 + $0x290] ss:$8 sps:$4 sm:$0xff]  }
  0x40   :  { %2557 = vmatpush2.bf16.msra.mxu1 %v11535_v1  ;;  %2569 = vmatprep.subr.bf16.mxu0 %v11544_v2  ;;  %v11629_v1 = vld [vmem:[%s17550_s1 + $0x390] ss:$8 sps:$4 sm:$0xff]   ;;  %v11634_v2 = vld [vmem:[%s17550_s1 + $0x284] ss:$8 sps:$4 sm:$0xff]  }
  0x41   :  { %2612 = vmatprep.subr.bf16.mxu1 %v11547_v3  ;;  %v11637_v3 = vld [vmem:[%s17550_s1 + $0x384] ss:$8 sps:$4 sm:$0xff]  }
  0x42   :  { %2516 = vmatmul.mubr.bf16.vlgmr.msra.gmra.mxu0 %v11536_v4  ;;  %v11632_v4 = vld [vmem:[%s17550_s1 + $0x280] ss:$8 sps:$4 sm:$0xff]  }
  0x43   :  { %2559 = vmatmul.mubr.bf16.vlgmr.msra.gmra.mxu1 %v11539_v5  ;;  %2570 = vmatpush1.bf16.msra.mxu0 %v11542_v6  ;;  %v11635_v5 = vld [vmem:[%s17550_s1 + $0x380] ss:$8 sps:$4 sm:$0xff]   ;;  %v11646_v6 = vld [vmem:[%s17550_s1 + $0x474] ss:$8 sps:$4 sm:$0xff]  }
  0x44   :  { %2613 = vmatpush1.bf16.msra.mxu1 %v11545_v7  ;;  %2571 = vmatprep.subr.bf16.mxu0 %v11550_v8  ;;  %v11649_v7 = vld [vmem:[%s17550_s1 + $0x574] ss:$8 sps:$4 sm:$0xff]   ;;  %v11638_v8 = vld [vmem:[%s17551_s0 + $0x10] ss:$144 sps:$4 sm:$0xff]  }
  0x45   :  { %2614 = vmatprep.subr.bf16.mxu1 %v11553_v9  ;;  %2601 = vmatprep.mubr.bf16.mxu0 %v11640_v34  ;;  %v11641_v9 = vld [vmem:[%s17551_s0 + $0x18] ss:$144 sps:$4 sm:$0xff]   ;;  %v11682_v34 = vld [vmem:[%s17550_s1 + $0x414] ss:$8 sps:$4 sm:$0xff]  }
  0x46   :  { %2644 = vmatprep.mubr.bf16.mxu1 %v11643_v35  ;;  %v11685_v35 = vld [vmem:[%s17550_s1 + $0x514] ss:$8 sps:$4 sm:$0xff]  }
  0x47   :  { %2572 = vmatpush1.bf16.msra.mxu0 %v11548_v10  ;;  %v11644_v10 = vld [vmem:[%s17550_s1 + $0x470] ss:$8 sps:$4 sm:$0xff]  }
  0x48   :  { %2615 = vmatpush1.bf16.msra.mxu1 %v11551_v11  ;;  %2573 = vmatprep.subr.bf16.mxu0 %v11556_v12  ;;  %v11647_v11 = vld [vmem:[%s17550_s1 + $0x570] ss:$8 sps:$4 sm:$0xff]   ;;  %v11652_v12 = vld [vmem:[%s17550_s1 + $0x464] ss:$8 sps:$4 sm:$0xff]  }
  0x49   :  { %2616 = vmatprep.subr.bf16.mxu1 %v11559_v13  ;;  %v11655_v13 = vld [vmem:[%s17550_s1 + $0x564] ss:$8 sps:$4 sm:$0xff]  }
  0x4b   :  { %2574 = vmatpush1.bf16.msra.mxu0 %v11554_v14  ;;  %v11650_v14 = vld [vmem:[%s17550_s1 + $0x460] ss:$8 sps:$4 sm:$0xff]  }
  0x4c   :  { %2617 = vmatpush1.bf16.msra.mxu1 %v11557_v15  ;;  %2575 = vmatprep.subr.bf16.mxu0 %v11562_v16  ;;  %v11653_v15 = vld [vmem:[%s17550_s1 + $0x560] ss:$8 sps:$4 sm:$0xff]   ;;  %v11658_v16 = vld [vmem:[%s17550_s1 + $0x454] ss:$8 sps:$4 sm:$0xff]  }
  0x4d   :  { %2618 = vmatprep.subr.bf16.mxu1 %v11565_v17  ;;  %v11661_v17 = vld [vmem:[%s17550_s1 + $0x554] ss:$8 sps:$4 sm:$0xff]  }
  0x4f   :  { %2576 = vmatpush1.bf16.msra.mxu0 %v11560_v18  ;;  %v11656_v18 = vld [vmem:[%s17550_s1 + $0x450] ss:$8 sps:$4 sm:$0xff]  }
  0x50   :  { %2619 = vmatpush1.bf16.msra.mxu1 %v11563_v19  ;;  %2577 = vmatprep.subr.bf16.mxu0 %v11568_v20  ;;  %v11742_v19 = vld [vmem:[%s17551_s0 + $0x24] ss:$144 sps:$4 sm:$0xff]   ;;  %v11659_v20 = vld [vmem:[%s17550_s1 + $0x550] ss:$8 sps:$4 sm:$0xff]  }
  0x51   :  { %2620 = vmatprep.subr.bf16.mxu1 %v11571_v21  ;;  %v11745_v21 = vld [vmem:[%s17551_s0 + $0x2c] ss:$144 sps:$4 sm:$0xff]  }
  0x53   :  { %2578 = vmatpush1.bf16.msra.mxu0 %v11566_v22  ;;  %v11664_v22 = vld [vmem:[%s17550_s1 + $0x444] ss:$8 sps:$4 sm:$0xff]  }
  0x54   :  { %2621 = vmatpush1.bf16.msra.mxu1 %v11569_v23  ;;  %2579 = vmatprep.subr.bf16.mxu0 %v11574_v24  ;;  %v11667_v23 = vld [vmem:[%s17550_s1 + $0x544] ss:$8 sps:$4 sm:$0xff]   ;;  %v11662_v24 = vld [vmem:[%s17550_s1 + $0x440] ss:$8 sps:$4 sm:$0xff]  }
  0x55   :  { %2622 = vmatprep.subr.bf16.mxu1 %v11577_v25  ;;  %v11665_v25 = vld [vmem:[%s17550_s1 + $0x540] ss:$8 sps:$4 sm:$0xff]  }
  0x57   :  { %2580 = vmatpush1.bf16.msra.mxu0 %v11572_v26  ;;  %v11670_v26 = vld [vmem:[%s17550_s1 + $0x434] ss:$8 sps:$4 sm:$0xff]  }
  0x58   :  { %2623 = vmatpush1.bf16.msra.mxu1 %v11575_v27  ;;  %2581 = vmatprep.subr.bf16.mxu0 %v11580_v28  ;;  %v11673_v27 = vld [vmem:[%s17550_s1 + $0x534] ss:$8 sps:$4 sm:$0xff]   ;;  %v11668_v28 = vld [vmem:[%s17550_s1 + $0x430] ss:$8 sps:$4 sm:$0xff]  }
  0x59   :  { %2624 = vmatprep.subr.bf16.mxu1 %v11583_v29  ;;  %v11671_v29 = vld [vmem:[%s17550_s1 + $0x530] ss:$8 sps:$4 sm:$0xff]  }
  0x5b   :  { %2582 = vmatpush1.bf16.msra.mxu0 %v11578_v30  ;;  %v11676_v30 = vld [vmem:[%s17550_s1 + $0x424] ss:$8 sps:$4 sm:$0xff]  }
  0x5c   :  { %2625 = vmatpush1.bf16.msra.mxu1 %v11581_v31  ;;  %2583 = vmatprep.subr.bf16.mxu0 %v11586_v32  ;;  %v11679_v31 = vld [vmem:[%s17550_s1 + $0x524] ss:$8 sps:$4 sm:$0xff]   ;;  %v11674_v32 = vld [vmem:[%s17550_s1 + $0x420] ss:$8 sps:$4 sm:$0xff]  }
  0x5d   :  { %2626 = vmatprep.subr.bf16.mxu1 %v11589_v33  ;;  %v11677_v33 = vld [vmem:[%s17550_s1 + $0x520] ss:$8 sps:$4 sm:$0xff]  }
  0x5f   :  { %2584 = vmatpush1.bf16.msra.mxu0 %v11584_v36  ;;  %v11680_v36 = vld [vmem:[%s17550_s1 + $0x410] ss:$8 sps:$4 sm:$0xff]  }
  0x60   :  { %2627 = vmatpush1.bf16.msra.mxu1 %v11587_v37  ;;  %2585 = vmatprep.subr.bf16.mxu0 %v11592_v38  ;;  %v11683_v37 = vld [vmem:[%s17550_s1 + $0x510] ss:$8 sps:$4 sm:$0xff]   ;;  %v11688_v38 = vld [vmem:[%s17550_s1 + $0x404] ss:$8 sps:$4 sm:$0xff]  }
  0x61   :  { %2628 = vmatprep.subr.bf16.mxu1 %v11595_v39  ;;  %v11691_v39 = vld [vmem:[%s17550_s1 + $0x504] ss:$8 sps:$4 sm:$0xff]  }
  0x63   :  { %2586 = vmatpush2.bf16.msra.mxu0 %v11590_v40  ;;  %v11686_v40 = vld [vmem:[%s17550_s1 + $0x400] ss:$8 sps:$4 sm:$0xff]  }
  0x64   :  { %2629 = vmatpush2.bf16.msra.mxu1 %v11593_v41  ;;  %2587 = vmatprep.subr.bf16.mxu0 %v11598_v42  ;;  %v11689_v41 = vld [vmem:[%s17550_s1 + $0x500] ss:$8 sps:$4 sm:$0xff]   ;;  %v11694_v42 = vld [vmem:[%s17550_s1 + $0x4f4] ss:$8 sps:$4 sm:$0xff]  }
  0x65   :  { %2630 = vmatprep.subr.bf16.mxu1 %v11601_v43  ;;  %v11697_v43 = vld [vmem:[%s17550_s1 + $0x5f4] ss:$8 sps:$4 sm:$0xff]  }
  0x67   :  { %2588 = vmatpush2.bf16.msra.mxu0 %v11596_v44  ;;  %v11692_v44 = vld [vmem:[%s17550_s1 + $0x4f0] ss:$8 sps:$4 sm:$0xff]  }
  0x68   :  { %2631 = vmatpush2.bf16.msra.mxu1 %v11599_v45  ;;  %2589 = vmatprep.subr.bf16.mxu0 %v11604_v46  ;;  %v11695_v45 = vld [vmem:[%s17550_s1 + $0x5f0] ss:$8 sps:$4 sm:$0xff]   ;;  %v11700_v46 = vld [vmem:[%s17550_s1 + $0x4e4] ss:$8 sps:$4 sm:$0xff]  }
  0x69   :  { %2632 = vmatprep.subr.bf16.mxu1 %v11607_v47  ;;  %v11703_v47 = vld [vmem:[%s17550_s1 + $0x5e4] ss:$8 sps:$4 sm:$0xff]  }
  0x6b   :  { %2590 = vmatpush2.bf16.msra.mxu0 %v11602_v48  ;;  %v11698_v48 = vld [vmem:[%s17550_s1 + $0x4e0] ss:$8 sps:$4 sm:$0xff]  }
  0x6c   :  { %2633 = vmatpush2.bf16.msra.mxu1 %v11605_v49  ;;  %2591 = vmatprep.subr.bf16.mxu0 %v11610_v50  ;;  %v11701_v49 = vld [vmem:[%s17550_s1 + $0x5e0] ss:$8 sps:$4 sm:$0xff]   ;;  %v11706_v50 = vld [vmem:[%s17550_s1 + $0x4d4] ss:$8 sps:$4 sm:$0xff]  }
  0x6d   :  { %2634 = vmatprep.subr.bf16.mxu1 %v11613_v51  ;;  %v11709_v51 = vld [vmem:[%s17550_s1 + $0x5d4] ss:$8 sps:$4 sm:$0xff]  }
  0x6f   :  { %2592 = vmatpush2.bf16.msra.mxu0 %v11608_v52  ;;  %v11704_v52 = vld [vmem:[%s17550_s1 + $0x4d0] ss:$8 sps:$4 sm:$0xff]  }
  0x70   :  { %2635 = vmatpush2.bf16.msra.mxu1 %v11611_v53  ;;  %2593 = vmatprep.subr.bf16.mxu0 %v11616_v54  ;;  %v11707_v53 = vld [vmem:[%s17550_s1 + $0x5d0] ss:$8 sps:$4 sm:$0xff]   ;;  %v11712_v54 = vld [vmem:[%s17550_s1 + $0x4c4] ss:$8 sps:$4 sm:$0xff]  }
  0x71   :  { %2636 = vmatprep.subr.bf16.mxu1 %v11619_v55  ;;  %v11715_v55 = vld [vmem:[%s17550_s1 + $0x5c4] ss:$8 sps:$4 sm:$0xff]  }
  0x73   :  { %2594 = vmatpush2.bf16.msra.mxu0 %v11614_v56  ;;  %v11710_v56 = vld [vmem:[%s17550_s1 + $0x4c0] ss:$8 sps:$4 sm:$0xff]  }
  0x74   :  { %2637 = vmatpush2.bf16.msra.mxu1 %v11617_v57  ;;  %2595 = vmatprep.subr.bf16.mxu0 %v11622_v58  ;;  %v11713_v57 = vld [vmem:[%s17550_s1 + $0x5c0] ss:$8 sps:$4 sm:$0xff]   ;;  %v11718_v58 = vld [vmem:[%s17550_s1 + $0x4b4] ss:$8 sps:$4 sm:$0xff]  }
  0x75   :  { %2638 = vmatprep.subr.bf16.mxu1 %v11625_v59  ;;  %v11721_v59 = vld [vmem:[%s17550_s1 + $0x5b4] ss:$8 sps:$4 sm:$0xff]  }
  0x77   :  { %2596 = vmatpush2.bf16.msra.mxu0 %v11620_v60  ;;  %v11716_v60 = vld [vmem:[%s17550_s1 + $0x4b0] ss:$8 sps:$4 sm:$0xff]  }
  0x78   :  { %2639 = vmatpush2.bf16.msra.mxu1 %v11623_v61  ;;  %2597 = vmatprep.subr.bf16.mxu0 %v11628_v62  ;;  %v11719_v61 = vld [vmem:[%s17550_s1 + $0x5b0] ss:$8 sps:$4 sm:$0xff]   ;;  %v11724_v62 = vld [vmem:[%s17550_s1 + $0x4a4] ss:$8 sps:$4 sm:$0xff]  }
  0x79   :  { %2640 = vmatprep.subr.bf16.mxu1 %v11631_v63  ;;  %v11727_v63 = vld [vmem:[%s17550_s1 + $0x5a4] ss:$8 sps:$4 sm:$0xff]  }
  0x7b   :  { %2598 = vmatpush2.bf16.msra.mxu0 %v11626_v0  ;;  %v11722_v0 = vld [vmem:[%s17550_s1 + $0x4a0] ss:$8 sps:$4 sm:$0xff]  }
  0x7c   :  { %2641 = vmatpush2.bf16.msra.mxu1 %v11629_v1  ;;  %2599 = vmatprep.subr.bf16.mxu0 %v11634_v2  ;;  %v11725_v1 = vld [vmem:[%s17550_s1 + $0x5a0] ss:$8 sps:$4 sm:$0xff]   ;;  %v11730_v2 = vld [vmem:[%s17550_s1 + $0x494] ss:$8 sps:$4 sm:$0xff]  }
  0x7d   :  { %2642 = vmatprep.subr.bf16.mxu1 %v11637_v3  ;;  %v11733_v3 = vld [vmem:[%s17550_s1 + $0x594] ss:$8 sps:$4 sm:$0xff]  }
  0x7f   :  { %2600 = vmatpush2.bf16.msra.mxu0 %v11632_v4  ;;  %v11728_v4 = vld [vmem:[%s17550_s1 + $0x490] ss:$8 sps:$4 sm:$0xff]  }
  0x80   :  { %2643 = vmatpush2.bf16.msra.mxu1 %v11635_v5  ;;  %2655 = vmatprep.subr.bf16.mxu0 %v11646_v6  ;;  %v11731_v5 = vld [vmem:[%s17550_s1 + $0x590] ss:$8 sps:$4 sm:$0xff]   ;;  %v11736_v6 = vld [vmem:[%s17550_s1 + $0x484] ss:$8 sps:$4 sm:$0xff]  }
  0x81   :  { %2698 = vmatprep.subr.bf16.mxu1 %v11649_v7  ;;  %v11739_v7 = vld [vmem:[%s17550_s1 + $0x584] ss:$8 sps:$4 sm:$0xff]  }
  0x82   :  { %2602 = vmatmul.mubr.bf16.vlgmr.msra.gmra.mxu0 %v11638_v8  ;;  %v11734_v8 = vld [vmem:[%s17550_s1 + $0x480] ss:$8 sps:$4 sm:$0xff]  }
  0x83   :  { %2645 = vmatmul.mubr.bf16.vlgmr.msra.gmra.mxu1 %v11641_v9  ;;  %2656 = vmatpush1.bf16.msra.mxu0 %v11644_v10  ;;  %v11737_v9 = vld [vmem:[%s17550_s1 + $0x580] ss:$8 sps:$4 sm:$0xff]   ;;  %v11748_v10 = vld [vmem:[%s17550_s1 + $0x674] ss:$8 sps:$4 sm:$0xff]  }
  0x84   :  { %2699 = vmatpush1.bf16.msra.mxu1 %v11647_v11  ;;  %2657 = vmatprep.subr.bf16.mxu0 %v11652_v12  ;;  %v11751_v11 = vld [vmem:[%s17550_s1 + $0x774] ss:$8 sps:$4 sm:$0xff]   ;;  %v11740_v12 = vld [vmem:[%s17551_s0 + $0x20] ss:$144 sps:$4 sm:$0xff]  }
  0x85   :  { %2700 = vmatprep.subr.bf16.mxu1 %v11655_v13  ;;  %2687 = vmatprep.mubr.bf16.mxu0 %v11742_v19  ;;  %v11743_v13 = vld [vmem:[%s17551_s0 + $0x28] ss:$144 sps:$4 sm:$0xff]   ;;  %v11847_v19 = vld [vmem:[%s17551_s0 + $0x3c] ss:$144 sps:$4 sm:$0xff]  }
  0x86   :  { %2730 = vmatprep.mubr.bf16.mxu1 %v11745_v21  ;;  %v11755_v21 = vld [vmem:[%s17550_s1 + $0x760] ss:$8 sps:$4 sm:$0xff]  }
  0x87   :  { %2658 = vmatpush1.bf16.msra.mxu0 %v11650_v14  ;;  %v11746_v14 = vld [vmem:[%s17550_s1 + $0x670] ss:$8 sps:$4 sm:$0xff]  }
  0x88   :  { %2701 = vmatpush1.bf16.msra.mxu1 %v11653_v15  ;;  %2659 = vmatprep.subr.bf16.mxu0 %v11658_v16  ;;  %v11749_v15 = vld [vmem:[%s17550_s1 + $0x770] ss:$8 sps:$4 sm:$0xff]   ;;  %v11754_v16 = vld [vmem:[%s17550_s1 + $0x664] ss:$8 sps:$4 sm:$0xff]  }
  0x89   :  { %2702 = vmatprep.subr.bf16.mxu1 %v11661_v17  ;;  %v11757_v17 = vld [vmem:[%s17550_s1 + $0x764] ss:$8 sps:$4 sm:$0xff]  }
  0x8b   :  { %2660 = vmatpush1.bf16.msra.mxu0 %v11656_v18  ;;  %v11844_v18 = vld [vmem:[%s17551_s0 + $0x34] ss:$144 sps:$4 sm:$0xff]  }
  0x8c   :  { %2703 = vmatpush1.bf16.msra.mxu1 %v11659_v20  ;;  %2661 = vmatprep.subr.bf16.mxu0 %v11664_v22  ;;  %v11752_v20 = vld [vmem:[%s17550_s1 + $0x660] ss:$8 sps:$4 sm:$0xff]   ;;  %v11760_v22 = vld [vmem:[%s17550_s1 + $0x654] ss:$8 sps:$4 sm:$0xff]  }
  0x8d   :  { %2704 = vmatprep.subr.bf16.mxu1 %v11667_v23  ;;  %v11763_v23 = vld [vmem:[%s17550_s1 + $0x754] ss:$8 sps:$4 sm:$0xff]  }
  0x8f   :  { %2662 = vmatpush1.bf16.msra.mxu0 %v11662_v24  ;;  %v11758_v24 = vld [vmem:[%s17550_s1 + $0x650] ss:$8 sps:$4 sm:$0xff]  }
  0x90   :  { %2705 = vmatpush1.bf16.msra.mxu1 %v11665_v25  ;;  %2663 = vmatprep.subr.bf16.mxu0 %v11670_v26  ;;  %v11761_v25 = vld [vmem:[%s17550_s1 + $0x750] ss:$8 sps:$4 sm:$0xff]   ;;  %v11766_v26 = vld [vmem:[%s17550_s1 + $0x644] ss:$8 sps:$4 sm:$0xff]  }
  0x91   :  { %2706 = vmatprep.subr.bf16.mxu1 %v11673_v27  ;;  %v11769_v27 = vld [vmem:[%s17550_s1 + $0x744] ss:$8 sps:$4 sm:$0xff]  }
  0x93   :  { %2664 = vmatpush1.bf16.msra.mxu0 %v11668_v28  ;;  %v11764_v28 = vld [vmem:[%s17550_s1 + $0x640] ss:$8 sps:$4 sm:$0xff]  }
  0x94   :  { %2707 = vmatpush1.bf16.msra.mxu1 %v11671_v29  ;;  %2665 = vmatprep.subr.bf16.mxu0 %v11676_v30  ;;  %v11767_v29 = vld [vmem:[%s17550_s1 + $0x740] ss:$8 sps:$4 sm:$0xff]   ;;  %v11772_v30 = vld [vmem:[%s17550_s1 + $0x634] ss:$8 sps:$4 sm:$0xff]  }
  0x95   :  { %2708 = vmatprep.subr.bf16.mxu1 %v11679_v31  ;;  %v11775_v31 = vld [vmem:[%s17550_s1 + $0x734] ss:$8 sps:$4 sm:$0xff]  }
  0x97   :  { %2666 = vmatpush1.bf16.msra.mxu0 %v11674_v32  ;;  %v11770_v32 = vld [vmem:[%s17550_s1 + $0x630] ss:$8 sps:$4 sm:$0xff]  }
  0x98   :  { %2709 = vmatpush1.bf16.msra.mxu1 %v11677_v33  ;;  %2667 = vmatprep.subr.bf16.mxu0 %v11682_v34  ;;  %v11773_v33 = vld [vmem:[%s17550_s1 + $0x730] ss:$8 sps:$4 sm:$0xff]   ;;  %v11778_v34 = vld [vmem:[%s17550_s1 + $0x624] ss:$8 sps:$4 sm:$0xff]  }
  0x99   :  { %2710 = vmatprep.subr.bf16.mxu1 %v11685_v35  ;;  %v11781_v35 = vld [vmem:[%s17550_s1 + $0x724] ss:$8 sps:$4 sm:$0xff]  }
  0x9b   :  { %2668 = vmatpush1.bf16.msra.mxu0 %v11680_v36  ;;  %v11776_v36 = vld [vmem:[%s17550_s1 + $0x620] ss:$8 sps:$4 sm:$0xff]  }
  0x9c   :  { %2711 = vmatpush1.bf16.msra.mxu1 %v11683_v37  ;;  %2669 = vmatprep.subr.bf16.mxu0 %v11688_v38  ;;  %v11779_v37 = vld [vmem:[%s17550_s1 + $0x720] ss:$8 sps:$4 sm:$0xff]   ;;  %v11784_v38 = vld [vmem:[%s17550_s1 + $0x614] ss:$8 sps:$4 sm:$0xff]  }
  0x9d   :  { %2712 = vmatprep.subr.bf16.mxu1 %v11691_v39  ;;  %v11787_v39 = vld [vmem:[%s17550_s1 + $0x714] ss:$8 sps:$4 sm:$0xff]  }
  0x9f   :  { %2670 = vmatpush1.bf16.msra.mxu0 %v11686_v40  ;;  %v11782_v40 = vld [vmem:[%s17550_s1 + $0x610] ss:$8 sps:$4 sm:$0xff]  }
  0xa0   :  { %2713 = vmatpush1.bf16.msra.mxu1 %v11689_v41  ;;  %2671 = vmatprep.subr.bf16.mxu0 %v11694_v42  ;;  %v11785_v41 = vld [vmem:[%s17550_s1 + $0x710] ss:$8 sps:$4 sm:$0xff]   ;;  %v11790_v42 = vld [vmem:[%s17550_s1 + $0x604] ss:$8 sps:$4 sm:$0xff]  }
  0xa1   :  { %2714 = vmatprep.subr.bf16.mxu1 %v11697_v43  ;;  %v11793_v43 = vld [vmem:[%s17550_s1 + $0x704] ss:$8 sps:$4 sm:$0xff]  }
  0xa3   :  { %2672 = vmatpush2.bf16.msra.mxu0 %v11692_v44  ;;  %v11788_v44 = vld [vmem:[%s17550_s1 + $0x600] ss:$8 sps:$4 sm:$0xff]  }
  0xa4   :  { %2715 = vmatpush2.bf16.msra.mxu1 %v11695_v45  ;;  %2673 = vmatprep.subr.bf16.mxu0 %v11700_v46  ;;  %v11791_v45 = vld [vmem:[%s17550_s1 + $0x700] ss:$8 sps:$4 sm:$0xff]   ;;  %v11796_v46 = vld [vmem:[%s17550_s1 + $0x6f4] ss:$8 sps:$4 sm:$0xff]  }
  0xa5   :  { %2716 = vmatprep.subr.bf16.mxu1 %v11703_v47  ;;  %v11799_v47 = vld [vmem:[%s17550_s1 + $0x7f4] ss:$8 sps:$4 sm:$0xff]  }
  0xa7   :  { %2674 = vmatpush2.bf16.msra.mxu0 %v11698_v48  ;;  %v11794_v48 = vld [vmem:[%s17550_s1 + $0x6f0] ss:$8 sps:$4 sm:$0xff]  }
  0xa8   :  { %2717 = vmatpush2.bf16.msra.mxu1 %v11701_v49  ;;  %2675 = vmatprep.subr.bf16.mxu0 %v11706_v50  ;;  %v11797_v49 = vld [vmem:[%s17550_s1 + $0x7f0] ss:$8 sps:$4 sm:$0xff]   ;;  %v11802_v50 = vld [vmem:[%s17550_s1 + $0x6e4] ss:$8 sps:$4 sm:$0xff]  }
  0xa9   :  { %2718 = vmatprep.subr.bf16.mxu1 %v11709_v51  ;;  %v11805_v51 = vld [vmem:[%s17550_s1 + $0x7e4] ss:$8 sps:$4 sm:$0xff]  }
  0xab   :  { %2676 = vmatpush2.bf16.msra.mxu0 %v11704_v52  ;;  %v11800_v52 = vld [vmem:[%s17550_s1 + $0x6e0] ss:$8 sps:$4 sm:$0xff]  }
  0xac   :  { %2719 = vmatpush2.bf16.msra.mxu1 %v11707_v53  ;;  %2677 = vmatprep.subr.bf16.mxu0 %v11712_v54  ;;  %v11803_v53 = vld [vmem:[%s17550_s1 + $0x7e0] ss:$8 sps:$4 sm:$0xff]   ;;  %v11808_v54 = vld [vmem:[%s17550_s1 + $0x6d4] ss:$8 sps:$4 sm:$0xff]  }
  0xad   :  { %2720 = vmatprep.subr.bf16.mxu1 %v11715_v55  ;;  %v11811_v55 = vld [vmem:[%s17550_s1 + $0x7d4] ss:$8 sps:$4 sm:$0xff]  }
  0xaf   :  { %2678 = vmatpush2.bf16.msra.mxu0 %v11710_v56  ;;  %v11806_v56 = vld [vmem:[%s17550_s1 + $0x6d0] ss:$8 sps:$4 sm:$0xff]  }
  0xb0   :  { %2721 = vmatpush2.bf16.msra.mxu1 %v11713_v57  ;;  %2679 = vmatprep.subr.bf16.mxu0 %v11718_v58  ;;  %v11809_v57 = vld [vmem:[%s17550_s1 + $0x7d0] ss:$8 sps:$4 sm:$0xff]   ;;  %v11814_v58 = vld [vmem:[%s17550_s1 + $0x6c4] ss:$8 sps:$4 sm:$0xff]  }
  0xb1   :  { %2722 = vmatprep.subr.bf16.mxu1 %v11721_v59  ;;  %v11817_v59 = vld [vmem:[%s17550_s1 + $0x7c4] ss:$8 sps:$4 sm:$0xff]  }
  0xb3   :  { %2680 = vmatpush2.bf16.msra.mxu0 %v11716_v60  ;;  %v11812_v60 = vld [vmem:[%s17550_s1 + $0x6c0] ss:$8 sps:$4 sm:$0xff]  }
  0xb4   :  { %2723 = vmatpush2.bf16.msra.mxu1 %v11719_v61  ;;  %2681 = vmatprep.subr.bf16.mxu0 %v11724_v62  ;;  %v11815_v61 = vld [vmem:[%s17550_s1 + $0x7c0] ss:$8 sps:$4 sm:$0xff]   ;;  %v11820_v62 = vld [vmem:[%s17550_s1 + $0x6b4] ss:$8 sps:$4 sm:$0xff]  }
  0xb5   :  { %2724 = vmatprep.subr.bf16.mxu1 %v11727_v63  ;;  %v11823_v63 = vld [vmem:[%s17550_s1 + $0x7b4] ss:$8 sps:$4 sm:$0xff]  }
  0xb7   :  { %2682 = vmatpush2.bf16.msra.mxu0 %v11722_v0  ;;  %v11818_v0 = vld [vmem:[%s17550_s1 + $0x6b0] ss:$8 sps:$4 sm:$0xff]  }
  0xb8   :  { %2725 = vmatpush2.bf16.msra.mxu1 %v11725_v1  ;;  %2683 = vmatprep.subr.bf16.mxu0 %v11730_v2  ;;  %v11821_v1 = vld [vmem:[%s17550_s1 + $0x7b0] ss:$8 sps:$4 sm:$0xff]   ;;  %v11826_v2 = vld [vmem:[%s17550_s1 + $0x6a4] ss:$8 sps:$4 sm:$0xff]  }
  0xb9   :  { %2726 = vmatprep.subr.bf16.mxu1 %v11733_v3  ;;  %v11829_v3 = vld [vmem:[%s17550_s1 + $0x7a4] ss:$8 sps:$4 sm:$0xff]  }
  0xbb   :  { %2684 = vmatpush2.bf16.msra.mxu0 %v11728_v4  ;;  %v11824_v4 = vld [vmem:[%s17550_s1 + $0x6a0] ss:$8 sps:$4 sm:$0xff]  }
  0xbc   :  { %2727 = vmatpush2.bf16.msra.mxu1 %v11731_v5  ;;  %2685 = vmatprep.subr.bf16.mxu0 %v11736_v6  ;;  %v11827_v5 = vld [vmem:[%s17550_s1 + $0x7a0] ss:$8 sps:$4 sm:$0xff]   ;;  %v11832_v6 = vld [vmem:[%s17550_s1 + $0x694] ss:$8 sps:$4 sm:$0xff]  }
  0xbd   :  { %2728 = vmatprep.subr.bf16.mxu1 %v11739_v7  ;;  %v11835_v7 = vld [vmem:[%s17550_s1 + $0x794] ss:$8 sps:$4 sm:$0xff]  }
  0xbf   :  { %2686 = vmatpush2.bf16.msra.mxu0 %v11734_v8  ;;  %v11830_v8 = vld [vmem:[%s17550_s1 + $0x690] ss:$8 sps:$4 sm:$0xff]  }
  0xc0   :  { %2729 = vmatpush2.bf16.msra.mxu1 %v11737_v9  ;;  %2741 = vmatprep.subr.bf16.mxu0 %v11748_v10  ;;  %v11833_v9 = vld [vmem:[%s17550_s1 + $0x790] ss:$8 sps:$4 sm:$0xff]   ;;  %v11838_v10 = vld [vmem:[%s17550_s1 + $0x684] ss:$8 sps:$4 sm:$0xff]  }
  0xc1   :  { %2784 = vmatprep.subr.bf16.mxu1 %v11751_v11  ;;  %v11841_v11 = vld [vmem:[%s17550_s1 + $0x784] ss:$8 sps:$4 sm:$0xff]  }
  0xc2   :  { %2688 = vmatmul.mubr.bf16.vlgmr.msra.gmra.mxu0 %v11740_v12  ;;  %v11836_v12 = vld [vmem:[%s17550_s1 + $0x680] ss:$8 sps:$4 sm:$0xff]  }
  0xc3   :  { %2731 = vmatmul.mubr.bf16.vlgmr.msra.gmra.mxu1 %v11743_v13  ;;  %2742 = vmatpush1.bf16.msra.mxu0 %v11746_v14  ;;  %v11839_v13 = vld [vmem:[%s17550_s1 + $0x780] ss:$8 sps:$4 sm:$0xff]   ;;  %v11850_v14 = vld [vmem:[%s17550_s1 + $0x874] ss:$8 sps:$4 sm:$0xff]  }
  0xc4   :  { %2785 = vmatpush1.bf16.msra.mxu1 %v11749_v15  ;;  %2743 = vmatprep.subr.bf16.mxu0 %v11754_v16  ;;  %v11853_v15 = vld [vmem:[%s17550_s1 + $0x974] ss:$8 sps:$4 sm:$0xff]   ;;  %v11842_v16 = vld [vmem:[%s17551_s0 + $0x30] ss:$144 sps:$4 sm:$0xff]  }
  0xc5   :  { %2786 = vmatprep.subr.bf16.mxu1 %v11757_v17  ;;  %2773 = vmatprep.mubr.bf16.mxu0 %v11844_v18  ;;  %v11845_v17 = vld [vmem:[%s17551_s0 + $0x38] ss:$144 sps:$4 sm:$0xff]  }
  0xc6   :  { %2816 = vmatprep.mubr.bf16.mxu1 %v11847_v19  ;;  %v11848_v18 = vld [vmem:[%s17550_s1 + $0x870] ss:$8 sps:$4 sm:$0xff]  }
  0xc7   :  { %2744 = vmatpush1.bf16.msra.mxu0 %v11752_v20  ;;  %v11851_v19 = vld [vmem:[%s17550_s1 + $0x970] ss:$8 sps:$4 sm:$0xff]   ;;  %v11856_v20 = vld [vmem:[%s17550_s1 + $0x864] ss:$8 sps:$4 sm:$0xff]  }
  0xc8   :  { %2787 = vmatpush1.bf16.msra.mxu1 %v11755_v21  ;;  %2745 = vmatprep.subr.bf16.mxu0 %v11760_v22  ;;  %v11859_v21 = vld [vmem:[%s17550_s1 + $0x964] ss:$8 sps:$4 sm:$0xff]  }
  0xc9   :  { %2788 = vmatprep.subr.bf16.mxu1 %v11763_v23  ;;  %v11946_v22 = vld [vmem:[%s17551_s0 + $0x44] ss:$144 sps:$4 sm:$0xff]   ;;  %v11949_v23 = vld [vmem:[%s17551_s0 + $0x4c] ss:$144 sps:$4 sm:$0xff]  }
  0xcb   :  { %2746 = vmatpush1.bf16.msra.mxu0 %v11758_v24  ;;  %v11854_v24 = vld [vmem:[%s17550_s1 + $0x860] ss:$8 sps:$4 sm:$0xff]  }
  0xcc   :  { %2789 = vmatpush1.bf16.msra.mxu1 %v11761_v25  ;;  %2747 = vmatprep.subr.bf16.mxu0 %v11766_v26  ;;  %v11857_v25 = vld [vmem:[%s17550_s1 + $0x960] ss:$8 sps:$4 sm:$0xff]   ;;  %v11862_v26 = vld [vmem:[%s17550_s1 + $0x854] ss:$8 sps:$4 sm:$0xff]  }
  0xcd   :  { %2790 = vmatprep.subr.bf16.mxu1 %v11769_v27  ;;  %v11865_v27 = vld [vmem:[%s17550_s1 + $0x954] ss:$8 sps:$4 sm:$0xff]  }
  0xcf   :  { %2748 = vmatpush1.bf16.msra.mxu0 %v11764_v28  ;;  %v11860_v28 = vld [vmem:[%s17550_s1 + $0x850] ss:$8 sps:$4 sm:$0xff]  }
  0xd0   :  { %2791 = vmatpush1.bf16.msra.mxu1 %v11767_v29  ;;  %2749 = vmatprep.subr.bf16.mxu0 %v11772_v30  ;;  %v11863_v29 = vld [vmem:[%s17550_s1 + $0x950] ss:$8 sps:$4 sm:$0xff]   ;;  %v11868_v30 = vld [vmem:[%s17550_s1 + $0x844] ss:$8 sps:$4 sm:$0xff]  }
  0xd1   :  { %2792 = vmatprep.subr.bf16.mxu1 %v11775_v31  ;;  %v11871_v31 = vld [vmem:[%s17550_s1 + $0x944] ss:$8 sps:$4 sm:$0xff]  }
  0xd3   :  { %2750 = vmatpush1.bf16.msra.mxu0 %v11770_v32  ;;  %v11866_v32 = vld [vmem:[%s17550_s1 + $0x840] ss:$8 sps:$4 sm:$0xff]  }
  0xd4   :  { %2793 = vmatpush1.bf16.msra.mxu1 %v11773_v33  ;;  %2751 = vmatprep.subr.bf16.mxu0 %v11778_v34  ;;  %v11869_v33 = vld [vmem:[%s17550_s1 + $0x940] ss:$8 sps:$4 sm:$0xff]   ;;  %v11874_v34 = vld [vmem:[%s17550_s1 + $0x834] ss:$8 sps:$4 sm:$0xff]  }
  0xd5   :  { %2794 = vmatprep.subr.bf16.mxu1 %v11781_v35  ;;  %v11877_v35 = vld [vmem:[%s17550_s1 + $0x934] ss:$8 sps:$4 sm:$0xff]  }
  0xd7   :  { %2752 = vmatpush1.bf16.msra.mxu0 %v11776_v36  ;;  %v11872_v36 = vld [vmem:[%s17550_s1 + $0x830] ss:$8 sps:$4 sm:$0xff]  }
  0xd8   :  { %2795 = vmatpush1.bf16.msra.mxu1 %v11779_v37  ;;  %2753 = vmatprep.subr.bf16.mxu0 %v11784_v38  ;;  %v11875_v37 = vld [vmem:[%s17550_s1 + $0x930] ss:$8 sps:$4 sm:$0xff]   ;;  %v11880_v38 = vld [vmem:[%s17550_s1 + $0x824] ss:$8 sps:$4 sm:$0xff]  }
  0xd9   :  { %2796 = vmatprep.subr.bf16.mxu1 %v11787_v39  ;;  %v11883_v39 = vld [vmem:[%s17550_s1 + $0x924] ss:$8 sps:$4 sm:$0xff]  }
  0xdb   :  { %2754 = vmatpush1.bf16.msra.mxu0 %v11782_v40  ;;  %v11878_v40 = vld [vmem:[%s17550_s1 + $0x820] ss:$8 sps:$4 sm:$0xff]  }
  0xdc   :  { %2797 = vmatpush1.bf16.msra.mxu1 %v11785_v41  ;;  %2755 = vmatprep.subr.bf16.mxu0 %v11790_v42  ;;  %v11881_v41 = vld [vmem:[%s17550_s1 + $0x920] ss:$8 sps:$4 sm:$0xff]   ;;  %v11886_v42 = vld [vmem:[%s17550_s1 + $0x814] ss:$8 sps:$4 sm:$0xff]  }
  0xdd   :  { %2798 = vmatprep.subr.bf16.mxu1 %v11793_v43  ;;  %v11889_v43 = vld [vmem:[%s17550_s1 + $0x914] ss:$8 sps:$4 sm:$0xff]  }
  0xdf   :  { %2756 = vmatpush1.bf16.msra.mxu0 %v11788_v44  ;;  %v11884_v44 = vld [vmem:[%s17550_s1 + $0x810] ss:$8 sps:$4 sm:$0xff]  }
  0xe0   :  { %2799 = vmatpush1.bf16.msra.mxu1 %v11791_v45  ;;  %2757 = vmatprep.subr.bf16.mxu0 %v11796_v46  ;;  %v11887_v45 = vld [vmem:[%s17550_s1 + $0x910] ss:$8 sps:$4 sm:$0xff]   ;;  %v11892_v46 = vld [vmem:[%s17550_s1 + $0x804] ss:$8 sps:$4 sm:$0xff]  }
  0xe1   :  { %2800 = vmatprep.subr.bf16.mxu1 %v11799_v47  ;;  %v11895_v47 = vld [vmem:[%s17550_s1 + $0x904] ss:$8 sps:$4 sm:$0xff]  }
  0xe3   :  { %2758 = vmatpush2.bf16.msra.mxu0 %v11794_v48  ;;  %v11890_v48 = vld [vmem:[%s17550_s1 + $0x800] ss:$8 sps:$4 sm:$0xff]  }
  0xe4   :  { %2801 = vmatpush2.bf16.msra.mxu1 %v11797_v49  ;;  %2759 = vmatprep.subr.bf16.mxu0 %v11802_v50  ;;  %v11893_v49 = vld [vmem:[%s17550_s1 + $0x900] ss:$8 sps:$4 sm:$0xff]   ;;  %v11898_v50 = vld [vmem:[%s17550_s1 + $0x8f4] ss:$8 sps:$4 sm:$0xff]  }
  0xe5   :  { %2802 = vmatprep.subr.bf16.mxu1 %v11805_v51  ;;  %v11901_v51 = vld [vmem:[%s17550_s1 + $0x9f4] ss:$8 sps:$4 sm:$0xff]  }
  0xe7   :  { %2760 = vmatpush2.bf16.msra.mxu0 %v11800_v52  ;;  %v11896_v52 = vld [vmem:[%s17550_s1 + $0x8f0] ss:$8 sps:$4 sm:$0xff]  }
  0xe8   :  { %2803 = vmatpush2.bf16.msra.mxu1 %v11803_v53  ;;  %2761 = vmatprep.subr.bf16.mxu0 %v11808_v54  ;;  %v11899_v53 = vld [vmem:[%s17550_s1 + $0x9f0] ss:$8 sps:$4 sm:$0xff]   ;;  %v11904_v54 = vld [vmem:[%s17550_s1 + $0x8e4] ss:$8 sps:$4 sm:$0xff]  }
  0xe9   :  { %2804 = vmatprep.subr.bf16.mxu1 %v11811_v55  ;;  %v11907_v55 = vld [vmem:[%s17550_s1 + $0x9e4] ss:$8 sps:$4 sm:$0xff]  }
  0xeb   :  { %2762 = vmatpush2.bf16.msra.mxu0 %v11806_v56  ;;  %v11902_v56 = vld [vmem:[%s17550_s1 + $0x8e0] ss:$8 sps:$4 sm:$0xff]  }
  0xec   :  { %2805 = vmatpush2.bf16.msra.mxu1 %v11809_v57  ;;  %2763 = vmatprep.subr.bf16.mxu0 %v11814_v58  ;;  %v11905_v57 = vld [vmem:[%s17550_s1 + $0x9e0] ss:$8 sps:$4 sm:$0xff]   ;;  %v11910_v58 = vld [vmem:[%s17550_s1 + $0x8d4] ss:$8 sps:$4 sm:$0xff]  }
  0xed   :  { %2806 = vmatprep.subr.bf16.mxu1 %v11817_v59  ;;  %v11913_v59 = vld [vmem:[%s17550_s1 + $0x9d4] ss:$8 sps:$4 sm:$0xff]  }
  0xef   :  { %2764 = vmatpush2.bf16.msra.mxu0 %v11812_v60  ;;  %v11908_v60 = vld [vmem:[%s17550_s1 + $0x8d0] ss:$8 sps:$4 sm:$0xff]  }
  0xf0   :  { %2807 = vmatpush2.bf16.msra.mxu1 %v11815_v61  ;;  %2765 = vmatprep.subr.bf16.mxu0 %v11820_v62  ;;  %v11911_v61 = vld [vmem:[%s17550_s1 + $0x9d0] ss:$8 sps:$4 sm:$0xff]   ;;  %v11916_v62 = vld [vmem:[%s17550_s1 + $0x8c4] ss:$8 sps:$4 sm:$0xff]  }
  0xf1   :  { %2808 = vmatprep.subr.bf16.mxu1 %v11823_v63  ;;  %v11919_v63 = vld [vmem:[%s17550_s1 + $0x9c4] ss:$8 sps:$4 sm:$0xff]  }
  0xf3   :  { %2766 = vmatpush2.bf16.msra.mxu0 %v11818_v0  ;;  %v11914_v0 = vld [vmem:[%s17550_s1 + $0x8c0] ss:$8 sps:$4 sm:$0xff]  }
  0xf4   :  { %2809 = vmatpush2.bf16.msra.mxu1 %v11821_v1  ;;  %2767 = vmatprep.subr.bf16.mxu0 %v11826_v2  ;;  %v11917_v1 = vld [vmem:[%s17550_s1 + $0x9c0] ss:$8 sps:$4 sm:$0xff]   ;;  %v11922_v2 = vld [vmem:[%s17550_s1 + $0x8b4] ss:$8 sps:$4 sm:$0xff]  }
  0xf5   :  { %2810 = vmatprep.subr.bf16.mxu1 %v11829_v3  ;;  %v11925_v3 = vld [vmem:[%s17550_s1 + $0x9b4] ss:$8 sps:$4 sm:$0xff]  }
  0xf7   :  { %2768 = vmatpush2.bf16.msra.mxu0 %v11824_v4  ;;  %v11920_v4 = vld [vmem:[%s17550_s1 + $0x8b0] ss:$8 sps:$4 sm:$0xff]  }
  0xf8   :  { %2811 = vmatpush2.bf16.msra.mxu1 %v11827_v5  ;;  %2769 = vmatprep.subr.bf16.mxu0 %v11832_v6  ;;  %v11923_v5 = vld [vmem:[%s17550_s1 + $0x9b0] ss:$8 sps:$4 sm:$0xff]   ;;  %v11928_v6 = vld [vmem:[%s17550_s1 + $0x8a4] ss:$8 sps:$4 sm:$0xff]  }
  0xf9   :  { %2812 = vmatprep.subr.bf16.mxu1 %v11835_v7  ;;  %v11931_v7 = vld [vmem:[%s17550_s1 + $0x9a4] ss:$8 sps:$4 sm:$0xff]  }
  0xfb   :  { %2770 = vmatpush2.bf16.msra.mxu0 %v11830_v8  ;;  %v11926_v8 = vld [vmem:[%s17550_s1 + $0x8a0] ss:$8 sps:$4 sm:$0xff]  }
  0xfc   :  { %2813 = vmatpush2.bf16.msra.mxu1 %v11833_v9  ;;  %2771 = vmatprep.subr.bf16.mxu0 %v11838_v10  ;;  %v11929_v9 = vld [vmem:[%s17550_s1 + $0x9a0] ss:$8 sps:$4 sm:$0xff]   ;;  %v11934_v10 = vld [vmem:[%s17550_s1 + $0x894] ss:$8 sps:$4 sm:$0xff]  }
  0xfd   :  { %2814 = vmatprep.subr.bf16.mxu1 %v11841_v11  ;;  %v11937_v11 = vld [vmem:[%s17550_s1 + $0x994] ss:$8 sps:$4 sm:$0xff]  }
  0xff   :  { %2772 = vmatpush2.bf16.msra.mxu0 %v11836_v12  ;;  %v11932_v12 = vld [vmem:[%s17550_s1 + $0x890] ss:$8 sps:$4 sm:$0xff]  }
 0x100   :  { %2815 = vmatpush2.bf16.msra.mxu1 %v11839_v13  ;;  %2827 = vmatprep.subr.bf16.mxu0 %v11850_v14  ;;  %v11935_v13 = vld [vmem:[%s17550_s1 + $0x990] ss:$8 sps:$4 sm:$0xff]   ;;  %v11940_v14 = vld [vmem:[%s17550_s1 + $0x884] ss:$8 sps:$4 sm:$0xff]  }
 0x101   :  { %2870 = vmatprep.subr.bf16.mxu1 %v11853_v15  ;;  %v11943_v15 = vld [vmem:[%s17550_s1 + $0x984] ss:$8 sps:$4 sm:$0xff]  }
 0x102   :  { %2774 = vmatmul.mubr.bf16.vlgmr.msra.gmra.mxu0 %v11842_v16  ;;  %v11938_v16 = vld [vmem:[%s17550_s1 + $0x880] ss:$8 sps:$4 sm:$0xff]  }
 0x103   :  { %2817 = vmatmul.mubr.bf16.vlgmr.msra.gmra.mxu1 %v11845_v17  ;;  %2828 = vmatpush1.bf16.msra.mxu0 %v11848_v18  ;;  %v11941_v17 = vld [vmem:[%s17550_s1 + $0x980] ss:$8 sps:$4 sm:$0xff]  }
 0x104   :  { %2871 = vmatpush1.bf16.msra.mxu1 %v11851_v19  ;;  %2829 = vmatprep.subr.bf16.mxu0 %v11856_v20  ;;  %v11944_v18 = vld [vmem:[%s17551_s0 + $0x40] ss:$144 sps:$4 sm:$0xff]   ;;  %v11947_v19 = vld [vmem:[%s17551_s0 + $0x48] ss:$144 sps:$4 sm:$0xff]   ;;  %v11952_v20 = vld [vmem:[%s17550_s1 + $0xa74] ss:$8 sps:$4 sm:$0xff]  }
 0x105   :  { %2872 = vmatprep.subr.bf16.mxu1 %v11859_v21  ;;  %2859 = vmatprep.mubr.bf16.mxu0 %v11946_v22  ;;  %v11955_v21 = vld [vmem:[%s17550_s1 + $0xb74] ss:$8 sps:$4 sm:$0xff]   ;;  %v11950_v22 = vld [vmem:[%s17550_s1 + $0xa70] ss:$8 sps:$4 sm:$0xff]  }
 0x106   :  { %2902 = vmatprep.mubr.bf16.mxu1 %v11949_v23  ;;  %v11953_v23 = vld [vmem:[%s17550_s1 + $0xb70] ss:$8 sps:$4 sm:$0xff]  }
 0x107   :  { %2830 = vmatpush1.bf16.msra.mxu0 %v11854_v24  ;;  %v11958_v24 = vld [vmem:[%s17550_s1 + $0xa64] ss:$8 sps:$4 sm:$0xff]  }
 0x108   :  { %2873 = vmatpush1.bf16.msra.mxu1 %v11857_v25  ;;  %2831 = vmatprep.subr.bf16.mxu0 %v11862_v26  ;;  %v11961_v25 = vld [vmem:[%s17550_s1 + $0xb64] ss:$8 sps:$4 sm:$0xff]   ;;  %v11956_v26 = vld [vmem:[%s17550_s1 + $0xa60] ss:$8 sps:$4 sm:$0xff]  }
 0x109   :  { %2874 = vmatprep.subr.bf16.mxu1 %v11865_v27  ;;  %v11959_v27 = vld [vmem:[%s17550_s1 + $0xb60] ss:$8 sps:$4 sm:$0xff]  }
 0x10b   :  { %2832 = vmatpush1.bf16.msra.mxu0 %v11860_v28  ;;  %v12048_v28 = vld [vmem:[%s17551_s0 + $0x54] ss:$144 sps:$4 sm:$0xff]  }
 0x10c   :  { %2875 = vmatpush1.bf16.msra.mxu1 %v11863_v29  ;;  %2833 = vmatprep.subr.bf16.mxu0 %v11868_v30  ;;  %v12051_v29 = vld [vmem:[%s17551_s0 + $0x5c] ss:$144 sps:$4 sm:$0xff]  }
 0x10d   :  { %2876 = vmatprep.subr.bf16.mxu1 %v11871_v31  ;;  %v11964_v30 = vld [vmem:[%s17550_s1 + $0xa54] ss:$8 sps:$4 sm:$0xff]  }
 0x10e   :  { %v11967_v31 = vld [vmem:[%s17550_s1 + $0xb54] ss:$8 sps:$4 sm:$0xff]  }
 0x10f   :  { %2834 = vmatpush1.bf16.msra.mxu0 %v11866_v32  ;;  %v11962_v32 = vld [vmem:[%s17550_s1 + $0xa50] ss:$8 sps:$4 sm:$0xff]  }
 0x110   :  { %2877 = vmatpush1.bf16.msra.mxu1 %v11869_v33  ;;  %2835 = vmatprep.subr.bf16.mxu0 %v11874_v34  ;;  %v11965_v33 = vld [vmem:[%s17550_s1 + $0xb50] ss:$8 sps:$4 sm:$0xff]   ;;  %v11970_v34 = vld [vmem:[%s17550_s1 + $0xa44] ss:$8 sps:$4 sm:$0xff]  }
 0x111   :  { %2878 = vmatprep.subr.bf16.mxu1 %v11877_v35  ;;  %v11973_v35 = vld [vmem:[%s17550_s1 + $0xb44] ss:$8 sps:$4 sm:$0xff]  }
 0x113   :  { %2836 = vmatpush1.bf16.msra.mxu0 %v11872_v36  ;;  %v11968_v36 = vld [vmem:[%s17550_s1 + $0xa40] ss:$8 sps:$4 sm:$0xff]  }
 0x114   :  { %2879 = vmatpush1.bf16.msra.mxu1 %v11875_v37  ;;  %2837 = vmatprep.subr.bf16.mxu0 %v11880_v38  ;;  %v11971_v37 = vld [vmem:[%s17550_s1 + $0xb40] ss:$8 sps:$4 sm:$0xff]   ;;  %v11976_v38 = vld [vmem:[%s17550_s1 + $0xa34] ss:$8 sps:$4 sm:$0xff]  }
 0x115   :  { %2880 = vmatprep.subr.bf16.mxu1 %v11883_v39  ;;  %v11979_v39 = vld [vmem:[%s17550_s1 + $0xb34] ss:$8 sps:$4 sm:$0xff]  }
 0x117   :  { %2838 = vmatpush1.bf16.msra.mxu0 %v11878_v40  ;;  %v11974_v40 = vld [vmem:[%s17550_s1 + $0xa30] ss:$8 sps:$4 sm:$0xff]  }
 0x118   :  { %2881 = vmatpush1.bf16.msra.mxu1 %v11881_v41  ;;  %2839 = vmatprep.subr.bf16.mxu0 %v11886_v42  ;;  %v11977_v41 = vld [vmem:[%s17550_s1 + $0xb30] ss:$8 sps:$4 sm:$0xff]   ;;  %v11982_v42 = vld [vmem:[%s17550_s1 + $0xa24] ss:$8 sps:$4 sm:$0xff]  }
 0x119   :  { %2882 = vmatprep.subr.bf16.mxu1 %v11889_v43  ;;  %v11985_v43 = vld [vmem:[%s17550_s1 + $0xb24] ss:$8 sps:$4 sm:$0xff]  }
 0x11b   :  { %2840 = vmatpush1.bf16.msra.mxu0 %v11884_v44  ;;  %v11980_v44 = vld [vmem:[%s17550_s1 + $0xa20] ss:$8 sps:$4 sm:$0xff]  }
 0x11c   :  { %2883 = vmatpush1.bf16.msra.mxu1 %v11887_v45  ;;  %2841 = vmatprep.subr.bf16.mxu0 %v11892_v46  ;;  %v11983_v45 = vld [vmem:[%s17550_s1 + $0xb20] ss:$8 sps:$4 sm:$0xff]   ;;  %v11988_v46 = vld [vmem:[%s17550_s1 + $0xa14] ss:$8 sps:$4 sm:$0xff]  }
 0x11d   :  { %2884 = vmatprep.subr.bf16.mxu1 %v11895_v47  ;;  %v11991_v47 = vld [vmem:[%s17550_s1 + $0xb14] ss:$8 sps:$4 sm:$0xff]  }
 0x11f   :  { %2842 = vmatpush1.bf16.msra.mxu0 %v11890_v48  ;;  %v11986_v48 = vld [vmem:[%s17550_s1 + $0xa10] ss:$8 sps:$4 sm:$0xff]  }
 0x120   :  { %2885 = vmatpush1.bf16.msra.mxu1 %v11893_v49  ;;  %2843 = vmatprep.subr.bf16.mxu0 %v11898_v50  ;;  %v11989_v49 = vld [vmem:[%s17550_s1 + $0xb10] ss:$8 sps:$4 sm:$0xff]   ;;  %v11994_v50 = vld [vmem:[%s17550_s1 + $0xa04] ss:$8 sps:$4 sm:$0xff]  }
 0x121   :  { %2886 = vmatprep.subr.bf16.mxu1 %v11901_v51  ;;  %v11997_v51 = vld [vmem:[%s17550_s1 + $0xb04] ss:$8 sps:$4 sm:$0xff]  }
 0x123   :  { %2844 = vmatpush2.bf16.msra.mxu0 %v11896_v52  ;;  %v11992_v52 = vld [vmem:[%s17550_s1 + $0xa00] ss:$8 sps:$4 sm:$0xff]  }
 0x124   :  { %2887 = vmatpush2.bf16.msra.mxu1 %v11899_v53  ;;  %2845 = vmatprep.subr.bf16.mxu0 %v11904_v54  ;;  %v11995_v53 = vld [vmem:[%s17550_s1 + $0xb00] ss:$8 sps:$4 sm:$0xff]   ;;  %v12000_v54 = vld [vmem:[%s17550_s1 + $0xaf4] ss:$8 sps:$4 sm:$0xff]  }
 0x125   :  { %2888 = vmatprep.subr.bf16.mxu1 %v11907_v55  ;;  %v12003_v55 = vld [vmem:[%s17550_s1 + $0xbf4] ss:$8 sps:$4 sm:$0xff]  }
 0x127   :  { %2846 = vmatpush2.bf16.msra.mxu0 %v11902_v56  ;;  %v11998_v56 = vld [vmem:[%s17550_s1 + $0xaf0] ss:$8 sps:$4 sm:$0xff]  }
 0x128   :  { %2889 = vmatpush2.bf16.msra.mxu1 %v11905_v57  ;;  %2847 = vmatprep.subr.bf16.mxu0 %v11910_v58  ;;  %v12001_v57 = vld [vmem:[%s17550_s1 + $0xbf0] ss:$8 sps:$4 sm:$0xff]   ;;  %v12006_v58 = vld [vmem:[%s17550_s1 + $0xae4] ss:$8 sps:$4 sm:$0xff]  }
 0x129   :  { %2890 = vmatprep.subr.bf16.mxu1 %v11913_v59  ;;  %v12009_v59 = vld [vmem:[%s17550_s1 + $0xbe4] ss:$8 sps:$4 sm:$0xff]  }
 0x12b   :  { %2848 = vmatpush2.bf16.msra.mxu0 %v11908_v60  ;;  %v12004_v60 = vld [vmem:[%s17550_s1 + $0xae0] ss:$8 sps:$4 sm:$0xff]  }
 0x12c   :  { %2891 = vmatpush2.bf16.msra.mxu1 %v11911_v61  ;;  %2849 = vmatprep.subr.bf16.mxu0 %v11916_v62  ;;  %v12007_v61 = vld [vmem:[%s17550_s1 + $0xbe0] ss:$8 sps:$4 sm:$0xff]   ;;  %v12012_v62 = vld [vmem:[%s17550_s1 + $0xad4] ss:$8 sps:$4 sm:$0xff]  }
 0x12d   :  { %2892 = vmatprep.subr.bf16.mxu1 %v11919_v63  ;;  %v12015_v63 = vld [vmem:[%s17550_s1 + $0xbd4] ss:$8 sps:$4 sm:$0xff]  }
 0x12f   :  { %2850 = vmatpush2.bf16.msra.mxu0 %v11914_v0  ;;  %v12010_v0 = vld [vmem:[%s17550_s1 + $0xad0] ss:$8 sps:$4 sm:$0xff]  }
 0x130   :  { %2893 = vmatpush2.bf16.msra.mxu1 %v11917_v1  ;;  %2851 = vmatprep.subr.bf16.mxu0 %v11922_v2  ;;  %v12013_v1 = vld [vmem:[%s17550_s1 + $0xbd0] ss:$8 sps:$4 sm:$0xff]   ;;  %v12018_v2 = vld [vmem:[%s17550_s1 + $0xac4] ss:$8 sps:$4 sm:$0xff]  }
 0x131   :  { %2894 = vmatprep.subr.bf16.mxu1 %v11925_v3  ;;  %v12021_v3 = vld [vmem:[%s17550_s1 + $0xbc4] ss:$8 sps:$4 sm:$0xff]  }
 0x133   :  { %2852 = vmatpush2.bf16.msra.mxu0 %v11920_v4  ;;  %v12016_v4 = vld [vmem:[%s17550_s1 + $0xac0] ss:$8 sps:$4 sm:$0xff]  }
 0x134   :  { %2895 = vmatpush2.bf16.msra.mxu1 %v11923_v5  ;;  %2853 = vmatprep.subr.bf16.mxu0 %v11928_v6  ;;  %v12019_v5 = vld [vmem:[%s17550_s1 + $0xbc0] ss:$8 sps:$4 sm:$0xff]   ;;  %v12024_v6 = vld [vmem:[%s17550_s1 + $0xab4] ss:$8 sps:$4 sm:$0xff]  }
 0x135   :  { %2896 = vmatprep.subr.bf16.mxu1 %v11931_v7  ;;  %v12027_v7 = vld [vmem:[%s17550_s1 + $0xbb4] ss:$8 sps:$4 sm:$0xff]  }
 0x137   :  { %2854 = vmatpush2.bf16.msra.mxu0 %v11926_v8  ;;  %v12022_v8 = vld [vmem:[%s17550_s1 + $0xab0] ss:$8 sps:$4 sm:$0xff]  }
 0x138   :  { %2897 = vmatpush2.bf16.msra.mxu1 %v11929_v9  ;;  %2855 = vmatprep.subr.bf16.mxu0 %v11934_v10  ;;  %v12025_v9 = vld [vmem:[%s17550_s1 + $0xbb0] ss:$8 sps:$4 sm:$0xff]   ;;  %v12030_v10 = vld [vmem:[%s17550_s1 + $0xaa4] ss:$8 sps:$4 sm:$0xff]  }
 0x139   :  { %2898 = vmatprep.subr.bf16.mxu1 %v11937_v11  ;;  %v12033_v11 = vld [vmem:[%s17550_s1 + $0xba4] ss:$8 sps:$4 sm:$0xff]  }
 0x13b   :  { %2856 = vmatpush2.bf16.msra.mxu0 %v11932_v12  ;;  %v12028_v12 = vld [vmem:[%s17550_s1 + $0xaa0] ss:$8 sps:$4 sm:$0xff]  }
 0x13c   :  { %2899 = vmatpush2.bf16.msra.mxu1 %v11935_v13  ;;  %2857 = vmatprep.subr.bf16.mxu0 %v11940_v14  ;;  %v12031_v13 = vld [vmem:[%s17550_s1 + $0xba0] ss:$8 sps:$4 sm:$0xff]   ;;  %v12036_v14 = vld [vmem:[%s17550_s1 + $0xa94] ss:$8 sps:$4 sm:$0xff]  }
 0x13d   :  { %2900 = vmatprep.subr.bf16.mxu1 %v11943_v15  ;;  %v12039_v15 = vld [vmem:[%s17550_s1 + $0xb94] ss:$8 sps:$4 sm:$0xff]  }
 0x13f   :  { %2858 = vmatpush2.bf16.msra.mxu0 %v11938_v16  ;;  %v12034_v16 = vld [vmem:[%s17550_s1 + $0xa90] ss:$8 sps:$4 sm:$0xff]  }
 0x140   :  { %2901 = vmatpush2.bf16.msra.mxu1 %v11941_v17  ;;  %2913 = vmatprep.subr.bf16.mxu0 %v11952_v20  ;;  %v12037_v17 = vld [vmem:[%s17550_s1 + $0xb90] ss:$8 sps:$4 sm:$0xff]   ;;  %v12040_v20 = vld [vmem:[%s17550_s1 + $0xa80] ss:$8 sps:$4 sm:$0xff]  }
 0x141   :  { %2956 = vmatprep.subr.bf16.mxu1 %v11955_v21  ;;  %v12043_v21 = vld [vmem:[%s17550_s1 + $0xb80] ss:$8 sps:$4 sm:$0xff]  }
 0x142   :  { %2860 = vmatmul.mubr.bf16.vlgmr.msra.gmra.mxu0 %v11944_v18  ;;  %v12042_v18 = vld [vmem:[%s17550_s1 + $0xa84] ss:$8 sps:$4 sm:$0xff]  }
 0x143   :  { %2903 = vmatmul.mubr.bf16.vlgmr.msra.gmra.mxu1 %v11947_v19  ;;  %2914 = vmatpush1.bf16.msra.mxu0 %v11950_v22  ;;  %v12045_v19 = vld [vmem:[%s17550_s1 + $0xb84] ss:$8 sps:$4 sm:$0xff]   ;;  %v12046_v22 = vld [vmem:[%s17551_s0 + $0x50] ss:$144 sps:$4 sm:$0xff]  }
 0x144   :  { %2957 = vmatpush1.bf16.msra.mxu1 %v11953_v23  ;;  %2915 = vmatprep.subr.bf16.mxu0 %v11958_v24  ;;  %v12049_v23 = vld [vmem:[%s17551_s0 + $0x58] ss:$144 sps:$4 sm:$0xff]   ;;  %v12054_v24 = vld [vmem:[%s17550_s1 + $0x74] ss:$8 sps:$4 sm:$0xff]  }
 0x145   :  { %2958 = vmatprep.subr.bf16.mxu1 %v11961_v25  ;;  %2945 = vmatprep.mubr.bf16.mxu0 %v12048_v28  ;;  %v12057_v25 = vld [vmem:[%s17550_s1 + $0x174] ss:$8 sps:$4 sm:$0xff]   ;;  %v12060_v28 = vld [vmem:[%s17550_s1 + $0x64] ss:$8 sps:$4 sm:$0xff]  }
 0x146   :  { %2988 = vmatprep.mubr.bf16.mxu1 %v12051_v29  ;;  %v12063_v29 = vld [vmem:[%s17550_s1 + $0x164] ss:$8 sps:$4 sm:$0xff]  }
 0x147   :  { %2916 = vmatpush1.bf16.msra.mxu0 %v11956_v26  ;;  %v12052_v26 = vld [vmem:[%s17550_s1 + $0x70] ss:$8 sps:$4 sm:$0xff]  }
 0x148   :  { %2959 = vmatpush1.bf16.msra.mxu1 %v11959_v27  ;;  %2917 = vmatprep.subr.bf16.mxu0 %v11964_v30  ;;  %v12055_v27 = vld [vmem:[%s17550_s1 + $0x170] ss:$8 sps:$4 sm:$0xff]   ;;  %v12058_v30 = vld [vmem:[%s17550_s1 + $0x60] ss:$8 sps:$4 sm:$0xff]  }
 0x149   :  { %2960 = vmatprep.subr.bf16.mxu1 %v11967_v31  ;;  %v12061_v31 = vld [vmem:[%s17550_s1 + $0x160] ss:$8 sps:$4 sm:$0xff]  }
 0x14b   :  { %2918 = vmatpush1.bf16.msra.mxu0 %v11962_v32  ;;  %v12150_v32 = vld [vmem:[%s17551_s0 + $0x1c] ss:$144 sps:$4 sm:$0xff]  }
 0x14c   :  { %2961 = vmatpush1.bf16.msra.mxu1 %v11965_v33  ;;  %2919 = vmatprep.subr.bf16.mxu0 %v11970_v34  ;;  %v12153_v33 = vld [vmem:[%s17551_s0 + $0x24] ss:$144 sps:$4 sm:$0xff]  }
 0x14d   :  { %2962 = vmatprep.subr.bf16.mxu1 %v11973_v35  ;;  %v12066_v34 = vld [vmem:[%s17550_s1 + $0x54] ss:$8 sps:$4 sm:$0xff]  }
 0x14e   :  { %v12069_v35 = vld [vmem:[%s17550_s1 + $0x154] ss:$8 sps:$4 sm:$0xff]  }
 0x14f   :  { %2920 = vmatpush1.bf16.msra.mxu0 %v11968_v36  ;;  %v12064_v36 = vld [vmem:[%s17550_s1 + $0x50] ss:$8 sps:$4 sm:$0xff]  }
 0x150   :  { %2963 = vmatpush1.bf16.msra.mxu1 %v11971_v37  ;;  %2921 = vmatprep.subr.bf16.mxu0 %v11976_v38  ;;  %v12067_v37 = vld [vmem:[%s17550_s1 + $0x150] ss:$8 sps:$4 sm:$0xff]   ;;  %v12072_v38 = vld [vmem:[%s17550_s1 + $0x44] ss:$8 sps:$4 sm:$0xff]  }
 0x151   :  { %2964 = vmatprep.subr.bf16.mxu1 %v11979_v39  ;;  %v12075_v39 = vld [vmem:[%s17550_s1 + $0x144] ss:$8 sps:$4 sm:$0xff]  }
 0x153   :  { %2922 = vmatpush1.bf16.msra.mxu0 %v11974_v40  ;;  %v12070_v40 = vld [vmem:[%s17550_s1 + $0x40] ss:$8 sps:$4 sm:$0xff]  }
 0x154   :  { %2965 = vmatpush1.bf16.msra.mxu1 %v11977_v41  ;;  %2923 = vmatprep.subr.bf16.mxu0 %v11982_v42  ;;  %v12073_v41 = vld [vmem:[%s17550_s1 + $0x140] ss:$8 sps:$4 sm:$0xff]   ;;  %v12078_v42 = vld [vmem:[%s17550_s1 + $0x34] ss:$8 sps:$4 sm:$0xff]  }
 0x155   :  { %2966 = vmatprep.subr.bf16.mxu1 %v11985_v43  ;;  %v12081_v43 = vld [vmem:[%s17550_s1 + $0x134] ss:$8 sps:$4 sm:$0xff]  }
 0x157   :  { %2924 = vmatpush1.bf16.msra.mxu0 %v11980_v44  ;;  %v12076_v44 = vld [vmem:[%s17550_s1 + $0x30] ss:$8 sps:$4 sm:$0xff]  }
 0x158   :  { %2967 = vmatpush1.bf16.msra.mxu1 %v11983_v45  ;;  %2925 = vmatprep.subr.bf16.mxu0 %v11988_v46  ;;  %v12079_v45 = vld [vmem:[%s17550_s1 + $0x130] ss:$8 sps:$4 sm:$0xff]   ;;  %v12084_v46 = vld [vmem:[%s17550_s1 + $0x24] ss:$8 sps:$4 sm:$0xff]  }
 0x159   :  { %2968 = vmatprep.subr.bf16.mxu1 %v11991_v47  ;;  %v12087_v47 = vld [vmem:[%s17550_s1 + $0x124] ss:$8 sps:$4 sm:$0xff]  }
 0x15b   :  { %2926 = vmatpush1.bf16.msra.mxu0 %v11986_v48  ;;  %v12082_v48 = vld [vmem:[%s17550_s1 + $0x20] ss:$8 sps:$4 sm:$0xff]  }
 0x15c   :  { %2969 = vmatpush1.bf16.msra.mxu1 %v11989_v49  ;;  %2927 = vmatprep.subr.bf16.mxu0 %v11994_v50  ;;  %v12085_v49 = vld [vmem:[%s17550_s1 + $0x120] ss:$8 sps:$4 sm:$0xff]   ;;  %v12090_v50 = vld [vmem:[%s17550_s1 + $0x14] ss:$8 sps:$4 sm:$0xff]  }
 0x15d   :  { %2970 = vmatprep.subr.bf16.mxu1 %v11997_v51  ;;  %v12093_v51 = vld [vmem:[%s17550_s1 + $0x114] ss:$8 sps:$4 sm:$0xff]  }
 0x15f   :  { %2928 = vmatpush1.bf16.msra.mxu0 %v11992_v52  ;;  %v12088_v52 = vld [vmem:[%s17550_s1 + $0x10] ss:$8 sps:$4 sm:$0xff]  }
 0x160   :  { %2971 = vmatpush1.bf16.msra.mxu1 %v11995_v53  ;;  %2929 = vmatprep.subr.bf16.mxu0 %v12000_v54  ;;  %v12091_v53 = vld [vmem:[%s17550_s1 + $0x110] ss:$8 sps:$4 sm:$0xff]   ;;  %v12096_v54 = vld [vmem:[%s17550_s1 + $0x4] ss:$8 sps:$4 sm:$0xff]  }
 0x161   :  { %2972 = vmatprep.subr.bf16.mxu1 %v12003_v55  ;;  %v12099_v55 = vld [vmem:[%s17550_s1 + $0x104] ss:$8 sps:$4 sm:$0xff]  }
 0x163   :  { %2930 = vmatpush2.bf16.msra.mxu0 %v11998_v56  ;;  %v12094_v56 = vld [vmem:[%s17550_s1] ss:$8 sps:$4 sm:$0xff]  }
 0x164   :  { %2973 = vmatpush2.bf16.msra.mxu1 %v12001_v57  ;;  %2931 = vmatprep.subr.bf16.mxu0 %v12006_v58  ;;  %v12097_v57 = vld [vmem:[%s17550_s1 + $0x100] ss:$8 sps:$4 sm:$0xff]   ;;  %v12102_v58 = vld [vmem:[%s17550_s1 + $0xf4] ss:$8 sps:$4 sm:$0xff]  }
 0x165   :  { %2974 = vmatprep.subr.bf16.mxu1 %v12009_v59  ;;  %v12105_v59 = vld [vmem:[%s17550_s1 + $0x1f4] ss:$8 sps:$4 sm:$0xff]  }
 0x167   :  { %2932 = vmatpush2.bf16.msra.mxu0 %v12004_v60  ;;  %v12100_v60 = vld [vmem:[%s17550_s1 + $0xf0] ss:$8 sps:$4 sm:$0xff]  }
 0x168   :  { %2975 = vmatpush2.bf16.msra.mxu1 %v12007_v61  ;;  %2933 = vmatprep.subr.bf16.mxu0 %v12012_v62  ;;  %v12103_v61 = vld [vmem:[%s17550_s1 + $0x1f0] ss:$8 sps:$4 sm:$0xff]   ;;  %v12108_v62 = vld [vmem:[%s17550_s1 + $0xe4] ss:$8 sps:$4 sm:$0xff]  }
 0x169   :  { %2976 = vmatprep.subr.bf16.mxu1 %v12015_v63  ;;  %v12111_v63 = vld [vmem:[%s17550_s1 + $0x1e4] ss:$8 sps:$4 sm:$0xff]  }
 0x16b   :  { %2934 = vmatpush2.bf16.msra.mxu0 %v12010_v0  ;;  %v12106_v0 = vld [vmem:[%s17550_s1 + $0xe0] ss:$8 sps:$4 sm:$0xff]  }
 0x16c   :  { %2977 = vmatpush2.bf16.msra.mxu1 %v12013_v1  ;;  %2935 = vmatprep.subr.bf16.mxu0 %v12018_v2  ;;  %v12109_v1 = vld [vmem:[%s17550_s1 + $0x1e0] ss:$8 sps:$4 sm:$0xff]   ;;  %v12114_v2 = vld [vmem:[%s17550_s1 + $0xd4] ss:$8 sps:$4 sm:$0xff]  }
 0x16d   :  { %2978 = vmatprep.subr.bf16.mxu1 %v12021_v3  ;;  %v12117_v3 = vld [vmem:[%s17550_s1 + $0x1d4] ss:$8 sps:$4 sm:$0xff]  }
 0x16f   :  { %2936 = vmatpush2.bf16.msra.mxu0 %v12016_v4  ;;  %v12112_v4 = vld [vmem:[%s17550_s1 + $0xd0] ss:$8 sps:$4 sm:$0xff]  }
 0x170   :  { %2979 = vmatpush2.bf16.msra.mxu1 %v12019_v5  ;;  %2937 = vmatprep.subr.bf16.mxu0 %v12024_v6  ;;  %v12115_v5 = vld [vmem:[%s17550_s1 + $0x1d0] ss:$8 sps:$4 sm:$0xff]   ;;  %v12120_v6 = vld [vmem:[%s17550_s1 + $0xc4] ss:$8 sps:$4 sm:$0xff]  }
 0x171   :  { %2980 = vmatprep.subr.bf16.mxu1 %v12027_v7  ;;  %v12123_v7 = vld [vmem:[%s17550_s1 + $0x1c4] ss:$8 sps:$4 sm:$0xff]  }
 0x173   :  { %2938 = vmatpush2.bf16.msra.mxu0 %v12022_v8  ;;  %v12118_v8 = vld [vmem:[%s17550_s1 + $0xc0] ss:$8 sps:$4 sm:$0xff]  }
 0x174   :  { %2981 = vmatpush2.bf16.msra.mxu1 %v12025_v9  ;;  %2939 = vmatprep.subr.bf16.mxu0 %v12030_v10  ;;  %v12121_v9 = vld [vmem:[%s17550_s1 + $0x1c0] ss:$8 sps:$4 sm:$0xff]   ;;  %v12126_v10 = vld [vmem:[%s17550_s1 + $0xb4] ss:$8 sps:$4 sm:$0xff]  }
 0x175   :  { %2982 = vmatprep.subr.bf16.mxu1 %v12033_v11  ;;  %v12129_v11 = vld [vmem:[%s17550_s1 + $0x1b4] ss:$8 sps:$4 sm:$0xff]  }
 0x177   :  { %2940 = vmatpush2.bf16.msra.mxu0 %v12028_v12  ;;  %v12124_v12 = vld [vmem:[%s17550_s1 + $0xb0] ss:$8 sps:$4 sm:$0xff]  }
 0x178   :  { %2983 = vmatpush2.bf16.msra.mxu1 %v12031_v13  ;;  %2941 = vmatprep.subr.bf16.mxu0 %v12036_v14  ;;  %v12127_v13 = vld [vmem:[%s17550_s1 + $0x1b0] ss:$8 sps:$4 sm:$0xff]   ;;  %v12132_v14 = vld [vmem:[%s17550_s1 + $0xa4] ss:$8 sps:$4 sm:$0xff]  }
 0x179   :  { %2984 = vmatprep.subr.bf16.mxu1 %v12039_v15  ;;  %v12135_v15 = vld [vmem:[%s17550_s1 + $0x1a4] ss:$8 sps:$4 sm:$0xff]  }
 0x17b   :  { %2942 = vmatpush2.bf16.msra.mxu0 %v12034_v16  ;;  %v12130_v16 = vld [vmem:[%s17550_s1 + $0xa0] ss:$8 sps:$4 sm:$0xff]  }
 0x17c   :  { %2985 = vmatpush2.bf16.msra.mxu1 %v12037_v17  ;;  %2943 = vmatprep.subr.bf16.mxu0 %v12042_v18  ;;  %v12133_v17 = vld [vmem:[%s17550_s1 + $0x1a0] ss:$8 sps:$4 sm:$0xff]   ;;  %v12138_v18 = vld [vmem:[%s17550_s1 + $0x94] ss:$8 sps:$4 sm:$0xff]  }
 0x17d   :  { %2986 = vmatprep.subr.bf16.mxu1 %v12045_v19  ;;  %v12141_v19 = vld [vmem:[%s17550_s1 + $0x194] ss:$8 sps:$4 sm:$0xff]  }
 0x17f   :  { %2944 = vmatpush2.bf16.msra.mxu0 %v12040_v20  ;;  %v12136_v20 = vld [vmem:[%s17550_s1 + $0x90] ss:$8 sps:$4 sm:$0xff]  }
 0x180   :  { %2987 = vmatpush2.bf16.msra.mxu1 %v12043_v21  ;;  %5534 = vmatprep.subr.bf16.mxu0 %v12054_v24  ;;  %v12139_v21 = vld [vmem:[%s17550_s1 + $0x190] ss:$8 sps:$4 sm:$0xff]   ;;  %v12142_v24 = vld [vmem:[%s17550_s1 + $0x80] ss:$8 sps:$4 sm:$0xff]  }
 0x181   :  { %5577 = vmatprep.subr.bf16.mxu1 %v12057_v25  ;;  %v12145_v25 = vld [vmem:[%s17550_s1 + $0x180] ss:$8 sps:$4 sm:$0xff]  }
 0x182   :  { %2946 = vmatmul.mubr.bf16.vlgmr.msra.gmra.mxu0 %v12046_v22  ;;  %v12144_v22 = vld [vmem:[%s17550_s1 + $0x84] ss:$8 sps:$4 sm:$0xff]  }
 0x183   :  { %2989 = vmatmul.mubr.bf16.vlgmr.msra.gmra.mxu1 %v12049_v23  ;;  %5535 = vmatpush1.bf16.msra.mxu0 %v12052_v26  ;;  %v12147_v23 = vld [vmem:[%s17550_s1 + $0x184] ss:$8 sps:$4 sm:$0xff]   ;;  %v12148_v26 = vld [vmem:[%s17551_s0 + $0x18] ss:$144 sps:$4 sm:$0xff]  }
 0x184   :  { %5578 = vmatpush1.bf16.msra.mxu1 %v12055_v27  ;;  %5536 = vmatprep.subr.bf16.mxu0 %v12060_v28  ;;  %v12151_v27 = vld [vmem:[%s17551_s0 + $0x20] ss:$144 sps:$4 sm:$0xff]   ;;  %v12156_v28 = vld [vmem:[%s17550_s1 + $0x274] ss:$8 sps:$4 sm:$0xff]  }
 0x185   :  { %5579 = vmatprep.subr.bf16.mxu1 %v12063_v29  ;;  %5566 = vmatprep.mubr.bf16.mxu0 %v12150_v32  ;;  %v12159_v29 = vld [vmem:[%s17550_s1 + $0x374] ss:$8 sps:$4 sm:$0xff]   ;;  %v12162_v32 = vld [vmem:[%s17550_s1 + $0x264] ss:$8 sps:$4 sm:$0xff]  }
 0x186   :  { %5609 = vmatprep.mubr.bf16.mxu1 %v12153_v33  ;;  %v12165_v33 = vld [vmem:[%s17550_s1 + $0x364] ss:$8 sps:$4 sm:$0xff]  }
 0x187   :  { %5537 = vmatpush1.bf16.msra.mxu0 %v12058_v30  ;;  %v12154_v30 = vld [vmem:[%s17550_s1 + $0x270] ss:$8 sps:$4 sm:$0xff]  }
 0x188   :  { %5580 = vmatpush1.bf16.msra.mxu1 %v12061_v31  ;;  %5538 = vmatprep.subr.bf16.mxu0 %v12066_v34  ;;  %v12157_v31 = vld [vmem:[%s17550_s1 + $0x370] ss:$8 sps:$4 sm:$0xff]   ;;  %v12160_v34 = vld [vmem:[%s17550_s1 + $0x260] ss:$8 sps:$4 sm:$0xff]  }
 0x189   :  { %5581 = vmatprep.subr.bf16.mxu1 %v12069_v35  ;;  %v12163_v35 = vld [vmem:[%s17550_s1 + $0x360] ss:$8 sps:$4 sm:$0xff]  }
 0x18b   :  { %5539 = vmatpush1.bf16.msra.mxu0 %v12064_v36  ;;  %v12252_v36 = vld [vmem:[%s17551_s0 + $0x2c] ss:$144 sps:$4 sm:$0xff]  }
 0x18c   :  { %5582 = vmatpush1.bf16.msra.mxu1 %v12067_v37  ;;  %5540 = vmatprep.subr.bf16.mxu0 %v12072_v38  ;;  %v12255_v37 = vld [vmem:[%s17551_s0 + $0x34] ss:$144 sps:$4 sm:$0xff]  }
 0x18d   :  { %5583 = vmatprep.subr.bf16.mxu1 %v12075_v39  ;;  %v12168_v38 = vld [vmem:[%s17550_s1 + $0x254] ss:$8 sps:$4 sm:$0xff]  }
 0x18e   :  { %v12171_v39 = vld [vmem:[%s17550_s1 + $0x354] ss:$8 sps:$4 sm:$0xff]  }
 0x18f   :  { %5541 = vmatpush1.bf16.msra.mxu0 %v12070_v40  ;;  %v12166_v40 = vld [vmem:[%s17550_s1 + $0x250] ss:$8 sps:$4 sm:$0xff]  }
 0x190   :  { %5584 = vmatpush1.bf16.msra.mxu1 %v12073_v41  ;;  %5542 = vmatprep.subr.bf16.mxu0 %v12078_v42  ;;  %v12169_v41 = vld [vmem:[%s17550_s1 + $0x350] ss:$8 sps:$4 sm:$0xff]   ;;  %v12174_v42 = vld [vmem:[%s17550_s1 + $0x244] ss:$8 sps:$4 sm:$0xff]  }
 0x191   :  { %5585 = vmatprep.subr.bf16.mxu1 %v12081_v43  ;;  %v12177_v43 = vld [vmem:[%s17550_s1 + $0x344] ss:$8 sps:$4 sm:$0xff]  }
 0x193   :  { %5543 = vmatpush1.bf16.msra.mxu0 %v12076_v44  ;;  %v12172_v44 = vld [vmem:[%s17550_s1 + $0x240] ss:$8 sps:$4 sm:$0xff]  }
 0x194   :  { %5586 = vmatpush1.bf16.msra.mxu1 %v12079_v45  ;;  %5544 = vmatprep.subr.bf16.mxu0 %v12084_v46  ;;  %v12175_v45 = vld [vmem:[%s17550_s1 + $0x340] ss:$8 sps:$4 sm:$0xff]   ;;  %v12180_v46 = vld [vmem:[%s17550_s1 + $0x234] ss:$8 sps:$4 sm:$0xff]  }
 0x195   :  { %5587 = vmatprep.subr.bf16.mxu1 %v12087_v47  ;;  %v12183_v47 = vld [vmem:[%s17550_s1 + $0x334] ss:$8 sps:$4 sm:$0xff]  }
 0x197   :  { %5545 = vmatpush1.bf16.msra.mxu0 %v12082_v48  ;;  %v12178_v48 = vld [vmem:[%s17550_s1 + $0x230] ss:$8 sps:$4 sm:$0xff]  }
 0x198   :  { %5588 = vmatpush1.bf16.msra.mxu1 %v12085_v49  ;;  %5546 = vmatprep.subr.bf16.mxu0 %v12090_v50  ;;  %v12181_v49 = vld [vmem:[%s17550_s1 + $0x330] ss:$8 sps:$4 sm:$0xff]   ;;  %v12186_v50 = vld [vmem:[%s17550_s1 + $0x224] ss:$8 sps:$4 sm:$0xff]  }
 0x199   :  { %5589 = vmatprep.subr.bf16.mxu1 %v12093_v51  ;;  %v12189_v51 = vld [vmem:[%s17550_s1 + $0x324] ss:$8 sps:$4 sm:$0xff]  }
 0x19b   :  { %5547 = vmatpush1.bf16.msra.mxu0 %v12088_v52  ;;  %v12184_v52 = vld [vmem:[%s17550_s1 + $0x220] ss:$8 sps:$4 sm:$0xff]  }
 0x19c   :  { %5590 = vmatpush1.bf16.msra.mxu1 %v12091_v53  ;;  %5548 = vmatprep.subr.bf16.mxu0 %v12096_v54  ;;  %v12187_v53 = vld [vmem:[%s17550_s1 + $0x320] ss:$8 sps:$4 sm:$0xff]   ;;  %v12192_v54 = vld [vmem:[%s17550_s1 + $0x214] ss:$8 sps:$4 sm:$0xff]  }
 0x19d   :  { %5591 = vmatprep.subr.bf16.mxu1 %v12099_v55  ;;  %v12195_v55 = vld [vmem:[%s17550_s1 + $0x314] ss:$8 sps:$4 sm:$0xff]  }
 0x19f   :  { %5549 = vmatpush1.bf16.msra.mxu0 %v12094_v56  ;;  %v12190_v56 = vld [vmem:[%s17550_s1 + $0x210] ss:$8 sps:$4 sm:$0xff]  }
 0x1a0   :  { %5592 = vmatpush1.bf16.msra.mxu1 %v12097_v57  ;;  %5550 = vmatprep.subr.bf16.mxu0 %v12102_v58  ;;  %v12193_v57 = vld [vmem:[%s17550_s1 + $0x310] ss:$8 sps:$4 sm:$0xff]   ;;  %v28_v58 = vlaneseq }
 0x1a1   :  { %5593 = vmatprep.subr.bf16.mxu1 %v12105_v59  ;;  %v12198_v59 = vld [vmem:[%s17550_s1 + $0x204] ss:$8 sps:$4 sm:$0xff]  }
 0x1a2   :  { %vm14894_vm0 = vcmp.lt.s32.totalorder %v28_v58, 256 }
 0x1a3   :  { %5551 = vmatpush2.bf16.msra.mxu0 %v12100_v60  ;;  %v12201_v60 = vld [vmem:[%s17550_s1 + $0x304] ss:$8 sps:$4 sm:$0xff]  }
 0x1a4   :  { %5594 = vmatpush2.bf16.msra.mxu1 %v12103_v61  ;;  %5552 = vmatprep.subr.bf16.mxu0 %v12108_v62  ;;  %v12196_v62 = vld [vmem:[%s17550_s1 + $0x200] ss:$8 sps:$4 sm:$0xff]  }
 0x1a5   :  { %5595 = vmatprep.subr.bf16.mxu1 %v12111_v63  ;;  %v12199_v63 = vld [vmem:[%s17550_s1 + $0x300] ss:$8 sps:$4 sm:$0xff]  }
 0x1a7   :  { %5553 = vmatpush2.bf16.msra.mxu0 %v12106_v0  ;;  %v13330_v0 = vmov 0.0  }
 0x1a8   :  { %5596 = vmatpush2.bf16.msra.mxu1 %v12109_v1  ;;  %5554 = vmatprep.subr.bf16.mxu0 %v12114_v2  ;;  %32 = vst.msk [vmem:[#allocation3] sm:$0x3] %vm14894_vm0, %v13330_v0  ;;  %33 = vst.msk [vmem:[#allocation4] sm:$0x3] %vm14894_vm0, %v13330_v0  ;;  %v12204_v1 = vld [vmem:[%s17550_s1 + $0x2f4] ss:$8 sps:$4 sm:$0xff]  }
 0x1a9   :  { %5597 = vmatprep.subr.bf16.mxu1 %v12117_v3  ;;  %v12207_v2 = vld [vmem:[%s17550_s1 + $0x3f4] ss:$8 sps:$4 sm:$0xff]   ;;  %v12202_v3 = vld [vmem:[%s17550_s1 + $0x2f0] ss:$8 sps:$4 sm:$0xff]  }
 0x1ab   :  { %5555 = vmatpush2.bf16.msra.mxu0 %v12112_v4  ;;  %v12205_v4 = vld [vmem:[%s17550_s1 + $0x3f0] ss:$8 sps:$4 sm:$0xff]  }
 0x1ac   :  { %5598 = vmatpush2.bf16.msra.mxu1 %v12115_v5  ;;  %5556 = vmatprep.subr.bf16.mxu0 %v12120_v6  ;;  %v12210_v5 = vld [vmem:[%s17550_s1 + $0x2e4] ss:$8 sps:$4 sm:$0xff]  }
 0x1ad   :  { %5599 = vmatprep.subr.bf16.mxu1 %v12123_v7  ;;  %v12213_v6 = vld [vmem:[%s17550_s1 + $0x3e4] ss:$8 sps:$4 sm:$0xff]   ;;  %v12208_v7 = vld [vmem:[%s17550_s1 + $0x2e0] ss:$8 sps:$4 sm:$0xff]  }
 0x1af   :  { %5557 = vmatpush2.bf16.msra.mxu0 %v12118_v8  ;;  %v12211_v8 = vld [vmem:[%s17550_s1 + $0x3e0] ss:$8 sps:$4 sm:$0xff]  }
 0x1b0   :  { %5600 = vmatpush2.bf16.msra.mxu1 %v12121_v9  ;;  %5558 = vmatprep.subr.bf16.mxu0 %v12126_v10  ;;  %v12216_v9 = vld [vmem:[%s17550_s1 + $0x2d4] ss:$8 sps:$4 sm:$0xff]  }
 0x1b1   :  { %5601 = vmatprep.subr.bf16.mxu1 %v12129_v11  ;;  %v12219_v10 = vld [vmem:[%s17550_s1 + $0x3d4] ss:$8 sps:$4 sm:$0xff]   ;;  %v12214_v11 = vld [vmem:[%s17550_s1 + $0x2d0] ss:$8 sps:$4 sm:$0xff]  }
 0x1b3   :  { %5559 = vmatpush2.bf16.msra.mxu0 %v12124_v12  ;;  %v12217_v12 = vld [vmem:[%s17550_s1 + $0x3d0] ss:$8 sps:$4 sm:$0xff]  }
 0x1b4   :  { %5602 = vmatpush2.bf16.msra.mxu1 %v12127_v13  ;;  %5560 = vmatprep.subr.bf16.mxu0 %v12132_v14  ;;  %v12222_v13 = vld [vmem:[%s17550_s1 + $0x2c4] ss:$8 sps:$4 sm:$0xff]  }
 0x1b5   :  { %5603 = vmatprep.subr.bf16.mxu1 %v12135_v15  ;;  %v12225_v14 = vld [vmem:[%s17550_s1 + $0x3c4] ss:$8 sps:$4 sm:$0xff]   ;;  %v12220_v15 = vld [vmem:[%s17550_s1 + $0x2c0] ss:$8 sps:$4 sm:$0xff]  }
 0x1b7   :  { %5561 = vmatpush2.bf16.msra.mxu0 %v12130_v16  ;;  %v12223_v16 = vld [vmem:[%s17550_s1 + $0x3c0] ss:$8 sps:$4 sm:$0xff]  }
 0x1b8   :  { %5604 = vmatpush2.bf16.msra.mxu1 %v12133_v17  ;;  %5562 = vmatprep.subr.bf16.mxu0 %v12138_v18  ;;  %v12228_v17 = vld [vmem:[%s17550_s1 + $0x2b4] ss:$8 sps:$4 sm:$0xff]  }
 0x1b9   :  { %5605 = vmatprep.subr.bf16.mxu1 %v12141_v19  ;;  %v12231_v18 = vld [vmem:[%s17550_s1 + $0x3b4] ss:$8 sps:$4 sm:$0xff]   ;;  %v12226_v19 = vld [vmem:[%s17550_s1 + $0x2b0] ss:$8 sps:$4 sm:$0xff]  }
 0x1bb   :  { %5563 = vmatpush2.bf16.msra.mxu0 %v12136_v20  ;;  %v12229_v20 = vld [vmem:[%s17550_s1 + $0x3b0] ss:$8 sps:$4 sm:$0xff]  }
 0x1bc   :  { %5606 = vmatpush2.bf16.msra.mxu1 %v12139_v21  ;;  %5564 = vmatprep.subr.bf16.mxu0 %v12144_v22  ;;  %v12234_v21 = vld [vmem:[%s17550_s1 + $0x2a4] ss:$8 sps:$4 sm:$0xff]  }
 0x1bd   :  { %5607 = vmatprep.subr.bf16.mxu1 %v12147_v23  ;;  %v12237_v22 = vld [vmem:[%s17550_s1 + $0x3a4] ss:$8 sps:$4 sm:$0xff]   ;;  %v12232_v23 = vld [vmem:[%s17550_s1 + $0x2a0] ss:$8 sps:$4 sm:$0xff]  }
 0x1bf   :  { %5565 = vmatpush2.bf16.msra.mxu0 %v12142_v24  ;;  %v12235_v24 = vld [vmem:[%s17550_s1 + $0x3a0] ss:$8 sps:$4 sm:$0xff]  }
 0x1c0   :  { %5608 = vmatpush2.bf16.msra.mxu1 %v12145_v25  ;;  %5620 = vmatprep.subr.bf16.mxu0 %v12156_v28  ;;  %v12240_v25 = vld [vmem:[%s17550_s1 + $0x294] ss:$8 sps:$4 sm:$0xff]   ;;  %v12241_v28 = vld [vmem:[%s17550_s1 + $0x390] ss:$8 sps:$4 sm:$0xff]  }
 0x1c1   :  { %5663 = vmatprep.subr.bf16.mxu1 %v12159_v29  ;;  %v12246_v29 = vld [vmem:[%s17550_s1 + $0x284] ss:$8 sps:$4 sm:$0xff]  }
 0x1c2   :  { %5567 = vmatmul.mubr.bf16.vlgmr.msra.gmra.mxu0 %v12148_v26  ;;  %v12243_v26 = vld [vmem:[%s17550_s1 + $0x394] ss:$8 sps:$4 sm:$0xff]  }
 0x1c3   :  { %5610 = vmatmul.mubr.bf16.vlgmr.msra.gmra.mxu1 %v12151_v27  ;;  %5621 = vmatpush1.bf16.msra.mxu0 %v12154_v30  ;;  %v12238_v27 = vld [vmem:[%s17550_s1 + $0x290] ss:$8 sps:$4 sm:$0xff]   ;;  %v12249_v30 = vld [vmem:[%s17550_s1 + $0x384] ss:$8 sps:$4 sm:$0xff]  }
 0x1c4   :  { %5664 = vmatpush1.bf16.msra.mxu1 %v12157_v31  ;;  %5622 = vmatprep.subr.bf16.mxu0 %v12162_v32  ;;  %v12244_v31 = vld [vmem:[%s17550_s1 + $0x280] ss:$8 sps:$4 sm:$0xff]  }
 0x1c5   :  { %5665 = vmatprep.subr.bf16.mxu1 %v12165_v33  ;;  %5652 = vmatprep.mubr.bf16.mxu0 %v12252_v36  ;;  %v12247_v32 = vld [vmem:[%s17550_s1 + $0x380] ss:$8 sps:$4 sm:$0xff]   ;;  %v15006_v33 = vpop.f32.mrf.mxu0 }
 0x1c6   :  { %5695 = vmatprep.mubr.bf16.mxu1 %v12255_v37  ;;  %v12253_v36 = vld [vmem:[%s17551_s0 + $0x30] ss:$144 sps:$4 sm:$0xff]   ;;  %v12258_v37 = vld [vmem:[%s17550_s1 + $0x474] ss:$8 sps:$4 sm:$0xff]  }
 0x1c7   :  { %5623 = vmatpush1.bf16.msra.mxu0 %v12160_v34  ;;  %v15008_v34 = vpop.f32.mrf.mxu1 }
 0x1c8   :  { %5666 = vmatpush1.bf16.msra.mxu1 %v12163_v35  ;;  %5624 = vmatprep.subr.bf16.mxu0 %v12168_v38  ;;  %v12250_v35 = vld [vmem:[%s17551_s0 + $0x28] ss:$144 sps:$4 sm:$0xff]   ;;  %v12261_v38 = vld [vmem:[%s17550_s1 + $0x574] ss:$8 sps:$4 sm:$0xff]  }
 0x1c9   :  { %5667 = vmatprep.subr.bf16.mxu1 %v12171_v39  ;;  %v12256_v39 = vld [vmem:[%s17550_s1 + $0x470] ss:$8 sps:$4 sm:$0xff]  }
 0x1cb   :  { %5625 = vmatpush1.bf16.msra.mxu0 %v12166_v40  ;;  %v12259_v40 = vld [vmem:[%s17550_s1 + $0x570] ss:$8 sps:$4 sm:$0xff]  }
 0x1cc   :  { %5668 = vmatpush1.bf16.msra.mxu1 %v12169_v41  ;;  %5626 = vmatprep.subr.bf16.mxu0 %v12174_v42  ;;  %v15028_v41 = vpop.f32.mrf.mxu0  ;;  %v15030_v42 = vpop.f32.mrf.mxu1 }
 0x1cd   :  { %5669 = vmatprep.subr.bf16.mxu1 %v12177_v43  ;;  %v12264_v43 = vld [vmem:[%s17550_s1 + $0x464] ss:$8 sps:$4 sm:$0xff]  }
 0x1cf   :  { %5627 = vmatpush1.bf16.msra.mxu0 %v12172_v44  ;;  %v12267_v44 = vld [vmem:[%s17550_s1 + $0x564] ss:$8 sps:$4 sm:$0xff]  }
 0x1d0   :  { %5670 = vmatpush1.bf16.msra.mxu1 %v12175_v45  ;;  %5628 = vmatprep.subr.bf16.mxu0 %v12180_v46  ;;  %v12262_v45 = vld [vmem:[%s17550_s1 + $0x460] ss:$8 sps:$4 sm:$0xff]  }
 0x1d1   :  { %5671 = vmatprep.subr.bf16.mxu1 %v12183_v47  ;;  %v12265_v46 = vld [vmem:[%s17550_s1 + $0x560] ss:$8 sps:$4 sm:$0xff]   ;;  %v12354_v47 = vld [vmem:[%s17551_s0 + $0x3c] ss:$144 sps:$4 sm:$0xff]  }
 0x1d3   :  { %5629 = vmatpush1.bf16.msra.mxu0 %v12178_v48  ;;  %v12357_v48 = vld [vmem:[%s17551_s0 + $0x44] ss:$144 sps:$4 sm:$0xff]  }
 0x1d4   :  { %5672 = vmatpush1.bf16.msra.mxu1 %v12181_v49  ;;  %5630 = vmatprep.subr.bf16.mxu0 %v12186_v50  ;;  %v15050_v49 = vpop.f32.mrf.mxu0  ;;  %v15052_v50 = vpop.f32.mrf.mxu1 }
 0x1d5   :  { %5673 = vmatprep.subr.bf16.mxu1 %v12189_v51  ;;  %v12270_v51 = vld [vmem:[%s17550_s1 + $0x454] ss:$8 sps:$4 sm:$0xff]  }
 0x1d7   :  { %5631 = vmatpush1.bf16.msra.mxu0 %v12184_v52  ;;  %v12273_v52 = vld [vmem:[%s17550_s1 + $0x554] ss:$8 sps:$4 sm:$0xff]  }
 0x1d8   :  { %5674 = vmatpush1.bf16.msra.mxu1 %v12187_v53  ;;  %5632 = vmatprep.subr.bf16.mxu0 %v12192_v54  ;;  %v12268_v53 = vld [vmem:[%s17550_s1 + $0x450] ss:$8 sps:$4 sm:$0xff]  }
 0x1d9   :  { %5675 = vmatprep.subr.bf16.mxu1 %v12195_v55  ;;  %v12271_v54 = vld [vmem:[%s17550_s1 + $0x550] ss:$8 sps:$4 sm:$0xff]   ;;  %v15066_v55 = vpop.f32.mrf.mxu0 }
 0x1db   :  { %5633 = vmatpush1.bf16.msra.mxu0 %v12190_v56  ;;  %v15068_v56 = vpop.f32.mrf.mxu1 }
 0x1dc   :  { %5676 = vmatpush1.bf16.msra.mxu1 %v12193_v57  ;;  %5634 = vmatprep.subr.bf16.mxu0 %v12198_v59  ;;  %v12276_v57 = vld [vmem:[%s17550_s1 + $0x444] ss:$8 sps:$4 sm:$0xff]  }
 0x1dd   :  { %5677 = vmatprep.subr.bf16.mxu1 %v12201_v60  ;;  %v12279_v59 = vld [vmem:[%s17550_s1 + $0x544] ss:$8 sps:$4 sm:$0xff]   ;;  %v15076_v60 = vpop.f32.mrf.mxu0 }
 0x1df   :  { %5635 = vmatpush1.bf16.msra.mxu0 %v12196_v62  ;;  %v15078_v62 = vpop.f32.mrf.mxu1 }
 0x1e0   :  { %5678 = vmatpush1.bf16.msra.mxu1 %v12199_v63  ;;  %5636 = vmatprep.subr.bf16.mxu0 %v12204_v1  ;;  %v12274_v63 = vld [vmem:[%s17550_s1 + $0x440] ss:$8 sps:$4 sm:$0xff]  }
 0x1e1   :  { %5679 = vmatprep.subr.bf16.mxu1 %v12207_v2  ;;  %v12277_v1 = vld [vmem:[%s17550_s1 + $0x540] ss:$8 sps:$4 sm:$0xff]   ;;  %v12282_v2 = vld [vmem:[%s17550_s1 + $0x434] ss:$8 sps:$4 sm:$0xff]  }
 0x1e3   :  { %5637 = vmatpush2.bf16.msra.mxu0 %v12202_v3  ;;  %v12285_v3 = vld [vmem:[%s17550_s1 + $0x534] ss:$8 sps:$4 sm:$0xff]  }
 0x1e4   :  { %5680 = vmatpush2.bf16.msra.mxu1 %v12205_v4  ;;  %5638 = vmatprep.subr.bf16.mxu0 %v12210_v5  ;;  %v15092_v4 = vpop.f32.mrf.mxu0  ;;  %v15094_v5 = vpop.f32.mrf.mxu1 }
 0x1e5   :  { %5681 = vmatprep.subr.bf16.mxu1 %v12213_v6  ;;  %v12280_v6 = vld [vmem:[%s17550_s1 + $0x430] ss:$8 sps:$4 sm:$0xff]  }
 0x1e7   :  { %5639 = vmatpush2.bf16.msra.mxu0 %v12208_v7  ;;  %v12283_v7 = vld [vmem:[%s17550_s1 + $0x530] ss:$8 sps:$4 sm:$0xff]  }
 0x1e8   :  { %5682 = vmatpush2.bf16.msra.mxu1 %v12211_v8  ;;  %5640 = vmatprep.subr.bf16.mxu0 %v12216_v9  ;;  %v12288_v8 = vld [vmem:[%s17550_s1 + $0x424] ss:$8 sps:$4 sm:$0xff]  }
 0x1e9   :  { %5683 = vmatprep.subr.bf16.mxu1 %v12219_v10  ;;  %v12291_v9 = vld [vmem:[%s17550_s1 + $0x524] ss:$8 sps:$4 sm:$0xff]   ;;  %v15108_v10 = vpop.f32.mrf.mxu0 }
 0x1eb   :  { %5641 = vmatpush2.bf16.msra.mxu0 %v12214_v11  ;;  %v15110_v11 = vpop.f32.mrf.mxu1 }
 0x1ec   :  { %5684 = vmatpush2.bf16.msra.mxu1 %v12217_v12  ;;  %5642 = vmatprep.subr.bf16.mxu0 %v12222_v13  ;;  %v12286_v12 = vld [vmem:[%s17550_s1 + $0x420] ss:$8 sps:$4 sm:$0xff]  }
 0x1ed   :  { %5685 = vmatprep.subr.bf16.mxu1 %v12225_v14  ;;  %v12289_v13 = vld [vmem:[%s17550_s1 + $0x520] ss:$8 sps:$4 sm:$0xff]   ;;  %v12294_v14 = vld [vmem:[%s17550_s1 + $0x414] ss:$8 sps:$4 sm:$0xff]  }
 0x1ef   :  { %5643 = vmatpush2.bf16.msra.mxu0 %v12220_v15  ;;  %v12297_v15 = vld [vmem:[%s17550_s1 + $0x514] ss:$8 sps:$4 sm:$0xff]  }
 0x1f0   :  { %5686 = vmatpush2.bf16.msra.mxu1 %v12223_v16  ;;  %5644 = vmatprep.subr.bf16.mxu0 %v12228_v17  ;;  %v15124_v16 = vpop.f32.mrf.mxu0  ;;  %v15126_v17 = vpop.f32.mrf.mxu1 }
 0x1f1   :  { %5687 = vmatprep.subr.bf16.mxu1 %v12231_v18  ;;  %v12292_v18 = vld [vmem:[%s17550_s1 + $0x410] ss:$8 sps:$4 sm:$0xff]  }
 0x1f3   :  { %5645 = vmatpush2.bf16.msra.mxu0 %v12226_v19  ;;  %v12295_v19 = vld [vmem:[%s17550_s1 + $0x510] ss:$8 sps:$4 sm:$0xff]  }
 0x1f4   :  { %5688 = vmatpush2.bf16.msra.mxu1 %v12229_v20  ;;  %5646 = vmatprep.subr.bf16.mxu0 %v12234_v21  ;;  %v15134_v20 = vpop.f32.mrf.mxu0  ;;  %v15136_v21 = vpop.f32.mrf.mxu1 }
 0x1f5   :  { %5689 = vmatprep.subr.bf16.mxu1 %v12237_v22  ;;  %v12300_v22 = vld [vmem:[%s17550_s1 + $0x404] ss:$8 sps:$4 sm:$0xff]  }
 0x1f7   :  { %5647 = vmatpush2.bf16.msra.mxu0 %v12232_v23  ;;  %v12303_v23 = vld [vmem:[%s17550_s1 + $0x504] ss:$8 sps:$4 sm:$0xff]  }
 0x1f8   :  { %5690 = vmatpush2.bf16.msra.mxu1 %v12235_v24  ;;  %5648 = vmatprep.subr.bf16.mxu0 %v12240_v25  ;;  %v12298_v24 = vld [vmem:[%s17550_s1 + $0x400] ss:$8 sps:$4 sm:$0xff]  }
 0x1f9   :  { %5691 = vmatprep.subr.bf16.mxu1 %v12243_v26  ;;  %v12301_v25 = vld [vmem:[%s17550_s1 + $0x500] ss:$8 sps:$4 sm:$0xff]   ;;  %v15150_v26 = vpop.f32.mrf.mxu0 }
 0x1fb   :  { %5649 = vmatpush2.bf16.msra.mxu0 %v12238_v27  ;;  %v15152_v27 = vpop.f32.mrf.mxu1 }
 0x1fc   :  { %5692 = vmatpush2.bf16.msra.mxu1 %v12241_v28  ;;  %5650 = vmatprep.subr.bf16.mxu0 %v12246_v29  ;;  %v12306_v28 = vld [vmem:[%s17550_s1 + $0x4f4] ss:$8 sps:$4 sm:$0xff]  }
 0x1fd   :  { %5693 = vmatprep.subr.bf16.mxu1 %v12249_v30  ;;  %v12309_v29 = vld [vmem:[%s17550_s1 + $0x5f4] ss:$8 sps:$4 sm:$0xff]   ;;  %v12304_v30 = vld [vmem:[%s17550_s1 + $0x4f0] ss:$8 sps:$4 sm:$0xff]  }
 0x1ff   :  { %5651 = vmatpush2.bf16.msra.mxu0 %v12244_v31  ;;  %v12307_v31 = vld [vmem:[%s17550_s1 + $0x5f0] ss:$8 sps:$4 sm:$0xff]  }
 0x200   :  { %5694 = vmatpush2.bf16.msra.mxu1 %v12247_v32  ;;  %5706 = vmatprep.subr.bf16.mxu0 %v12258_v37  ;;  %v15166_v32 = vpop.f32.mrf.mxu0  ;;  %v12315_v37 = vld [vmem:[%s17550_s1 + $0x5e4] ss:$8 sps:$4 sm:$0xff]  }
 0x201   :  { %5749 = vmatprep.subr.bf16.mxu1 %v12261_v38  ;;  %v12310_v38 = vld [vmem:[%s17550_s1 + $0x4e0] ss:$8 sps:$4 sm:$0xff]  }
 0x202   :  { %5653 = vmatmul.mubr.bf16.vlgmr.msra.gmra.mxu0 %v12250_v35  ;;  %v15168_v35 = vpop.f32.mrf.mxu1 }
 0x203   :  { %5696 = vmatmul.mubr.bf16.vlgmr.msra.gmra.mxu1 %v12253_v36  ;;  %5707 = vmatpush1.bf16.msra.mxu0 %v12256_v39  ;;  %v12312_v36 = vld [vmem:[%s17550_s1 + $0x4e4] ss:$8 sps:$4 sm:$0xff]   ;;  %v12313_v39 = vld [vmem:[%s17550_s1 + $0x5e0] ss:$8 sps:$4 sm:$0xff]  }
 0x204   :  { %5750 = vmatpush1.bf16.msra.mxu1 %v12259_v40  ;;  %5708 = vmatprep.subr.bf16.mxu0 %v12264_v43  ;;  %v15182_v40 = vpop.f32.mrf.mxu0  ;;  %v15184_v43 = vpop.f32.mrf.mxu1 }
 0x205   :  { %5751 = vmatprep.subr.bf16.mxu1 %v12267_v44  ;;  %5738 = vmatprep.mubr.bf16.mxu0 %v12354_v47  ;;  %v12318_v44 = vld [vmem:[%s17550_s1 + $0x4d4] ss:$8 sps:$4 sm:$0xff]  }
 0x206   :  { %5781 = vmatprep.mubr.bf16.mxu1 %v12357_v48  ;;  %v15192_v47 = vpop.f32.mrf.mxu1  ;;  %v12316_v48 = vld [vmem:[%s17550_s1 + $0x4d0] ss:$8 sps:$4 sm:$0xff]  }
 0x207   :  { %5709 = vmatpush1.bf16.msra.mxu0 %v12262_v45  ;;  %v12321_v45 = vld [vmem:[%s17550_s1 + $0x5d4] ss:$8 sps:$4 sm:$0xff]  }
 0x208   :  { %5752 = vmatpush1.bf16.msra.mxu1 %v12265_v46  ;;  %5710 = vmatprep.subr.bf16.mxu0 %v12270_v51  ;;  %v2775_v46 = vpop.f32.mrf.mxu0  ;;  %v12319_v51 = vld [vmem:[%s17550_s1 + $0x5d0] ss:$8 sps:$4 sm:$0xff]  }
 0x209   :  { %5753 = vmatprep.subr.bf16.mxu1 %v12273_v52  ;;  %v12324_v52 = vld [vmem:[%s17550_s1 + $0x4c4] ss:$8 sps:$4 sm:$0xff]  }
 0x20b   :  { %5711 = vmatpush1.bf16.msra.mxu0 %v12268_v53  ;;  %v12327_v53 = vld [vmem:[%s17550_s1 + $0x5c4] ss:$8 sps:$4 sm:$0xff]  }
 0x20c   :  { %5754 = vmatpush1.bf16.msra.mxu1 %v12271_v54  ;;  %5712 = vmatprep.subr.bf16.mxu0 %v12276_v57  ;;  %v2561_v54 = vadd.f32 %v15008_v34, %v15006_v33  ;;  %v2777_v57 = vpop.f32.mrf.mxu0  ;;  %v12330_v33 = vld [vmem:[%s17550_s1 + $0x4b4] ss:$8 sps:$4 sm:$0xff]  }
 0x20d   :  { %5755 = vmatprep.subr.bf16.mxu1 %v12279_v59  ;;  %v15208_v59 = vpop.f32.mrf.mxu1  ;;  %v12333_v34 = vld [vmem:[%s17550_s1 + $0x5b4] ss:$8 sps:$4 sm:$0xff]  }
 0x20f   :  { %5713 = vmatpush1.bf16.msra.mxu0 %v12274_v63  ;;  %v2563_v63 = vadd.f32 %v15030_v42, %v15028_v41  ;;  %v2565_v41 = vadd.f32 %v15052_v50, %v15050_v49  ;;  %v12331_v49 = vld [vmem:[%s17550_s1 + $0x5b0] ss:$8 sps:$4 sm:$0xff]   ;;  %v12336_v50 = vld [vmem:[%s17550_s1 + $0x4a4] ss:$8 sps:$4 sm:$0xff]  }
 0x210   :  { %5756 = vmatpush1.bf16.msra.mxu1 %v12277_v1  ;;  %5714 = vmatprep.subr.bf16.mxu0 %v12282_v2  ;;  %v2604_v1 = vadd.f32 %v15076_v60, %v2561_v54  ;;  %v12322_v2 = vld [vmem:[%s17550_s1 + $0x4c0] ss:$8 sps:$4 sm:$0xff]   ;;  %v2779_v60 = vpop.f32.mrf.mxu0 }
 0x211   :  { %5757 = vmatprep.subr.bf16.mxu1 %v12285_v3  ;;  %v12325_v3 = vld [vmem:[%s17550_s1 + $0x5c0] ss:$8 sps:$4 sm:$0xff]   ;;  %v2606_v42 = vadd.f32 %v15092_v4, %v2563_v63  ;;  %v12358_v63 = vld [vmem:[%s17550_s1 + $0x670] ss:$8 sps:$4 sm:$0xff]  }
 0x213   :  { %5715 = vmatpush1.bf16.msra.mxu0 %v12280_v6  ;;  %v15228_v6 = vpop.f32.mrf.mxu1 }
 0x214   :  { %5758 = vmatpush1.bf16.msra.mxu1 %v12283_v7  ;;  %5716 = vmatprep.subr.bf16.mxu0 %v12288_v8  ;;  %v2567_v7 = vadd.f32 %v15068_v56, %v15066_v55  ;;  %v2647_v8 = vadd.f32 %v15078_v62, %v2604_v1  ;;  %v12339_v55 = vld [vmem:[%s17550_s1 + $0x5a4] ss:$8 sps:$4 sm:$0xff]   ;;  %v2649_v56 = vadd.f32 %v15094_v5, %v2606_v42  ;;  %v12337_v5 = vld [vmem:[%s17550_s1 + $0x5a0] ss:$8 sps:$4 sm:$0xff]   ;;  %v12361_v1 = vld [vmem:[%s17550_s1 + $0x770] ss:$8 sps:$4 sm:$0xff]  }
 0x215   :  { %5759 = vmatprep.subr.bf16.mxu1 %v12291_v9  ;;  %v2608_v9 = vadd.f32 %v15108_v10, %v2565_v41  ;;  %v2781_v10 = vpop.f32.mrf.mxu0 }
 0x216   :  { %v2610_v62 = vadd.f32 %v15124_v16, %v2567_v7  ;;  %v2690_v4 = vadd.f32 %v15134_v20, %v2647_v8  ;;  %v12345_v20 = vld [vmem:[%s17550_s1 + $0x594] ss:$8 sps:$4 sm:$0xff]  }
 0x217   :  { %5717 = vmatpush1.bf16.msra.mxu0 %v12286_v12  ;;  %v12328_v12 = vld [vmem:[%s17550_s1 + $0x4b0] ss:$8 sps:$4 sm:$0xff]   ;;  %v12456_v7 = vld [vmem:[%s17551_s0 + $0x4c] ss:$144 sps:$4 sm:$0xff]   ;;  %v12459_v8 = vld [vmem:[%s17551_s0 + $0x54] ss:$144 sps:$4 sm:$0xff]  }
 0x218   :  { %5760 = vmatpush1.bf16.msra.mxu1 %v12289_v13  ;;  %5718 = vmatprep.subr.bf16.mxu0 %v12294_v14  ;;  %v2824_v13 = vpop.f32.mrf.mxu1  ;;  %v2651_v14 = vadd.f32 %v15110_v11, %v2608_v9  ;;  %v12342_v11 = vld [vmem:[%s17550_s1 + $0x494] ss:$8 sps:$4 sm:$0xff]  }
 0x219   :  { %5761 = vmatprep.subr.bf16.mxu1 %v12297_v15  ;;  %v2692_v15 = vadd.f32 %v15150_v26, %v2649_v56 }
 0x21a   :  { %v2904_v16 = vpop.f32.mrf.mxu1 }
 0x21b   :  { %5719 = vmatpush1.bf16.msra.mxu0 %v12292_v18  ;;  %v12334_v18 = vld [vmem:[%s17550_s1 + $0x4a0] ss:$8 sps:$4 sm:$0xff]  }
 0x21c   :  { %5762 = vmatpush1.bf16.msra.mxu1 %v12295_v19  ;;  %5720 = vmatprep.subr.bf16.mxu0 %v12300_v22  ;;  %v2861_v19 = vpop.f32.mrf.mxu0  ;;  %v2653_v22 = vadd.f32 %v15126_v17, %v2610_v62 }
 0x21d   :  { %5763 = vmatprep.subr.bf16.mxu1 %v12303_v23  ;;  %v2733_v23 = vadd.f32 %v15136_v21, %v2690_v4  ;;  %v12348_v21 = vld [vmem:[%s17550_s1 + $0x484] ss:$8 sps:$4 sm:$0xff]   ;;  %v12372_v4 = vld [vmem:[%s17550_s1 + $0x654] ss:$8 sps:$4 sm:$0xff]  }
 0x21e   :  { %v2696_v26 = vadd.f32 %v15182_v40, %v2653_v22  ;;  %v2863_v17 = vpop.f32.mrf.mxu0  ;;  %v12346_v40 = vld [vmem:[%s17550_s1 + $0x480] ss:$8 sps:$4 sm:$0xff]  }
 0x21f   :  { %5721 = vmatpush1.bf16.msra.mxu0 %v12298_v24  ;;  %v2694_v24 = vadd.f32 %v15166_v32, %v2651_v14 }
 0x220   :  { %5764 = vmatpush1.bf16.msra.mxu1 %v12301_v25  ;;  %5722 = vmatprep.subr.bf16.mxu0 %v12306_v28  ;;  %v2735_v25 = vadd.f32 %v15152_v27, %v2692_v15  ;;  %v2776_v28 = vadd.f32 %v2775_v46, %v2733_v23  ;;  %v12351_v27 = vld [vmem:[%s17550_s1 + $0x584] ss:$8 sps:$4 sm:$0xff]   ;;  %v12370_v15 = vld [vmem:[%s17550_s1 + $0x650] ss:$8 sps:$4 sm:$0xff]  }
 0x221   :  { %5765 = vmatprep.subr.bf16.mxu1 %v12309_v29  ;;  %v12340_v29 = vld [vmem:[%s17550_s1 + $0x490] ss:$8 sps:$4 sm:$0xff]   ;;  %v2737_v32 = vadd.f32 %v15168_v35, %v2694_v24  ;;  %v12378_v24 = vld [vmem:[%s17550_s1 + $0x644] ss:$8 sps:$4 sm:$0xff]  }
 0x222   :  { %v12352_v35 = vld [vmem:[%s17551_s0 + $0x38] ss:$144 sps:$4 sm:$0xff]  }
 0x223   :  { %5723 = vmatpush2.bf16.msra.mxu0 %v12304_v30  ;;  %v12343_v30 = vld [vmem:[%s17550_s1 + $0x590] ss:$8 sps:$4 sm:$0xff]  }
 0x224   :  { %5766 = vmatpush2.bf16.msra.mxu1 %v12307_v31  ;;  %5724 = vmatprep.subr.bf16.mxu0 %v12312_v36  ;;  %v2906_v31 = vpop.f32.mrf.mxu1  ;;  %v2778_v36 = vadd.f32 %v2777_v57, %v2735_v25  ;;  %v12381_v25 = vld [vmem:[%s17550_s1 + $0x744] ss:$8 sps:$4 sm:$0xff]  }
 0x225   :  { %5767 = vmatprep.subr.bf16.mxu1 %v12315_v37  ;;  %v2739_v37 = vadd.f32 %v15184_v43, %v2696_v26  ;;  %v12355_v43 = vld [vmem:[%s17551_s0 + $0x40] ss:$144 sps:$4 sm:$0xff]  }
 0x226   :  { %v2908_v46 = vpop.f32.mrf.mxu1 }
 0x227   :  { %5725 = vmatpush2.bf16.msra.mxu0 %v12310_v38  ;;  %v2819_v38 = vadd.f32 %v15192_v47, %v2776_v28  ;;  %v12360_v47 = vld [vmem:[%s17550_s1 + $0x674] ss:$8 sps:$4 sm:$0xff]  }
 0x228   :  { %5768 = vmatpush2.bf16.msra.mxu1 %v12313_v39  ;;  %5726 = vmatprep.subr.bf16.mxu0 %v12318_v44  ;;  %v2780_v39 = vadd.f32 %v2779_v60, %v2737_v32  ;;  %v12349_v44 = vld [vmem:[%s17550_s1 + $0x580] ss:$8 sps:$4 sm:$0xff]  }
 0x229   :  { %5769 = vmatprep.subr.bf16.mxu1 %v12321_v45  ;;  %v2865_v45 = vpop.f32.mrf.mxu0  ;;  %v12364_v60 = vld [vmem:[%s17550_s1 + $0x660] ss:$8 sps:$4 sm:$0xff]  }
 0x22a   :  { %v2823_v54 = vadd.f32 %v15228_v6, %v2780_v39  ;;  %v12367_v6 = vld [vmem:[%s17550_s1 + $0x760] ss:$8 sps:$4 sm:$0xff]  }
 0x22b   :  { %5727 = vmatpush2.bf16.msra.mxu0 %v12316_v48  ;;  %v12363_v48 = vld [vmem:[%s17550_s1 + $0x774] ss:$8 sps:$4 sm:$0xff]   ;;  %v12379_v32 = vld [vmem:[%s17550_s1 + $0x740] ss:$8 sps:$4 sm:$0xff]  }
 0x22c   :  { %5770 = vmatpush2.bf16.msra.mxu1 %v12319_v51  ;;  %5728 = vmatprep.subr.bf16.mxu0 %v12324_v52  ;;  %v2821_v51 = vadd.f32 %v15208_v59, %v2778_v36  ;;  %v2782_v52 = vadd.f32 %v2781_v10, %v2739_v37  ;;  %v12366_v59 = vld [vmem:[%s17550_s1 + $0x664] ss:$8 sps:$4 sm:$0xff]   ;;  %v2866_v42 = vadd.f32 %v2865_v45, %v2823_v54  ;;  %v12375_v10 = vld [vmem:[%s17550_s1 + $0x754] ss:$8 sps:$4 sm:$0xff]  }
 0x22d   :  { %5771 = vmatprep.subr.bf16.mxu1 %v12327_v53  ;;  %v2862_v53 = vadd.f32 %v2861_v19, %v2819_v38  ;;  %v12384_v36 = vld [vmem:[%s17550_s1 + $0x634] ss:$8 sps:$4 sm:$0xff]   ;;  %v12390_v54 = vld [vmem:[%s17550_s1 + $0x624] ss:$8 sps:$4 sm:$0xff]  }
 0x22e   :  { %v2864_v57 = vadd.f32 %v2863_v17, %v2821_v51  ;;  %v12387_v38 = vld [vmem:[%s17550_s1 + $0x734] ss:$8 sps:$4 sm:$0xff]   ;;  %v12385_v51 = vld [vmem:[%s17550_s1 + $0x730] ss:$8 sps:$4 sm:$0xff]  }
 0x22f   :  { %5729 = vmatpush2.bf16.msra.mxu0 %v12322_v2  ;;  %v2867_v2 = vpop.f32.mrf.mxu0  ;;  %v2905_v41 = vadd.f32 %v2904_v16, %v2862_v53 }
 0x230   :  { %5772 = vmatpush2.bf16.msra.mxu1 %v12325_v3  ;;  %5730 = vmatprep.subr.bf16.mxu0 %v12330_v33  ;;  %v2910_v3 = vpop.f32.mrf.mxu1  ;;  %v12369_v33 = vld [vmem:[%s17550_s1 + $0x764] ss:$8 sps:$4 sm:$0xff]  }
 0x231   :  { %5773 = vmatprep.subr.bf16.mxu1 %v12333_v34  ;;  %v2825_v34 = vadd.f32 %v2824_v13, %v2782_v52  ;;  %v2909_v13 = vadd.f32 %v2908_v46, %v2866_v42  ;;  %v13331_v52 = vmov 1966171168   ;;  %v12388_v42 = vld [vmem:[%s17550_s1 + $0x620] ss:$8 sps:$4 sm:$0xff]  }
 0x232   :  { %v3027_v53 = vunpack.c.l.s4 %v13331_v52  ;;  %v12421_v52 = vld [vmem:[%s17550_s1 + $0x7d0] ss:$8 sps:$4 sm:$0xff]  }
 0x233   :  { %5731 = vmatpush2.bf16.msra.mxu0 %v12328_v12 }
 0x234   :  { %5774 = vmatpush2.bf16.msra.mxu1 %v12331_v49  ;;  %5732 = vmatprep.subr.bf16.mxu0 %v12336_v50  ;;  %v2907_v49 = vadd.f32 %v2906_v31, %v2864_v57  ;;  %v2868_v50 = vadd.f32 %v2867_v2, %v2825_v34  ;;  %v12393_v57 = vld [vmem:[%s17550_s1 + $0x724] ss:$8 sps:$4 sm:$0xff]  }
 0x235   :  { %5775 = vmatprep.subr.bf16.mxu1 %v12339_v55 }
 0x237   :  { %5733 = vmatpush2.bf16.msra.mxu0 %v12334_v18  ;;  %v12373_v18 = vld [vmem:[%s17550_s1 + $0x750] ss:$8 sps:$4 sm:$0xff]  }
 0x238   :  { %5776 = vmatpush2.bf16.msra.mxu1 %v12337_v5  ;;  %5734 = vmatprep.subr.bf16.mxu0 %v12342_v11  ;;  %v2911_v11 = vadd.f32 %v2910_v3, %v2868_v50 }
 0x239   :  { %5777 = vmatprep.subr.bf16.mxu1 %v12345_v20 }
 0x23b   :  { %5735 = vmatpush2.bf16.msra.mxu0 %v12340_v29  ;;  %v12376_v29 = vld [vmem:[%s17550_s1 + $0x640] ss:$8 sps:$4 sm:$0xff]  }
 0x23c   :  { %5778 = vmatpush2.bf16.msra.mxu1 %v12343_v30  ;;  %5736 = vmatprep.subr.bf16.mxu0 %v12348_v21 }
 0x23d   :  { %5779 = vmatprep.subr.bf16.mxu1 %v12351_v27 }
 0x23f   :  { %5737 = vmatpush2.bf16.msra.mxu0 %v12346_v40 }
 0x240   :  { %5780 = vmatpush2.bf16.msra.mxu1 %v12349_v44  ;;  %5792 = vmatprep.subr.bf16.mxu0 %v12360_v47 }
 0x241   :  { %5835 = vmatprep.subr.bf16.mxu1 %v12363_v48  ;;  %v12382_v48 = vld [vmem:[%s17550_s1 + $0x630] ss:$8 sps:$4 sm:$0xff]  }
 0x242   :  { %v2947_v9 = vpop.f32.mrf.mxu0  ;;  %5739 = vmatmul.mubr.bf16.vlgmr.msra.gmra.mxu0 %v12352_v35 }
 0x243   :  { %v2990_v12 = vpop.f32.mrf.mxu1  ;;  %5782 = vmatmul.mubr.bf16.vlgmr.msra.gmra.mxu1 %v12355_v43  ;;  %v2948_v55 = vadd.f32 %v2947_v9, %v2905_v41  ;;  %5793 = vmatpush1.bf16.msra.mxu0 %v12358_v63  ;;  %v12399_v9 = vld [vmem:[%s17550_s1 + $0x714] ss:$8 sps:$4 sm:$0xff]  }
 0x244   :  { %5836 = vmatpush1.bf16.msra.mxu1 %v12361_v1  ;;  %v2949_v56 = vpop.f32.mrf.mxu0  ;;  %5794 = vmatprep.subr.bf16.mxu0 %v12366_v59 }
 0x245   :  { %v2992_v62 = vpop.f32.mrf.mxu1  ;;  %5837 = vmatprep.subr.bf16.mxu1 %v12369_v33  ;;  %v2950_v14 = vadd.f32 %v2949_v56, %v2907_v49  ;;  %5824 = vmatprep.mubr.bf16.mxu0 %v12456_v7  ;;  %v15339_v5 = vadd.f32 %v2990_v12, %v2948_v55  ;;  %v15396_v7 = vshrl.u32 %v28_v58, 7  ;;  %v12394_v58 = vld [vmem:[%s17550_s1 + $0x610] ss:$8 sps:$4 sm:$0xff]  }
 0x246   :  { %5867 = vmatprep.mubr.bf16.mxu1 %v12459_v8  ;;  %v2951_v19 = vpop.f32.mrf.mxu0  ;;  %v12396_v8 = vld [vmem:[%s17550_s1 + $0x614] ss:$8 sps:$4 sm:$0xff]  }
 0x247   :  { %v2994_v16 = vpop.f32.mrf.mxu1  ;;  %v2952_v20 = vadd.f32 %v2951_v19, %v2909_v13  ;;  %5795 = vmatpush1.bf16.msra.mxu0 %v12364_v60  ;;  %v15341_v22 = vadd.f32 %v2992_v62, %v2950_v14  ;;  %v3048_v30 = vmul.f32 %v15339_v5, %v15339_v5  ;;  %v12391_v60 = vld [vmem:[%s17550_s1 + $0x720] ss:$8 sps:$4 sm:$0xff]   ;;  %v12402_v13 = vld [vmem:[%s17550_s1 + $0x604] ss:$8 sps:$4 sm:$0xff]  }
 0x248   :  { %5838 = vmatpush1.bf16.msra.mxu1 %v12367_v6  ;;  %v2953_v23 = vpop.f32.mrf.mxu0  ;;  %5796 = vmatprep.subr.bf16.mxu0 %v12372_v4  ;;  %v3028_v6 = vunpack.c.0.s8 %v3027_v53  ;;  %v12405_v14 = vld [vmem:[%s17550_s1 + $0x704] ss:$8 sps:$4 sm:$0xff]  }
 0x249   :  { %5839 = vmatprep.subr.bf16.mxu1 %v12375_v10  ;;  %v15349_v26 = vadd.f32 %v2994_v16, %v2952_v20  ;;  %v2954_v28 = vadd.f32 %v2953_v23, %v2911_v11  ;;  %v2996_v17 = vpop.f32.mrf.mxu1  ;;  %v3049_v37 = vmul.f32 %v15341_v22, %v15341_v22  ;;  %v12397_v10 = vld [vmem:[%s17550_s1 + $0x710] ss:$8 sps:$4 sm:$0xff]   ;;  %v12426_v53 = vld [vmem:[%s17550_s1 + $0x6c4] ss:$8 sps:$4 sm:$0xff]  }
 0x24a   :  { %v15417_v19 = vsub.s32 %v3028_v6, %v15396_v7  ;;  %v12447_v6 = vld [vmem:[%s17550_s1 + $0x794] ss:$8 sps:$4 sm:$0xff]  }
 0x24b   :  { %v3009_v31 = vadd.f32 %v15349_v26, %v15339_v5  ;;  %v3050_v21 = vmul.f32 %v15349_v26, %v15349_v26  ;;  %v15360_v27 = vadd.f32 %v2996_v17, %v2954_v28  ;;  %5797 = vmatpush1.bf16.msra.mxu0 %v12370_v15  ;;  %v3008_v28 = vld [vmem:[#allocation3] sm:$0x3] }
 0x24c   :  { %5840 = vmatpush1.bf16.msra.mxu1 %v12373_v18  ;;  %5798 = vmatprep.subr.bf16.mxu0 %v12378_v24  ;;  %v12400_v24 = vld [vmem:[%s17550_s1 + $0x600] ss:$8 sps:$4 sm:$0xff]  }
 0x24d   :  { %5841 = vmatprep.subr.bf16.mxu1 %v12381_v25  ;;  %v3010_v39 = vrot.slane %v3009_v31, 4  ;;  %v3052_v40 = vadd.f32 %v3050_v21, %v3048_v30  ;;  %v3016_v44 = vadd.f32 %v15360_v27, %v15341_v22  ;;  %v3051_v45 = vmul.f32 %v15360_v27, %v15360_v27  ;;  %v12403_v25 = vld [vmem:[%s17550_s1 + $0x700] ss:$8 sps:$4 sm:$0xff]   ;;  %v12411_v30 = vld [vmem:[%s17550_s1 + $0x7f4] ss:$8 sps:$4 sm:$0xff]  }
 0x24e   :  { %v12406_v21 = vld [vmem:[%s17550_s1 + $0x6f0] ss:$8 sps:$4 sm:$0xff]  }
 0x24f   :  { %v3011_v46 = vadd.f32 %v3010_v39, %v3009_v31  ;;  %v3053_v35 = vrot.slane %v3052_v40, 4  ;;  %v3017_v43 = vrot.slane %v3016_v44, 4  ;;  %v3059_v47 = vadd.f32 %v3051_v45, %v3049_v37  ;;  %5799 = vmatpush1.bf16.msra.mxu0 %v12376_v29  ;;  %v12408_v29 = vld [vmem:[%s17550_s1 + $0x6f4] ss:$8 sps:$4 sm:$0xff]   ;;  %v12414_v39 = vld [vmem:[%s17550_s1 + $0x6e4] ss:$8 sps:$4 sm:$0xff]  }
 0x250   :  { %5842 = vmatpush1.bf16.msra.mxu1 %v12379_v32  ;;  %5800 = vmatprep.subr.bf16.mxu0 %v12384_v36  ;;  %v3047_v36 = vld [vmem:[#allocation4] sm:$0x3] }
 0x251   :  { %5843 = vmatprep.subr.bf16.mxu1 %v12387_v38  ;;  %v3012_v63 = vrot.slane %v3011_v46, 2  ;;  %v3054_v1 = vadd.f32 %v3053_v35, %v3052_v40  ;;  %v3018_v2 = vadd.f32 %v3017_v43, %v3016_v44  ;;  %v3060_v3 = vrot.slane %v3059_v47, 4  ;;  %v12409_v38 = vld [vmem:[%s17550_s1 + $0x7f0] ss:$8 sps:$4 sm:$0xff]   ;;  %v12417_v40 = vld [vmem:[%s17550_s1 + $0x7e4] ss:$8 sps:$4 sm:$0xff]  }
 0x252   :  { %v12412_v35 = vld [vmem:[%s17550_s1 + $0x6e0] ss:$8 sps:$4 sm:$0xff]  }
 0x253   :  { %v3013_v59 = vadd.f32 %v3012_v63, %v3011_v46  ;;  %v3055_v33 = vrot.slane %v3054_v1, 2  ;;  %v3019_v34 = vrot.slane %v3018_v2, 2  ;;  %v3061_v41 = vadd.f32 %v3060_v3, %v3059_v47  ;;  %5801 = vmatpush1.bf16.msra.mxu0 %v12382_v48  ;;  %v12415_v43 = vld [vmem:[%s17550_s1 + $0x7e0] ss:$8 sps:$4 sm:$0xff]   ;;  %v12420_v47 = vld [vmem:[%s17550_s1 + $0x6d4] ss:$8 sps:$4 sm:$0xff]  }
 0x254   :  { %5844 = vmatpush1.bf16.msra.mxu1 %v12385_v51  ;;  %5802 = vmatprep.subr.bf16.mxu0 %v12390_v54  ;;  %v12423_v48 = vld [vmem:[%s17550_s1 + $0x7d4] ss:$8 sps:$4 sm:$0xff]   ;;  %v12418_v51 = vld [vmem:[%s17550_s1 + $0x6d0] ss:$8 sps:$4 sm:$0xff]   ;;  %v12429_v54 = vld [vmem:[%s17550_s1 + $0x7c4] ss:$8 sps:$4 sm:$0xff]  }
 0x255   :  { %5845 = vmatprep.subr.bf16.mxu1 %v12393_v57  ;;  %v3014_v12 = vrot.slane %v3013_v59, 1  ;;  %v3056_v49 = vadd.f32 %v3055_v33, %v3054_v1  ;;  %v3020_v50 = vadd.f32 %v3019_v34, %v3018_v2  ;;  %v3062_v55 = vrot.slane %v3061_v41, 2  ;;  %v12424_v57 = vld [vmem:[%s17550_s1 + $0x6c0] ss:$8 sps:$4 sm:$0xff]   ;;  %v12432_v1 = vld [vmem:[%s17550_s1 + $0x6b4] ss:$8 sps:$4 sm:$0xff]  }
 0x256   :  { %v12427_v63 = vld [vmem:[%s17550_s1 + $0x7c0] ss:$8 sps:$4 sm:$0xff]   ;;  %v12435_v2 = vld [vmem:[%s17550_s1 + $0x7b4] ss:$8 sps:$4 sm:$0xff]   ;;  %v12430_v3 = vld [vmem:[%s17550_s1 + $0x6b0] ss:$8 sps:$4 sm:$0xff]  }
 0x257   :  { %v3057_v56 = vrot.slane %v3056_v49, 1  ;;  %v3021_v62 = vrot.slane %v3020_v50, 1  ;;  %v3063_v4 = vadd.f32 %v3062_v55, %v3061_v41  ;;  %5803 = vmatpush1.bf16.msra.mxu0 %v12388_v42  ;;  %v3015_v15 = vadd.f32 %v3014_v12, %v3013_v59  ;;  %v12433_v59 = vld [vmem:[%s17550_s1 + $0x7b0] ss:$8 sps:$4 sm:$0xff]   ;;  %v12438_v33 = vld [vmem:[%s17550_s1 + $0x6a4] ss:$8 sps:$4 sm:$0xff]  }
 0x258   :  { %5846 = vmatpush1.bf16.msra.mxu1 %v12391_v60  ;;  %5804 = vmatprep.subr.bf16.mxu0 %v12396_v8  ;;  %v12441_v34 = vld [vmem:[%s17550_s1 + $0x7a4] ss:$8 sps:$4 sm:$0xff]   ;;  %v12436_v41 = vld [vmem:[%s17550_s1 + $0x6a0] ss:$8 sps:$4 sm:$0xff]   ;;  %v12444_v60 = vld [vmem:[%s17550_s1 + $0x694] ss:$8 sps:$4 sm:$0xff]  }
 0x259   :  { %5847 = vmatprep.subr.bf16.mxu1 %v12399_v9  ;;  %v3022_v18 = vadd.f32 %v3021_v62, %v3020_v50  ;;  %v3064_v16 = vrot.slane %v3063_v4, 1  ;;  %v3058_v11 = vadd.f32 %v3057_v56, %v3056_v49  ;;  %v12439_v42 = vld [vmem:[%s17550_s1 + $0x7a0] ss:$8 sps:$4 sm:$0xff]   ;;  %v12442_v8 = vld [vmem:[%s17550_s1 + $0x690] ss:$8 sps:$4 sm:$0xff]  }
 0x25a   :  { %v12445_v9 = vld [vmem:[%s17550_s1 + $0x790] ss:$8 sps:$4 sm:$0xff]   ;;  %v12450_v12 = vld [vmem:[%s17550_s1 + $0x684] ss:$8 sps:$4 sm:$0xff]   ;;  %v12448_v50 = vld [vmem:[%s17550_s1 + $0x680] ss:$8 sps:$4 sm:$0xff]  }
 0x25b   :  { %v3025_v20 = vcombine.low %v3015_v15, %v3022_v18  ;;  %v3065_v23 = vadd.f32 %v3064_v16, %v3063_v4  ;;  %5805 = vmatpush1.bf16.msra.mxu0 %v12394_v58  ;;  %v12453_v49 = vld [vmem:[%s17550_s1 + $0x784] ss:$8 sps:$4 sm:$0xff]   ;;  %v12451_v55 = vld [vmem:[%s17550_s1 + $0x780] ss:$8 sps:$4 sm:$0xff]   ;;  %v12462_v4 = vld [vmem:[%s17550_s1 + $0x874] ss:$8 sps:$4 sm:$0xff]  }
 0x25c   :  { %5848 = vmatpush1.bf16.msra.mxu1 %v12397_v10  ;;  %5806 = vmatprep.subr.bf16.mxu0 %v12402_v13  ;;  %v12454_v56 = vld [vmem:[%s17551_s0 + $0x48] ss:$144 sps:$4 sm:$0xff]   ;;  %v12457_v62 = vld [vmem:[%s17551_s0 + $0x50] ss:$144 sps:$4 sm:$0xff]   ;;  %v12465_v58 = vld [vmem:[%s17550_s1 + $0x974] ss:$8 sps:$4 sm:$0xff]  }
 0x25d   :  { %5849 = vmatprep.subr.bf16.mxu1 %v12405_v14  ;;  %v3032_v17 = vrot.slane %v3025_v20, %v15417_v19  ;;  %v3068_v31 = vcombine.low %v3058_v11, %v3065_v23  ;;  %v12460_v10 = vld [vmem:[%s17550_s1 + $0x870] ss:$8 sps:$4 sm:$0xff]   ;;  %v12468_v14 = vld [vmem:[%s17550_s1 + $0x864] ss:$8 sps:$4 sm:$0xff]   ;;  %v12466_v18 = vld [vmem:[%s17550_s1 + $0x860] ss:$8 sps:$4 sm:$0xff]  }
 0x25e   :  { %v12463_v13 = vld [vmem:[%s17550_s1 + $0x970] ss:$8 sps:$4 sm:$0xff]   ;;  %v12471_v15 = vld [vmem:[%s17550_s1 + $0x964] ss:$8 sps:$4 sm:$0xff]   ;;  %v12469_v16 = vld [vmem:[%s17550_s1 + $0x960] ss:$8 sps:$4 sm:$0xff]  }
 0x25f   :  { %v3039_v32 = vrot.slane %v3032_v17, %v15417_v19  ;;  %v3075_v37 = vrot.slane %v3068_v31, %v15417_v19  ;;  %5807 = vmatpush1.bf16.msra.mxu0 %v12400_v24  ;;  %v12558_v11 = vld [vmem:[%s17551_s0 + $0x5c] ss:$144 sps:$4 sm:$0xff]   ;;  %v12561_v20 = vld [vmem:[%s17551_s0 + $0x64] ss:$144 sps:$4 sm:$0xff]   ;;  %v12478_v17 = vld [vmem:[%s17550_s1 + $0x840] ss:$8 sps:$4 sm:$0xff]  }
 0x260   :  { %5850 = vmatpush1.bf16.msra.mxu1 %v12403_v25  ;;  %5808 = vmatprep.subr.bf16.mxu0 %v12408_v29  ;;  %v12474_v23 = vld [vmem:[%s17550_s1 + $0x854] ss:$8 sps:$4 sm:$0xff]   ;;  %v12472_v25 = vld [vmem:[%s17550_s1 + $0x850] ss:$8 sps:$4 sm:$0xff]   ;;  %v12480_v29 = vld [vmem:[%s17550_s1 + $0x844] ss:$8 sps:$4 sm:$0xff]  }
 0x261   :  { %5851 = vmatprep.subr.bf16.mxu1 %v12411_v30  ;;  %v3041_v44 = vadd.f32 %v3039_v32, %v3008_v28  ;;  %v3082_v45 = vrot.slane %v3075_v37, %v15417_v19  ;;  %v12477_v24 = vld [vmem:[%s17550_s1 + $0x954] ss:$8 sps:$4 sm:$0xff]   ;;  %v12475_v28 = vld [vmem:[%s17550_s1 + $0x950] ss:$8 sps:$4 sm:$0xff]   ;;  %v12483_v30 = vld [vmem:[%s17550_s1 + $0x944] ss:$8 sps:$4 sm:$0xff]  }
 0x262   :  { %v12481_v31 = vld [vmem:[%s17550_s1 + $0x940] ss:$8 sps:$4 sm:$0xff]   ;;  %v12489_v32 = vld [vmem:[%s17550_s1 + $0x934] ss:$8 sps:$4 sm:$0xff]   ;;  %v12487_v37 = vld [vmem:[%s17550_s1 + $0x930] ss:$8 sps:$4 sm:$0xff]  }
 0x263   :  { %3046 = vst.msk [vmem:[#allocation3] sm:$0x3] %vm14894_vm0, %v3041_v44  ;;  %v3084_v46 = vadd.f32 %v3082_v45, %v3047_v36  ;;  %5809 = vmatpush2.bf16.msra.mxu0 %v12406_v21  ;;  %v12486_v21 = vld [vmem:[%s17550_s1 + $0x834] ss:$8 sps:$4 sm:$0xff]   ;;  %v12484_v36 = vld [vmem:[%s17550_s1 + $0x830] ss:$8 sps:$4 sm:$0xff]  }
 0x264   :  { %5852 = vmatpush2.bf16.msra.mxu1 %v12409_v38  ;;  %5810 = vmatprep.subr.bf16.mxu0 %v12414_v39  ;;  %v12492_v38 = vld [vmem:[%s17550_s1 + $0x824] ss:$8 sps:$4 sm:$0xff]   ;;  %v12493_v44 = vld [vmem:[%s17550_s1 + $0x920] ss:$8 sps:$4 sm:$0xff]   ;;  %v12498_v45 = vld [vmem:[%s17550_s1 + $0x814] ss:$8 sps:$4 sm:$0xff]  }
 0x265   :  { %5853 = vmatprep.subr.bf16.mxu1 %v12417_v40  ;;  %3085 = vst.msk [vmem:[#allocation4] sm:$0x3] %vm14894_vm0, %v3084_v46  ;;  %v12495_v39 = vld [vmem:[%s17550_s1 + $0x924] ss:$8 sps:$4 sm:$0xff]   ;;  %v12490_v40 = vld [vmem:[%s17550_s1 + $0x820] ss:$8 sps:$4 sm:$0xff]  }
 0x266   :  { %v12501_v46 = vld [vmem:[%s17550_s1 + $0x914] ss:$8 sps:$4 sm:$0xff]  }
 0x267   :  { %5811 = vmatpush2.bf16.msra.mxu0 %v12412_v35  ;;  %v12496_v35 = vld [vmem:[%s17550_s1 + $0x810] ss:$8 sps:$4 sm:$0xff]  }
 0x268   :  { %5854 = vmatpush2.bf16.msra.mxu1 %v12415_v43  ;;  %5812 = vmatprep.subr.bf16.mxu0 %v12420_v47  ;;  %v12499_v43 = vld [vmem:[%s17550_s1 + $0x910] ss:$8 sps:$4 sm:$0xff]   ;;  %v12504_v47 = vld [vmem:[%s17550_s1 + $0x804] ss:$8 sps:$4 sm:$0xff]  }
 0x269   :  { %5855 = vmatprep.subr.bf16.mxu1 %v12423_v48  ;;  %v12507_v48 = vld [vmem:[%s17550_s1 + $0x904] ss:$8 sps:$4 sm:$0xff]  }
 0x26b   :  { %5813 = vmatpush2.bf16.msra.mxu0 %v12418_v51  ;;  %v12502_v51 = vld [vmem:[%s17550_s1 + $0x800] ss:$8 sps:$4 sm:$0xff]  }
 0x26c   :  { %5856 = vmatpush2.bf16.msra.mxu1 %v12421_v52  ;;  %5814 = vmatprep.subr.bf16.mxu0 %v12426_v53  ;;  %v12505_v52 = vld [vmem:[%s17550_s1 + $0x900] ss:$8 sps:$4 sm:$0xff]   ;;  %v12510_v53 = vld [vmem:[%s17550_s1 + $0x8f4] ss:$8 sps:$4 sm:$0xff]  }
 0x26d   :  { %5857 = vmatprep.subr.bf16.mxu1 %v12429_v54  ;;  %v12513_v54 = vld [vmem:[%s17550_s1 + $0x9f4] ss:$8 sps:$4 sm:$0xff]  }
 0x26f   :  { %5815 = vmatpush2.bf16.msra.mxu0 %v12424_v57  ;;  %v12508_v57 = vld [vmem:[%s17550_s1 + $0x8f0] ss:$8 sps:$4 sm:$0xff]  }
 0x270   :  { %5858 = vmatpush2.bf16.msra.mxu1 %v12427_v63  ;;  %5816 = vmatprep.subr.bf16.mxu0 %v12432_v1  ;;  %v12511_v63 = vld [vmem:[%s17550_s1 + $0x9f0] ss:$8 sps:$4 sm:$0xff]   ;;  %v12516_v1 = vld [vmem:[%s17550_s1 + $0x8e4] ss:$8 sps:$4 sm:$0xff]  }
 0x271   :  { %5859 = vmatprep.subr.bf16.mxu1 %v12435_v2  ;;  %v12519_v2 = vld [vmem:[%s17550_s1 + $0x9e4] ss:$8 sps:$4 sm:$0xff]  }
 0x273   :  { %5817 = vmatpush2.bf16.msra.mxu0 %v12430_v3  ;;  %v12514_v3 = vld [vmem:[%s17550_s1 + $0x8e0] ss:$8 sps:$4 sm:$0xff]  }
 0x274   :  { %5860 = vmatpush2.bf16.msra.mxu1 %v12433_v59  ;;  %5818 = vmatprep.subr.bf16.mxu0 %v12438_v33  ;;  %v12517_v59 = vld [vmem:[%s17550_s1 + $0x9e0] ss:$8 sps:$4 sm:$0xff]   ;;  %v12522_v33 = vld [vmem:[%s17550_s1 + $0x8d4] ss:$8 sps:$4 sm:$0xff]  }
 0x275   :  { %5861 = vmatprep.subr.bf16.mxu1 %v12441_v34  ;;  %v12525_v34 = vld [vmem:[%s17550_s1 + $0x9d4] ss:$8 sps:$4 sm:$0xff]  }
 0x277   :  { %5819 = vmatpush2.bf16.msra.mxu0 %v12436_v41  ;;  %v12520_v41 = vld [vmem:[%s17550_s1 + $0x8d0] ss:$8 sps:$4 sm:$0xff]  }
 0x278   :  { %5862 = vmatpush2.bf16.msra.mxu1 %v12439_v42  ;;  %5820 = vmatprep.subr.bf16.mxu0 %v12444_v60  ;;  %v12523_v42 = vld [vmem:[%s17550_s1 + $0x9d0] ss:$8 sps:$4 sm:$0xff]   ;;  %v12528_v60 = vld [vmem:[%s17550_s1 + $0x8c4] ss:$8 sps:$4 sm:$0xff]  }
 0x279   :  { %5863 = vmatprep.subr.bf16.mxu1 %v12447_v6  ;;  %v12531_v6 = vld [vmem:[%s17550_s1 + $0x9c4] ss:$8 sps:$4 sm:$0xff]  }
 0x27b   :  { %5821 = vmatpush2.bf16.msra.mxu0 %v12442_v8  ;;  %v12526_v8 = vld [vmem:[%s17550_s1 + $0x8c0] ss:$8 sps:$4 sm:$0xff]  }
 0x27c   :  { %5864 = vmatpush2.bf16.msra.mxu1 %v12445_v9  ;;  %5822 = vmatprep.subr.bf16.mxu0 %v12450_v12  ;;  %v12529_v9 = vld [vmem:[%s17550_s1 + $0x9c0] ss:$8 sps:$4 sm:$0xff]   ;;  %v12534_v12 = vld [vmem:[%s17550_s1 + $0x8b4] ss:$8 sps:$4 sm:$0xff]  }
 0x27d   :  { %5865 = vmatprep.subr.bf16.mxu1 %v12453_v49  ;;  %v12537_v49 = vld [vmem:[%s17550_s1 + $0x9b4] ss:$8 sps:$4 sm:$0xff]  }
 0x27f   :  { %5823 = vmatpush2.bf16.msra.mxu0 %v12448_v50  ;;  %v12532_v50 = vld [vmem:[%s17550_s1 + $0x8b0] ss:$8 sps:$4 sm:$0xff]  }
 0x280   :  { %5866 = vmatpush2.bf16.msra.mxu1 %v12451_v55  ;;  %5878 = vmatprep.subr.bf16.mxu0 %v12462_v4  ;;  %v12535_v55 = vld [vmem:[%s17550_s1 + $0x9b0] ss:$8 sps:$4 sm:$0xff]   ;;  %v12538_v4 = vld [vmem:[%s17550_s1 + $0x8a0] ss:$8 sps:$4 sm:$0xff]  }
 0x281   :  { %5921 = vmatprep.subr.bf16.mxu1 %v12465_v58  ;;  %v12541_v58 = vld [vmem:[%s17550_s1 + $0x9a0] ss:$8 sps:$4 sm:$0xff]  }
 0x282   :  { %5825 = vmatmul.mubr.bf16.vlgmr.msra.gmra.mxu0 %v12454_v56  ;;  %v12540_v56 = vld [vmem:[%s17550_s1 + $0x8a4] ss:$8 sps:$4 sm:$0xff]  }
 0x283   :  { %5868 = vmatmul.mubr.bf16.vlgmr.msra.gmra.mxu1 %v12457_v62  ;;  %5879 = vmatpush1.bf16.msra.mxu0 %v12460_v10  ;;  %v12543_v62 = vld [vmem:[%s17550_s1 + $0x9a4] ss:$8 sps:$4 sm:$0xff]   ;;  %v12546_v10 = vld [vmem:[%s17550_s1 + $0x894] ss:$8 sps:$4 sm:$0xff]  }
 0x284   :  { %5922 = vmatpush1.bf16.msra.mxu1 %v12463_v13  ;;  %5880 = vmatprep.subr.bf16.mxu0 %v12468_v14  ;;  %v12549_v13 = vld [vmem:[%s17550_s1 + $0x994] ss:$8 sps:$4 sm:$0xff]   ;;  %v12544_v14 = vld [vmem:[%s17550_s1 + $0x890] ss:$8 sps:$4 sm:$0xff]  }
 0x285   :  { %5923 = vmatprep.subr.bf16.mxu1 %v12471_v15  ;;  %5910 = vmatprep.mubr.bf16.mxu0 %v12558_v11  ;;  %v12547_v15 = vld [vmem:[%s17550_s1 + $0x990] ss:$8 sps:$4 sm:$0xff]   ;;  %v12550_v11 = vld [vmem:[%s17550_s1 + $0x880] ss:$8 sps:$4 sm:$0xff]  }
 0x286   :  { %5953 = vmatprep.mubr.bf16.mxu1 %v12561_v20  ;;  %v12553_v20 = vld [vmem:[%s17550_s1 + $0x980] ss:$8 sps:$4 sm:$0xff]  }
 0x287   :  { %5881 = vmatpush1.bf16.msra.mxu0 %v12466_v18  ;;  %v12552_v18 = vld [vmem:[%s17550_s1 + $0x884] ss:$8 sps:$4 sm:$0xff]  }
 0x288   :  { %5924 = vmatpush1.bf16.msra.mxu1 %v12469_v16  ;;  %5882 = vmatprep.subr.bf16.mxu0 %v12474_v23  ;;  %v12555_v16 = vld [vmem:[%s17550_s1 + $0x984] ss:$8 sps:$4 sm:$0xff]   ;;  %v12556_v23 = vld [vmem:[%s17551_s0 + $0x58] ss:$144 sps:$4 sm:$0xff]  }
 0x289   :  { %5925 = vmatprep.subr.bf16.mxu1 %v12477_v24  ;;  %v12559_v24 = vld [vmem:[%s17551_s0 + $0x60] ss:$144 sps:$4 sm:$0xff]  }
 0x28b   :  { %5883 = vmatpush1.bf16.msra.mxu0 %v12472_v25  ;;  %v12564_v25 = vld [vmem:[%s17550_s1 + $0xa74] ss:$8 sps:$4 sm:$0xff]  }
 0x28c   :  { %5926 = vmatpush1.bf16.msra.mxu1 %v12475_v28  ;;  %5884 = vmatprep.subr.bf16.mxu0 %v12480_v29  ;;  %v12567_v28 = vld [vmem:[%s17550_s1 + $0xb74] ss:$8 sps:$4 sm:$0xff]   ;;  %v12562_v29 = vld [vmem:[%s17550_s1 + $0xa70] ss:$8 sps:$4 sm:$0xff]  }
 0x28d   :  { %5927 = vmatprep.subr.bf16.mxu1 %v12483_v30  ;;  %v12565_v30 = vld [vmem:[%s17550_s1 + $0xb70] ss:$8 sps:$4 sm:$0xff]  }
 0x28f   :  { %5885 = vmatpush1.bf16.msra.mxu0 %v12478_v17  ;;  %v12570_v17 = vld [vmem:[%s17550_s1 + $0xa64] ss:$8 sps:$4 sm:$0xff]  }
 0x290   :  { %5928 = vmatpush1.bf16.msra.mxu1 %v12481_v31  ;;  %5886 = vmatprep.subr.bf16.mxu0 %v12486_v21  ;;  %v12573_v31 = vld [vmem:[%s17550_s1 + $0xb64] ss:$8 sps:$4 sm:$0xff]  }
 0x291   :  { %5929 = vmatprep.subr.bf16.mxu1 %v12489_v32  ;;  %v12660_v21 = vld [vmem:[%s17551_s0 + $0x6c] ss:$144 sps:$4 sm:$0xff]   ;;  %v12663_v32 = vld [vmem:[%s17551_s0 + $0x74] ss:$144 sps:$4 sm:$0xff]  }
 0x293   :  { %5887 = vmatpush1.bf16.msra.mxu0 %v12484_v36  ;;  %v12568_v36 = vld [vmem:[%s17550_s1 + $0xa60] ss:$8 sps:$4 sm:$0xff]  }
 0x294   :  { %5930 = vmatpush1.bf16.msra.mxu1 %v12487_v37  ;;  %5888 = vmatprep.subr.bf16.mxu0 %v12492_v38  ;;  %v12571_v37 = vld [vmem:[%s17550_s1 + $0xb60] ss:$8 sps:$4 sm:$0xff]   ;;  %v12576_v38 = vld [vmem:[%s17550_s1 + $0xa54] ss:$8 sps:$4 sm:$0xff]  }
 0x295   :  { %5931 = vmatprep.subr.bf16.mxu1 %v12495_v39  ;;  %v12579_v39 = vld [vmem:[%s17550_s1 + $0xb54] ss:$8 sps:$4 sm:$0xff]  }
 0x297   :  { %5889 = vmatpush1.bf16.msra.mxu0 %v12490_v40  ;;  %v12574_v40 = vld [vmem:[%s17550_s1 + $0xa50] ss:$8 sps:$4 sm:$0xff]  }
 0x298   :  { %5932 = vmatpush1.bf16.msra.mxu1 %v12493_v44  ;;  %5890 = vmatprep.subr.bf16.mxu0 %v12498_v45  ;;  %v12577_v44 = vld [vmem:[%s17550_s1 + $0xb50] ss:$8 sps:$4 sm:$0xff]   ;;  %v12582_v45 = vld [vmem:[%s17550_s1 + $0xa44] ss:$8 sps:$4 sm:$0xff]  }
 0x299   :  { %5933 = vmatprep.subr.bf16.mxu1 %v12501_v46  ;;  %v12585_v46 = vld [vmem:[%s17550_s1 + $0xb44] ss:$8 sps:$4 sm:$0xff]  }
 0x29b   :  { %5891 = vmatpush1.bf16.msra.mxu0 %v12496_v35  ;;  %v12580_v35 = vld [vmem:[%s17550_s1 + $0xa40] ss:$8 sps:$4 sm:$0xff]  }
 0x29c   :  { %5934 = vmatpush1.bf16.msra.mxu1 %v12499_v43  ;;  %5892 = vmatprep.subr.bf16.mxu0 %v12504_v47  ;;  %v12583_v43 = vld [vmem:[%s17550_s1 + $0xb40] ss:$8 sps:$4 sm:$0xff]   ;;  %v12588_v47 = vld [vmem:[%s17550_s1 + $0xa34] ss:$8 sps:$4 sm:$0xff]  }
 0x29d   :  { %5935 = vmatprep.subr.bf16.mxu1 %v12507_v48  ;;  %v12591_v48 = vld [vmem:[%s17550_s1 + $0xb34] ss:$8 sps:$4 sm:$0xff]  }
 0x29f   :  { %5893 = vmatpush1.bf16.msra.mxu0 %v12502_v51  ;;  %v12586_v51 = vld [vmem:[%s17550_s1 + $0xa30] ss:$8 sps:$4 sm:$0xff]  }
 0x2a0   :  { %5936 = vmatpush1.bf16.msra.mxu1 %v12505_v52  ;;  %5894 = vmatprep.subr.bf16.mxu0 %v12510_v53  ;;  %v12589_v52 = vld [vmem:[%s17550_s1 + $0xb30] ss:$8 sps:$4 sm:$0xff]   ;;  %v12594_v53 = vld [vmem:[%s17550_s1 + $0xa24] ss:$8 sps:$4 sm:$0xff]  }
 0x2a1   :  { %5937 = vmatprep.subr.bf16.mxu1 %v12513_v54  ;;  %v12597_v54 = vld [vmem:[%s17550_s1 + $0xb24] ss:$8 sps:$4 sm:$0xff]  }
 0x2a3   :  { %5895 = vmatpush2.bf16.msra.mxu0 %v12508_v57  ;;  %v12592_v57 = vld [vmem:[%s17550_s1 + $0xa20] ss:$8 sps:$4 sm:$0xff]  }
 0x2a4   :  { %5938 = vmatpush2.bf16.msra.mxu1 %v12511_v63  ;;  %5896 = vmatprep.subr.bf16.mxu0 %v12516_v1  ;;  %v12595_v63 = vld [vmem:[%s17550_s1 + $0xb20] ss:$8 sps:$4 sm:$0xff]   ;;  %v12600_v1 = vld [vmem:[%s17550_s1 + $0xa14] ss:$8 sps:$4 sm:$0xff]  }
 0x2a5   :  { %5939 = vmatprep.subr.bf16.mxu1 %v12519_v2  ;;  %v12603_v2 = vld [vmem:[%s17550_s1 + $0xb14] ss:$8 sps:$4 sm:$0xff]  }
 0x2a7   :  { %5897 = vmatpush2.bf16.msra.mxu0 %v12514_v3  ;;  %v12598_v3 = vld [vmem:[%s17550_s1 + $0xa10] ss:$8 sps:$4 sm:$0xff]  }
 0x2a8   :  { %5940 = vmatpush2.bf16.msra.mxu1 %v12517_v59  ;;  %5898 = vmatprep.subr.bf16.mxu0 %v12522_v33  ;;  %v12601_v59 = vld [vmem:[%s17550_s1 + $0xb10] ss:$8 sps:$4 sm:$0xff]   ;;  %v12606_v33 = vld [vmem:[%s17550_s1 + $0xa04] ss:$8 sps:$4 sm:$0xff]  }
 0x2a9   :  { %5941 = vmatprep.subr.bf16.mxu1 %v12525_v34  ;;  %v12609_v34 = vld [vmem:[%s17550_s1 + $0xb04] ss:$8 sps:$4 sm:$0xff]  }
 0x2ab   :  { %5899 = vmatpush2.bf16.msra.mxu0 %v12520_v41  ;;  %v12604_v41 = vld [vmem:[%s17550_s1 + $0xa00] ss:$8 sps:$4 sm:$0xff]  }
 0x2ac   :  { %5942 = vmatpush2.bf16.msra.mxu1 %v12523_v42  ;;  %5900 = vmatprep.subr.bf16.mxu0 %v12528_v60  ;;  %v12607_v42 = vld [vmem:[%s17550_s1 + $0xb00] ss:$8 sps:$4 sm:$0xff]   ;;  %v12612_v60 = vld [vmem:[%s17550_s1 + $0xaf4] ss:$8 sps:$4 sm:$0xff]  }
 0x2ad   :  { %5943 = vmatprep.subr.bf16.mxu1 %v12531_v6  ;;  %v12615_v6 = vld [vmem:[%s17550_s1 + $0xbf4] ss:$8 sps:$4 sm:$0xff]  }
 0x2af   :  { %5901 = vmatpush2.bf16.msra.mxu0 %v12526_v8  ;;  %v12610_v8 = vld [vmem:[%s17550_s1 + $0xaf0] ss:$8 sps:$4 sm:$0xff]  }
 0x2b0   :  { %5944 = vmatpush2.bf16.msra.mxu1 %v12529_v9  ;;  %5902 = vmatprep.subr.bf16.mxu0 %v12534_v12  ;;  %v12613_v9 = vld [vmem:[%s17550_s1 + $0xbf0] ss:$8 sps:$4 sm:$0xff]   ;;  %v12618_v12 = vld [vmem:[%s17550_s1 + $0xae4] ss:$8 sps:$4 sm:$0xff]  }
 0x2b1   :  { %5945 = vmatprep.subr.bf16.mxu1 %v12537_v49  ;;  %v12621_v49 = vld [vmem:[%s17550_s1 + $0xbe4] ss:$8 sps:$4 sm:$0xff]  }
 0x2b3   :  { %5903 = vmatpush2.bf16.msra.mxu0 %v12532_v50  ;;  %v12616_v50 = vld [vmem:[%s17550_s1 + $0xae0] ss:$8 sps:$4 sm:$0xff]  }
 0x2b4   :  { %5946 = vmatpush2.bf16.msra.mxu1 %v12535_v55  ;;  %5904 = vmatprep.subr.bf16.mxu0 %v12540_v56  ;;  %v12619_v55 = vld [vmem:[%s17550_s1 + $0xbe0] ss:$8 sps:$4 sm:$0xff]   ;;  %v12624_v56 = vld [vmem:[%s17550_s1 + $0xad4] ss:$8 sps:$4 sm:$0xff]  }
 0x2b5   :  { %5947 = vmatprep.subr.bf16.mxu1 %v12543_v62  ;;  %v12627_v62 = vld [vmem:[%s17550_s1 + $0xbd4] ss:$8 sps:$4 sm:$0xff]  }
 0x2b7   :  { %5905 = vmatpush2.bf16.msra.mxu0 %v12538_v4  ;;  %v12622_v4 = vld [vmem:[%s17550_s1 + $0xad0] ss:$8 sps:$4 sm:$0xff]  }
 0x2b8   :  { %5948 = vmatpush2.bf16.msra.mxu1 %v12541_v58  ;;  %5906 = vmatprep.subr.bf16.mxu0 %v12546_v10  ;;  %v12625_v58 = vld [vmem:[%s17550_s1 + $0xbd0] ss:$8 sps:$4 sm:$0xff]   ;;  %v12630_v10 = vld [vmem:[%s17550_s1 + $0xac4] ss:$8 sps:$4 sm:$0xff]  }
 0x2b9   :  { %5949 = vmatprep.subr.bf16.mxu1 %v12549_v13  ;;  %v12633_v13 = vld [vmem:[%s17550_s1 + $0xbc4] ss:$8 sps:$4 sm:$0xff]  }
 0x2bb   :  { %5907 = vmatpush2.bf16.msra.mxu0 %v12544_v14  ;;  %v12628_v14 = vld [vmem:[%s17550_s1 + $0xac0] ss:$8 sps:$4 sm:$0xff]  }
 0x2bc   :  { %5950 = vmatpush2.bf16.msra.mxu1 %v12547_v15  ;;  %5908 = vmatprep.subr.bf16.mxu0 %v12552_v18  ;;  %v12631_v15 = vld [vmem:[%s17550_s1 + $0xbc0] ss:$8 sps:$4 sm:$0xff]   ;;  %v12636_v18 = vld [vmem:[%s17550_s1 + $0xab4] ss:$8 sps:$4 sm:$0xff]  }
 0x2bd   :  { %5951 = vmatprep.subr.bf16.mxu1 %v12555_v16  ;;  %v12639_v16 = vld [vmem:[%s17550_s1 + $0xbb4] ss:$8 sps:$4 sm:$0xff]  }
 0x2bf   :  { %5909 = vmatpush2.bf16.msra.mxu0 %v12550_v11  ;;  %v12634_v11 = vld [vmem:[%s17550_s1 + $0xab0] ss:$8 sps:$4 sm:$0xff]  }
 0x2c0   :  { %5952 = vmatpush2.bf16.msra.mxu1 %v12553_v20  ;;  %5964 = vmatprep.subr.bf16.mxu0 %v12564_v25  ;;  %v12637_v20 = vld [vmem:[%s17550_s1 + $0xbb0] ss:$8 sps:$4 sm:$0xff]   ;;  %v12640_v25 = vld [vmem:[%s17550_s1 + $0xaa0] ss:$8 sps:$4 sm:$0xff]  }
 0x2c1   :  { %6007 = vmatprep.subr.bf16.mxu1 %v12567_v28  ;;  %v12643_v28 = vld [vmem:[%s17550_s1 + $0xba0] ss:$8 sps:$4 sm:$0xff]  }
 0x2c2   :  { %5911 = vmatmul.mubr.bf16.vlgmr.msra.gmra.mxu0 %v12556_v23  ;;  %v12642_v23 = vld [vmem:[%s17550_s1 + $0xaa4] ss:$8 sps:$4 sm:$0xff]  }
 0x2c3   :  { %5954 = vmatmul.mubr.bf16.vlgmr.msra.gmra.mxu1 %v12559_v24  ;;  %5965 = vmatpush1.bf16.msra.mxu0 %v12562_v29  ;;  %v12645_v24 = vld [vmem:[%s17550_s1 + $0xba4] ss:$8 sps:$4 sm:$0xff]   ;;  %v12648_v29 = vld [vmem:[%s17550_s1 + $0xa94] ss:$8 sps:$4 sm:$0xff]  }
 0x2c4   :  { %6008 = vmatpush1.bf16.msra.mxu1 %v12565_v30  ;;  %5966 = vmatprep.subr.bf16.mxu0 %v12570_v17  ;;  %v12651_v30 = vld [vmem:[%s17550_s1 + $0xb94] ss:$8 sps:$4 sm:$0xff]   ;;  %v12646_v17 = vld [vmem:[%s17550_s1 + $0xa90] ss:$8 sps:$4 sm:$0xff]  }
 0x2c5   :  { %6009 = vmatprep.subr.bf16.mxu1 %v12573_v31  ;;  %5996 = vmatprep.mubr.bf16.mxu0 %v12660_v21  ;;  %v12649_v31 = vld [vmem:[%s17550_s1 + $0xb90] ss:$8 sps:$4 sm:$0xff]   ;;  %v12654_v21 = vld [vmem:[%s17550_s1 + $0xa84] ss:$8 sps:$4 sm:$0xff]  }
 0x2c6   :  { %6039 = vmatprep.mubr.bf16.mxu1 %v12663_v32  ;;  %v12657_v32 = vld [vmem:[%s17550_s1 + $0xb84] ss:$8 sps:$4 sm:$0xff]  }
 0x2c7   :  { %5967 = vmatpush1.bf16.msra.mxu0 %v12568_v36  ;;  %v12652_v36 = vld [vmem:[%s17550_s1 + $0xa80] ss:$8 sps:$4 sm:$0xff]  }
 0x2c8   :  { %6010 = vmatpush1.bf16.msra.mxu1 %v12571_v37  ;;  %5968 = vmatprep.subr.bf16.mxu0 %v12576_v38  ;;  %v12655_v37 = vld [vmem:[%s17550_s1 + $0xb80] ss:$8 sps:$4 sm:$0xff]   ;;  %v12666_v38 = vld [vmem:[%s17550_s1 + $0x74] ss:$8 sps:$4 sm:$0xff]  }
 0x2c9   :  { %6011 = vmatprep.subr.bf16.mxu1 %v12579_v39  ;;  %v12669_v39 = vld [vmem:[%s17550_s1 + $0x174] ss:$8 sps:$4 sm:$0xff]  }
 0x2cb   :  { %5969 = vmatpush1.bf16.msra.mxu0 %v12574_v40  ;;  %v12658_v40 = vld [vmem:[%s17551_s0 + $0x68] ss:$144 sps:$4 sm:$0xff]  }
 0x2cc   :  { %6012 = vmatpush1.bf16.msra.mxu1 %v12577_v44  ;;  %5970 = vmatprep.subr.bf16.mxu0 %v12582_v45  ;;  %v12661_v44 = vld [vmem:[%s17551_s0 + $0x70] ss:$144 sps:$4 sm:$0xff]  }
 0x2cd   :  { %6013 = vmatprep.subr.bf16.mxu1 %v12585_v46  ;;  %v12664_v45 = vld [vmem:[%s17550_s1 + $0x70] ss:$8 sps:$4 sm:$0xff]  }
 0x2ce   :  { %v12667_v46 = vld [vmem:[%s17550_s1 + $0x170] ss:$8 sps:$4 sm:$0xff]  }
 0x2cf   :  { %5971 = vmatpush1.bf16.msra.mxu0 %v12580_v35  ;;  %v12672_v35 = vld [vmem:[%s17550_s1 + $0x64] ss:$8 sps:$4 sm:$0xff]  }
 0x2d0   :  { %6014 = vmatpush1.bf16.msra.mxu1 %v12583_v43  ;;  %5972 = vmatprep.subr.bf16.mxu0 %v12588_v47  ;;  %v12675_v43 = vld [vmem:[%s17550_s1 + $0x164] ss:$8 sps:$4 sm:$0xff]  }
 0x2d1   :  { %6015 = vmatprep.subr.bf16.mxu1 %v12591_v48  ;;  %v12762_v47 = vld [vmem:[%s17551_s0 + $0x34] ss:$144 sps:$4 sm:$0xff]   ;;  %v12765_v48 = vld [vmem:[%s17551_s0 + $0x3c] ss:$144 sps:$4 sm:$0xff]  }
 0x2d3   :  { %5973 = vmatpush1.bf16.msra.mxu0 %v12586_v51  ;;  %v12670_v51 = vld [vmem:[%s17550_s1 + $0x60] ss:$8 sps:$4 sm:$0xff]  }
 0x2d4   :  { %6016 = vmatpush1.bf16.msra.mxu1 %v12589_v52  ;;  %5974 = vmatprep.subr.bf16.mxu0 %v12594_v53  ;;  %v12673_v52 = vld [vmem:[%s17550_s1 + $0x160] ss:$8 sps:$4 sm:$0xff]   ;;  %v12678_v53 = vld [vmem:[%s17550_s1 + $0x54] ss:$8 sps:$4 sm:$0xff]  }
 0x2d5   :  { %6017 = vmatprep.subr.bf16.mxu1 %v12597_v54  ;;  %v12681_v54 = vld [vmem:[%s17550_s1 + $0x154] ss:$8 sps:$4 sm:$0xff]  }
 0x2d7   :  { %5975 = vmatpush1.bf16.msra.mxu0 %v12592_v57  ;;  %v12676_v57 = vld [vmem:[%s17550_s1 + $0x50] ss:$8 sps:$4 sm:$0xff]  }
 0x2d8   :  { %6018 = vmatpush1.bf16.msra.mxu1 %v12595_v63  ;;  %5976 = vmatprep.subr.bf16.mxu0 %v12600_v1  ;;  %v12679_v63 = vld [vmem:[%s17550_s1 + $0x150] ss:$8 sps:$4 sm:$0xff]   ;;  %v12684_v1 = vld [vmem:[%s17550_s1 + $0x44] ss:$8 sps:$4 sm:$0xff]  }
 0x2d9   :  { %6019 = vmatprep.subr.bf16.mxu1 %v12603_v2  ;;  %v12687_v2 = vld [vmem:[%s17550_s1 + $0x144] ss:$8 sps:$4 sm:$0xff]  }
 0x2db   :  { %5977 = vmatpush1.bf16.msra.mxu0 %v12598_v3  ;;  %v12682_v3 = vld [vmem:[%s17550_s1 + $0x40] ss:$8 sps:$4 sm:$0xff]  }
 0x2dc   :  { %6020 = vmatpush1.bf16.msra.mxu1 %v12601_v59  ;;  %5978 = vmatprep.subr.bf16.mxu0 %v12606_v33  ;;  %v12685_v59 = vld [vmem:[%s17550_s1 + $0x140] ss:$8 sps:$4 sm:$0xff]   ;;  %v12690_v33 = vld [vmem:[%s17550_s1 + $0x34] ss:$8 sps:$4 sm:$0xff]  }
 0x2dd   :  { %6021 = vmatprep.subr.bf16.mxu1 %v12609_v34  ;;  %v12693_v34 = vld [vmem:[%s17550_s1 + $0x134] ss:$8 sps:$4 sm:$0xff]  }
 0x2df   :  { %5979 = vmatpush1.bf16.msra.mxu0 %v12604_v41  ;;  %v12688_v41 = vld [vmem:[%s17550_s1 + $0x30] ss:$8 sps:$4 sm:$0xff]  }
 0x2e0   :  { %6022 = vmatpush1.bf16.msra.mxu1 %v12607_v42  ;;  %5980 = vmatprep.subr.bf16.mxu0 %v12612_v60  ;;  %v12691_v42 = vld [vmem:[%s17550_s1 + $0x130] ss:$8 sps:$4 sm:$0xff]   ;;  %v12696_v60 = vld [vmem:[%s17550_s1 + $0x24] ss:$8 sps:$4 sm:$0xff]  }
 0x2e1   :  { %6023 = vmatprep.subr.bf16.mxu1 %v12615_v6  ;;  %v12699_v6 = vld [vmem:[%s17550_s1 + $0x124] ss:$8 sps:$4 sm:$0xff]  }
 0x2e3   :  { %5981 = vmatpush2.bf16.msra.mxu0 %v12610_v8  ;;  %v12694_v8 = vld [vmem:[%s17550_s1 + $0x20] ss:$8 sps:$4 sm:$0xff]  }
 0x2e4   :  { %6024 = vmatpush2.bf16.msra.mxu1 %v12613_v9  ;;  %5982 = vmatprep.subr.bf16.mxu0 %v12618_v12  ;;  %v12697_v9 = vld [vmem:[%s17550_s1 + $0x120] ss:$8 sps:$4 sm:$0xff]   ;;  %v12702_v12 = vld [vmem:[%s17550_s1 + $0x14] ss:$8 sps:$4 sm:$0xff]  }
 0x2e5   :  { %6025 = vmatprep.subr.bf16.mxu1 %v12621_v49  ;;  %v12705_v49 = vld [vmem:[%s17550_s1 + $0x114] ss:$8 sps:$4 sm:$0xff]  }
 0x2e7   :  { %5983 = vmatpush2.bf16.msra.mxu0 %v12616_v50  ;;  %v12700_v50 = vld [vmem:[%s17550_s1 + $0x10] ss:$8 sps:$4 sm:$0xff]  }
 0x2e8   :  { %6026 = vmatpush2.bf16.msra.mxu1 %v12619_v55  ;;  %5984 = vmatprep.subr.bf16.mxu0 %v12624_v56  ;;  %v12703_v55 = vld [vmem:[%s17550_s1 + $0x110] ss:$8 sps:$4 sm:$0xff]   ;;  %v12708_v56 = vld [vmem:[%s17550_s1 + $0x4] ss:$8 sps:$4 sm:$0xff]  }
 0x2e9   :  { %6027 = vmatprep.subr.bf16.mxu1 %v12627_v62  ;;  %v12711_v62 = vld [vmem:[%s17550_s1 + $0x104] ss:$8 sps:$4 sm:$0xff]  }
 0x2eb   :  { %5985 = vmatpush2.bf16.msra.mxu0 %v12622_v4  ;;  %v12706_v4 = vld [vmem:[%s17550_s1] ss:$8 sps:$4 sm:$0xff]  }
 0x2ec   :  { %6028 = vmatpush2.bf16.msra.mxu1 %v12625_v58  ;;  %5986 = vmatprep.subr.bf16.mxu0 %v12630_v10  ;;  %v12709_v58 = vld [vmem:[%s17550_s1 + $0x100] ss:$8 sps:$4 sm:$0xff]   ;;  %v12714_v10 = vld [vmem:[%s17550_s1 + $0xf4] ss:$8 sps:$4 sm:$0xff]  }
 0x2ed   :  { %6029 = vmatprep.subr.bf16.mxu1 %v12633_v13  ;;  %v12717_v13 = vld [vmem:[%s17550_s1 + $0x1f4] ss:$8 sps:$4 sm:$0xff]  }
 0x2ef   :  { %5987 = vmatpush2.bf16.msra.mxu0 %v12628_v14  ;;  %v12712_v14 = vld [vmem:[%s17550_s1 + $0xf0] ss:$8 sps:$4 sm:$0xff]  }
 0x2f0   :  { %6030 = vmatpush2.bf16.msra.mxu1 %v12631_v15  ;;  %5988 = vmatprep.subr.bf16.mxu0 %v12636_v18  ;;  %v12715_v15 = vld [vmem:[%s17550_s1 + $0x1f0] ss:$8 sps:$4 sm:$0xff]   ;;  %v12720_v18 = vld [vmem:[%s17550_s1 + $0xe4] ss:$8 sps:$4 sm:$0xff]  }
 0x2f1   :  { %6031 = vmatprep.subr.bf16.mxu1 %v12639_v16  ;;  %v12723_v16 = vld [vmem:[%s17550_s1 + $0x1e4] ss:$8 sps:$4 sm:$0xff]  }
 0x2f3   :  { %5989 = vmatpush2.bf16.msra.mxu0 %v12634_v11  ;;  %v12718_v11 = vld [vmem:[%s17550_s1 + $0xe0] ss:$8 sps:$4 sm:$0xff]  }
 0x2f4   :  { %6032 = vmatpush2.bf16.msra.mxu1 %v12637_v20  ;;  %5990 = vmatprep.subr.bf16.mxu0 %v12642_v23  ;;  %v12721_v20 = vld [vmem:[%s17550_s1 + $0x1e0] ss:$8 sps:$4 sm:$0xff]   ;;  %v12726_v23 = vld [vmem:[%s17550_s1 + $0xd4] ss:$8 sps:$4 sm:$0xff]  }
 0x2f5   :  { %6033 = vmatprep.subr.bf16.mxu1 %v12645_v24  ;;  %v12729_v24 = vld [vmem:[%s17550_s1 + $0x1d4] ss:$8 sps:$4 sm:$0xff]  }
 0x2f7   :  { %5991 = vmatpush2.bf16.msra.mxu0 %v12640_v25  ;;  %v12724_v25 = vld [vmem:[%s17550_s1 + $0xd0] ss:$8 sps:$4 sm:$0xff]  }
 0x2f8   :  { %6034 = vmatpush2.bf16.msra.mxu1 %v12643_v28  ;;  %5992 = vmatprep.subr.bf16.mxu0 %v12648_v29  ;;  %v12727_v28 = vld [vmem:[%s17550_s1 + $0x1d0] ss:$8 sps:$4 sm:$0xff]   ;;  %v12732_v29 = vld [vmem:[%s17550_s1 + $0xc4] ss:$8 sps:$4 sm:$0xff]  }
 0x2f9   :  { %6035 = vmatprep.subr.bf16.mxu1 %v12651_v30  ;;  %v12735_v30 = vld [vmem:[%s17550_s1 + $0x1c4] ss:$8 sps:$4 sm:$0xff]  }
 0x2fb   :  { %5993 = vmatpush2.bf16.msra.mxu0 %v12646_v17  ;;  %v12730_v17 = vld [vmem:[%s17550_s1 + $0xc0] ss:$8 sps:$4 sm:$0xff]  }
 0x2fc   :  { %6036 = vmatpush2.bf16.msra.mxu1 %v12649_v31  ;;  %5994 = vmatprep.subr.bf16.mxu0 %v12654_v21  ;;  %v12733_v31 = vld [vmem:[%s17550_s1 + $0x1c0] ss:$8 sps:$4 sm:$0xff]   ;;  %v12738_v21 = vld [vmem:[%s17550_s1 + $0xb4] ss:$8 sps:$4 sm:$0xff]  }
 0x2fd   :  { %6037 = vmatprep.subr.bf16.mxu1 %v12657_v32  ;;  %v12741_v32 = vld [vmem:[%s17550_s1 + $0x1b4] ss:$8 sps:$4 sm:$0xff]  }
 0x2ff   :  { %5995 = vmatpush2.bf16.msra.mxu0 %v12652_v36  ;;  %v12736_v36 = vld [vmem:[%s17550_s1 + $0xb0] ss:$8 sps:$4 sm:$0xff]  }
 0x300   :  { %6038 = vmatpush2.bf16.msra.mxu1 %v12655_v37  ;;  %8576 = vmatprep.subr.bf16.mxu0 %v12666_v38  ;;  %v12739_v37 = vld [vmem:[%s17550_s1 + $0x1b0] ss:$8 sps:$4 sm:$0xff]   ;;  %v12744_v38 = vld [vmem:[%s17550_s1 + $0xa4] ss:$8 sps:$4 sm:$0xff]  }
 0x301   :  { %8619 = vmatprep.subr.bf16.mxu1 %v12669_v39  ;;  %v12747_v39 = vld [vmem:[%s17550_s1 + $0x1a4] ss:$8 sps:$4 sm:$0xff]  }
 0x302   :  { %5997 = vmatmul.mubr.bf16.vlgmr.msra.gmra.mxu0 %v12658_v40  ;;  %v12742_v40 = vld [vmem:[%s17550_s1 + $0xa0] ss:$8 sps:$4 sm:$0xff]  }
 0x303   :  { %6040 = vmatmul.mubr.bf16.vlgmr.msra.gmra.mxu1 %v12661_v44  ;;  %8577 = vmatpush1.bf16.msra.mxu0 %v12664_v45  ;;  %v12745_v44 = vld [vmem:[%s17550_s1 + $0x1a0] ss:$8 sps:$4 sm:$0xff]   ;;  %v12750_v45 = vld [vmem:[%s17550_s1 + $0x94] ss:$8 sps:$4 sm:$0xff]  }
 0x304   :  { %8620 = vmatpush1.bf16.msra.mxu1 %v12667_v46  ;;  %8578 = vmatprep.subr.bf16.mxu0 %v12672_v35  ;;  %v12753_v46 = vld [vmem:[%s17550_s1 + $0x194] ss:$8 sps:$4 sm:$0xff]   ;;  %v12748_v35 = vld [vmem:[%s17550_s1 + $0x90] ss:$8 sps:$4 sm:$0xff]  }
 0x305   :  { %8621 = vmatprep.subr.bf16.mxu1 %v12675_v43  ;;  %8608 = vmatprep.mubr.bf16.mxu0 %v12762_v47  ;;  %v12751_v43 = vld [vmem:[%s17550_s1 + $0x190] ss:$8 sps:$4 sm:$0xff]   ;;  %v12756_v47 = vld [vmem:[%s17550_s1 + $0x84] ss:$8 sps:$4 sm:$0xff]  }
 0x306   :  { %8651 = vmatprep.mubr.bf16.mxu1 %v12765_v48  ;;  %v12759_v48 = vld [vmem:[%s17550_s1 + $0x184] ss:$8 sps:$4 sm:$0xff]  }
 0x307   :  { %8579 = vmatpush1.bf16.msra.mxu0 %v12670_v51  ;;  %v12754_v51 = vld [vmem:[%s17550_s1 + $0x80] ss:$8 sps:$4 sm:$0xff]  }
 0x308   :  { %8622 = vmatpush1.bf16.msra.mxu1 %v12673_v52  ;;  %8580 = vmatprep.subr.bf16.mxu0 %v12678_v53  ;;  %v12757_v52 = vld [vmem:[%s17550_s1 + $0x180] ss:$8 sps:$4 sm:$0xff]   ;;  %v12768_v53 = vld [vmem:[%s17550_s1 + $0x274] ss:$8 sps:$4 sm:$0xff]  }
 0x309   :  { %8623 = vmatprep.subr.bf16.mxu1 %v12681_v54  ;;  %v12771_v54 = vld [vmem:[%s17550_s1 + $0x374] ss:$8 sps:$4 sm:$0xff]  }
 0x30b   :  { %8581 = vmatpush1.bf16.msra.mxu0 %v12676_v57  ;;  %v12760_v57 = vld [vmem:[%s17551_s0 + $0x30] ss:$144 sps:$4 sm:$0xff]  }
 0x30c   :  { %8624 = vmatpush1.bf16.msra.mxu1 %v12679_v63  ;;  %8582 = vmatprep.subr.bf16.mxu0 %v12684_v1  ;;  %v12763_v63 = vld [vmem:[%s17551_s0 + $0x38] ss:$144 sps:$4 sm:$0xff]  }
 0x30d   :  { %8625 = vmatprep.subr.bf16.mxu1 %v12687_v2  ;;  %v12766_v1 = vld [vmem:[%s17550_s1 + $0x270] ss:$8 sps:$4 sm:$0xff]  }
 0x30e   :  { %v12769_v2 = vld [vmem:[%s17550_s1 + $0x370] ss:$8 sps:$4 sm:$0xff]  }
 0x30f   :  { %8583 = vmatpush1.bf16.msra.mxu0 %v12682_v3  ;;  %v12774_v3 = vld [vmem:[%s17550_s1 + $0x264] ss:$8 sps:$4 sm:$0xff]  }
 0x310   :  { %8626 = vmatpush1.bf16.msra.mxu1 %v12685_v59  ;;  %8584 = vmatprep.subr.bf16.mxu0 %v12690_v33  ;;  %v12777_v59 = vld [vmem:[%s17550_s1 + $0x364] ss:$8 sps:$4 sm:$0xff]  }
 0x311   :  { %8627 = vmatprep.subr.bf16.mxu1 %v12693_v34  ;;  %v12864_v33 = vld [vmem:[%s17551_s0 + $0x44] ss:$144 sps:$4 sm:$0xff]   ;;  %v12867_v34 = vld [vmem:[%s17551_s0 + $0x4c] ss:$144 sps:$4 sm:$0xff]  }
 0x313   :  { %8585 = vmatpush1.bf16.msra.mxu0 %v12688_v41  ;;  %v12772_v41 = vld [vmem:[%s17550_s1 + $0x260] ss:$8 sps:$4 sm:$0xff]  }
 0x314   :  { %8628 = vmatpush1.bf16.msra.mxu1 %v12691_v42  ;;  %8586 = vmatprep.subr.bf16.mxu0 %v12696_v60  ;;  %v12775_v42 = vld [vmem:[%s17550_s1 + $0x360] ss:$8 sps:$4 sm:$0xff]   ;;  %v12780_v60 = vld [vmem:[%s17550_s1 + $0x254] ss:$8 sps:$4 sm:$0xff]  }
 0x315   :  { %8629 = vmatprep.subr.bf16.mxu1 %v12699_v6  ;;  %v12783_v6 = vld [vmem:[%s17550_s1 + $0x354] ss:$8 sps:$4 sm:$0xff]  }
 0x317   :  { %8587 = vmatpush1.bf16.msra.mxu0 %v12694_v8  ;;  %v12778_v8 = vld [vmem:[%s17550_s1 + $0x250] ss:$8 sps:$4 sm:$0xff]  }
 0x318   :  { %8630 = vmatpush1.bf16.msra.mxu1 %v12697_v9  ;;  %8588 = vmatprep.subr.bf16.mxu0 %v12702_v12  ;;  %v12781_v9 = vld [vmem:[%s17550_s1 + $0x350] ss:$8 sps:$4 sm:$0xff]   ;;  %v12786_v12 = vld [vmem:[%s17550_s1 + $0x244] ss:$8 sps:$4 sm:$0xff]  }
 0x319   :  { %8631 = vmatprep.subr.bf16.mxu1 %v12705_v49  ;;  %v12789_v49 = vld [vmem:[%s17550_s1 + $0x344] ss:$8 sps:$4 sm:$0xff]  }
 0x31b   :  { %8589 = vmatpush1.bf16.msra.mxu0 %v12700_v50  ;;  %v12784_v50 = vld [vmem:[%s17550_s1 + $0x240] ss:$8 sps:$4 sm:$0xff]  }
 0x31c   :  { %8632 = vmatpush1.bf16.msra.mxu1 %v12703_v55  ;;  %8590 = vmatprep.subr.bf16.mxu0 %v12708_v56  ;;  %v12787_v55 = vld [vmem:[%s17550_s1 + $0x340] ss:$8 sps:$4 sm:$0xff]   ;;  %v12792_v56 = vld [vmem:[%s17550_s1 + $0x234] ss:$8 sps:$4 sm:$0xff]  }
 0x31d   :  { %8633 = vmatprep.subr.bf16.mxu1 %v12711_v62  ;;  %v12795_v62 = vld [vmem:[%s17550_s1 + $0x334] ss:$8 sps:$4 sm:$0xff]  }
 0x31f   :  { %8591 = vmatpush1.bf16.msra.mxu0 %v12706_v4  ;;  %v12790_v4 = vld [vmem:[%s17550_s1 + $0x230] ss:$8 sps:$4 sm:$0xff]  }
 0x320   :  { %8634 = vmatpush1.bf16.msra.mxu1 %v12709_v58  ;;  %8592 = vmatprep.subr.bf16.mxu0 %v12714_v10  ;;  %v12793_v58 = vld [vmem:[%s17550_s1 + $0x330] ss:$8 sps:$4 sm:$0xff]   ;;  %v12798_v10 = vld [vmem:[%s17550_s1 + $0x224] ss:$8 sps:$4 sm:$0xff]  }
 0x321   :  { %8635 = vmatprep.subr.bf16.mxu1 %v12717_v13  ;;  %v12801_v13 = vld [vmem:[%s17550_s1 + $0x324] ss:$8 sps:$4 sm:$0xff]  }
 0x323   :  { %8593 = vmatpush2.bf16.msra.mxu0 %v12712_v14  ;;  %v12796_v14 = vld [vmem:[%s17550_s1 + $0x220] ss:$8 sps:$4 sm:$0xff]  }
 0x324   :  { %8636 = vmatpush2.bf16.msra.mxu1 %v12715_v15  ;;  %8594 = vmatprep.subr.bf16.mxu0 %v12720_v18  ;;  %v12799_v15 = vld [vmem:[%s17550_s1 + $0x320] ss:$8 sps:$4 sm:$0xff]   ;;  %v12804_v18 = vld [vmem:[%s17550_s1 + $0x214] ss:$8 sps:$4 sm:$0xff]  }
 0x325   :  { %8637 = vmatprep.subr.bf16.mxu1 %v12723_v16  ;;  %v12807_v16 = vld [vmem:[%s17550_s1 + $0x314] ss:$8 sps:$4 sm:$0xff]  }
 0x327   :  { %8595 = vmatpush2.bf16.msra.mxu0 %v12718_v11  ;;  %v12802_v11 = vld [vmem:[%s17550_s1 + $0x210] ss:$8 sps:$4 sm:$0xff]  }
 0x328   :  { %8638 = vmatpush2.bf16.msra.mxu1 %v12721_v20  ;;  %8596 = vmatprep.subr.bf16.mxu0 %v12726_v23  ;;  %v12805_v20 = vld [vmem:[%s17550_s1 + $0x310] ss:$8 sps:$4 sm:$0xff]   ;;  %v12810_v23 = vld [vmem:[%s17550_s1 + $0x204] ss:$8 sps:$4 sm:$0xff]  }
 0x329   :  { %8639 = vmatprep.subr.bf16.mxu1 %v12729_v24  ;;  %v12813_v24 = vld [vmem:[%s17550_s1 + $0x304] ss:$8 sps:$4 sm:$0xff]  }
 0x32b   :  { %8597 = vmatpush2.bf16.msra.mxu0 %v12724_v25  ;;  %v12808_v25 = vld [vmem:[%s17550_s1 + $0x200] ss:$8 sps:$4 sm:$0xff]  }
 0x32c   :  { %8640 = vmatpush2.bf16.msra.mxu1 %v12727_v28  ;;  %8598 = vmatprep.subr.bf16.mxu0 %v12732_v29  ;;  %v12811_v28 = vld [vmem:[%s17550_s1 + $0x300] ss:$8 sps:$4 sm:$0xff]   ;;  %v12816_v29 = vld [vmem:[%s17550_s1 + $0x2f4] ss:$8 sps:$4 sm:$0xff]  }
 0x32d   :  { %8641 = vmatprep.subr.bf16.mxu1 %v12735_v30  ;;  %v12819_v30 = vld [vmem:[%s17550_s1 + $0x3f4] ss:$8 sps:$4 sm:$0xff]  }
 0x32f   :  { %8599 = vmatpush2.bf16.msra.mxu0 %v12730_v17  ;;  %v12814_v17 = vld [vmem:[%s17550_s1 + $0x2f0] ss:$8 sps:$4 sm:$0xff]  }
 0x330   :  { %8642 = vmatpush2.bf16.msra.mxu1 %v12733_v31  ;;  %8600 = vmatprep.subr.bf16.mxu0 %v12738_v21  ;;  %v12817_v31 = vld [vmem:[%s17550_s1 + $0x3f0] ss:$8 sps:$4 sm:$0xff]   ;;  %v12822_v21 = vld [vmem:[%s17550_s1 + $0x2e4] ss:$8 sps:$4 sm:$0xff]  }
 0x331   :  { %8643 = vmatprep.subr.bf16.mxu1 %v12741_v32  ;;  %v12825_v32 = vld [vmem:[%s17550_s1 + $0x3e4] ss:$8 sps:$4 sm:$0xff]  }
 0x333   :  { %8601 = vmatpush2.bf16.msra.mxu0 %v12736_v36  ;;  %v12820_v36 = vld [vmem:[%s17550_s1 + $0x2e0] ss:$8 sps:$4 sm:$0xff]  }
 0x334   :  { %8644 = vmatpush2.bf16.msra.mxu1 %v12739_v37  ;;  %8602 = vmatprep.subr.bf16.mxu0 %v12744_v38  ;;  %v12823_v37 = vld [vmem:[%s17550_s1 + $0x3e0] ss:$8 sps:$4 sm:$0xff]   ;;  %v12828_v38 = vld [vmem:[%s17550_s1 + $0x2d4] ss:$8 sps:$4 sm:$0xff]  }
 0x335   :  { %8645 = vmatprep.subr.bf16.mxu1 %v12747_v39  ;;  %v12831_v39 = vld [vmem:[%s17550_s1 + $0x3d4] ss:$8 sps:$4 sm:$0xff]  }
 0x337   :  { %8603 = vmatpush2.bf16.msra.mxu0 %v12742_v40  ;;  %v12826_v40 = vld [vmem:[%s17550_s1 + $0x2d0] ss:$8 sps:$4 sm:$0xff]  }
 0x338   :  { %8646 = vmatpush2.bf16.msra.mxu1 %v12745_v44  ;;  %8604 = vmatprep.subr.bf16.mxu0 %v12750_v45  ;;  %v12829_v44 = vld [vmem:[%s17550_s1 + $0x3d0] ss:$8 sps:$4 sm:$0xff]   ;;  %v12834_v45 = vld [vmem:[%s17550_s1 + $0x2c4] ss:$8 sps:$4 sm:$0xff]  }
 0x339   :  { %8647 = vmatprep.subr.bf16.mxu1 %v12753_v46  ;;  %v12837_v46 = vld [vmem:[%s17550_s1 + $0x3c4] ss:$8 sps:$4 sm:$0xff]  }
 0x33b   :  { %8605 = vmatpush2.bf16.msra.mxu0 %v12748_v35  ;;  %v12832_v35 = vld [vmem:[%s17550_s1 + $0x2c0] ss:$8 sps:$4 sm:$0xff]  }
 0x33c   :  { %8648 = vmatpush2.bf16.msra.mxu1 %v12751_v43  ;;  %8606 = vmatprep.subr.bf16.mxu0 %v12756_v47  ;;  %v12835_v43 = vld [vmem:[%s17550_s1 + $0x3c0] ss:$8 sps:$4 sm:$0xff]   ;;  %v12840_v47 = vld [vmem:[%s17550_s1 + $0x2b4] ss:$8 sps:$4 sm:$0xff]  }
 0x33d   :  { %8649 = vmatprep.subr.bf16.mxu1 %v12759_v48  ;;  %v12843_v48 = vld [vmem:[%s17550_s1 + $0x3b4] ss:$8 sps:$4 sm:$0xff]  }
 0x33f   :  { %8607 = vmatpush2.bf16.msra.mxu0 %v12754_v51  ;;  %v12838_v51 = vld [vmem:[%s17550_s1 + $0x2b0] ss:$8 sps:$4 sm:$0xff]  }
 0x340   :  { %8650 = vmatpush2.bf16.msra.mxu1 %v12757_v52  ;;  %8662 = vmatprep.subr.bf16.mxu0 %v12768_v53  ;;  %v12841_v52 = vld [vmem:[%s17550_s1 + $0x3b0] ss:$8 sps:$4 sm:$0xff]   ;;  %v12846_v53 = vld [vmem:[%s17550_s1 + $0x2a4] ss:$8 sps:$4 sm:$0xff]  }
 0x341   :  { %8705 = vmatprep.subr.bf16.mxu1 %v12771_v54  ;;  %v12849_v54 = vld [vmem:[%s17550_s1 + $0x3a4] ss:$8 sps:$4 sm:$0xff]  }
 0x342   :  { %8609 = vmatmul.mubr.bf16.vlgmr.msra.gmra.mxu0 %v12760_v57  ;;  %v12844_v57 = vld [vmem:[%s17550_s1 + $0x2a0] ss:$8 sps:$4 sm:$0xff]  }
 0x343   :  { %8652 = vmatmul.mubr.bf16.vlgmr.msra.gmra.mxu1 %v12763_v63  ;;  %8663 = vmatpush1.bf16.msra.mxu0 %v12766_v1  ;;  %v12847_v63 = vld [vmem:[%s17550_s1 + $0x3a0] ss:$8 sps:$4 sm:$0xff]   ;;  %v12852_v1 = vld [vmem:[%s17550_s1 + $0x294] ss:$8 sps:$4 sm:$0xff]  }
 0x344   :  { %8706 = vmatpush1.bf16.msra.mxu1 %v12769_v2  ;;  %8664 = vmatprep.subr.bf16.mxu0 %v12774_v3  ;;  %v12855_v2 = vld [vmem:[%s17550_s1 + $0x394] ss:$8 sps:$4 sm:$0xff]   ;;  %v12850_v3 = vld [vmem:[%s17550_s1 + $0x290] ss:$8 sps:$4 sm:$0xff]  }
 0x345   :  { %8707 = vmatprep.subr.bf16.mxu1 %v12777_v59  ;;  %8694 = vmatprep.mubr.bf16.mxu0 %v12864_v33  ;;  %v12853_v59 = vld [vmem:[%s17550_s1 + $0x390] ss:$8 sps:$4 sm:$0xff]   ;;  %v12858_v33 = vld [vmem:[%s17550_s1 + $0x284] ss:$8 sps:$4 sm:$0xff]  }
 0x346   :  { %8737 = vmatprep.mubr.bf16.mxu1 %v12867_v34  ;;  %v12861_v34 = vld [vmem:[%s17550_s1 + $0x384] ss:$8 sps:$4 sm:$0xff]  }
 0x347   :  { %8665 = vmatpush1.bf16.msra.mxu0 %v12772_v41  ;;  %v12856_v41 = vld [vmem:[%s17550_s1 + $0x280] ss:$8 sps:$4 sm:$0xff]  }
 0x348   :  { %8708 = vmatpush1.bf16.msra.mxu1 %v12775_v42  ;;  %8666 = vmatprep.subr.bf16.mxu0 %v12780_v60  ;;  %v12859_v42 = vld [vmem:[%s17550_s1 + $0x380] ss:$8 sps:$4 sm:$0xff]   ;;  %v16345_v60 = vpop.f32.mrf.mxu0 }
 0x349   :  { %8709 = vmatprep.subr.bf16.mxu1 %v12783_v6  ;;  %v16347_v6 = vpop.f32.mrf.mxu1 }
 0x34b   :  { %8667 = vmatpush1.bf16.msra.mxu0 %v12778_v8  ;;  %v12870_v8 = vld [vmem:[%s17550_s1 + $0x474] ss:$8 sps:$4 sm:$0xff]  }
 0x34c   :  { %8710 = vmatpush1.bf16.msra.mxu1 %v12781_v9  ;;  %8668 = vmatprep.subr.bf16.mxu0 %v12786_v12  ;;  %v12873_v9 = vld [vmem:[%s17550_s1 + $0x574] ss:$8 sps:$4 sm:$0xff]   ;;  %v12862_v12 = vld [vmem:[%s17551_s0 + $0x40] ss:$144 sps:$4 sm:$0xff]  }
 0x34d   :  { %8711 = vmatprep.subr.bf16.mxu1 %v12789_v49  ;;  %v12865_v49 = vld [vmem:[%s17551_s0 + $0x48] ss:$144 sps:$4 sm:$0xff]  }
 0x34f   :  { %8669 = vmatpush1.bf16.msra.mxu0 %v12784_v50  ;;  %v12868_v50 = vld [vmem:[%s17550_s1 + $0x470] ss:$8 sps:$4 sm:$0xff]  }
 0x350   :  { %8712 = vmatpush1.bf16.msra.mxu1 %v12787_v55  ;;  %8670 = vmatprep.subr.bf16.mxu0 %v12792_v56  ;;  %v12871_v55 = vld [vmem:[%s17550_s1 + $0x570] ss:$8 sps:$4 sm:$0xff]   ;;  %v16367_v56 = vpop.f32.mrf.mxu0 }
 0x351   :  { %8713 = vmatprep.subr.bf16.mxu1 %v12795_v62  ;;  %v16369_v62 = vpop.f32.mrf.mxu1 }
 0x353   :  { %8671 = vmatpush1.bf16.msra.mxu0 %v12790_v4  ;;  %v12876_v4 = vld [vmem:[%s17550_s1 + $0x464] ss:$8 sps:$4 sm:$0xff]  }
 0x354   :  { %8714 = vmatpush1.bf16.msra.mxu1 %v12793_v58  ;;  %8672 = vmatprep.subr.bf16.mxu0 %v12798_v10  ;;  %v12879_v58 = vld [vmem:[%s17550_s1 + $0x564] ss:$8 sps:$4 sm:$0xff]  }
 0x355   :  { %8715 = vmatprep.subr.bf16.mxu1 %v12801_v13  ;;  %v12966_v10 = vld [vmem:[%s17551_s0 + $0x54] ss:$144 sps:$4 sm:$0xff]   ;;  %v12969_v13 = vld [vmem:[%s17551_s0 + $0x5c] ss:$144 sps:$4 sm:$0xff]  }
 0x357   :  { %8673 = vmatpush1.bf16.msra.mxu0 %v12796_v14  ;;  %v12874_v14 = vld [vmem:[%s17550_s1 + $0x460] ss:$8 sps:$4 sm:$0xff]  }
 0x358   :  { %8716 = vmatpush1.bf16.msra.mxu1 %v12799_v15  ;;  %8674 = vmatprep.subr.bf16.mxu0 %v12804_v18  ;;  %v12877_v15 = vld [vmem:[%s17550_s1 + $0x560] ss:$8 sps:$4 sm:$0xff]   ;;  %v16389_v18 = vpop.f32.mrf.mxu0 }
 0x359   :  { %8717 = vmatprep.subr.bf16.mxu1 %v12807_v16  ;;  %v16391_v16 = vpop.f32.mrf.mxu1 }
 0x35b   :  { %8675 = vmatpush1.bf16.msra.mxu0 %v12802_v11  ;;  %v12882_v11 = vld [vmem:[%s17550_s1 + $0x454] ss:$8 sps:$4 sm:$0xff]  }
 0x35c   :  { %8718 = vmatpush1.bf16.msra.mxu1 %v12805_v20  ;;  %8676 = vmatprep.subr.bf16.mxu0 %v12810_v23  ;;  %v12885_v20 = vld [vmem:[%s17550_s1 + $0x554] ss:$8 sps:$4 sm:$0xff]   ;;  %v12880_v23 = vld [vmem:[%s17550_s1 + $0x450] ss:$8 sps:$4 sm:$0xff]  }
 0x35d   :  { %8719 = vmatprep.subr.bf16.mxu1 %v12813_v24  ;;  %v12883_v24 = vld [vmem:[%s17550_s1 + $0x550] ss:$8 sps:$4 sm:$0xff]  }
 0x35f   :  { %8677 = vmatpush1.bf16.msra.mxu0 %v12808_v25  ;;  %v16405_v25 = vpop.f32.mrf.mxu0 }
 0x360   :  { %8720 = vmatpush1.bf16.msra.mxu1 %v12811_v28  ;;  %8678 = vmatprep.subr.bf16.mxu0 %v12816_v29  ;;  %v16407_v28 = vpop.f32.mrf.mxu1  ;;  %v12888_v29 = vld [vmem:[%s17550_s1 + $0x444] ss:$8 sps:$4 sm:$0xff]  }
 0x361   :  { %8721 = vmatprep.subr.bf16.mxu1 %v12819_v30  ;;  %v12891_v30 = vld [vmem:[%s17550_s1 + $0x544] ss:$8 sps:$4 sm:$0xff]  }
 0x363   :  { %8679 = vmatpush2.bf16.msra.mxu0 %v12814_v17  ;;  %v16415_v17 = vpop.f32.mrf.mxu0 }
 0x364   :  { %8722 = vmatpush2.bf16.msra.mxu1 %v12817_v31  ;;  %8680 = vmatprep.subr.bf16.mxu0 %v12822_v21  ;;  %v16417_v31 = vpop.f32.mrf.mxu1  ;;  %v12886_v21 = vld [vmem:[%s17550_s1 + $0x440] ss:$8 sps:$4 sm:$0xff]  }
 0x365   :  { %8723 = vmatprep.subr.bf16.mxu1 %v12825_v32  ;;  %v12889_v32 = vld [vmem:[%s17550_s1 + $0x540] ss:$8 sps:$4 sm:$0xff]  }
 0x367   :  { %8681 = vmatpush2.bf16.msra.mxu0 %v12820_v36  ;;  %v12894_v36 = vld [vmem:[%s17550_s1 + $0x434] ss:$8 sps:$4 sm:$0xff]  }
 0x368   :  { %8724 = vmatpush2.bf16.msra.mxu1 %v12823_v37  ;;  %8682 = vmatprep.subr.bf16.mxu0 %v12828_v38  ;;  %v12897_v37 = vld [vmem:[%s17550_s1 + $0x534] ss:$8 sps:$4 sm:$0xff]   ;;  %v16431_v38 = vpop.f32.mrf.mxu0 }
 0x369   :  { %8725 = vmatprep.subr.bf16.mxu1 %v12831_v39  ;;  %v16433_v39 = vpop.f32.mrf.mxu1 }
 0x36b   :  { %8683 = vmatpush2.bf16.msra.mxu0 %v12826_v40  ;;  %v12892_v40 = vld [vmem:[%s17550_s1 + $0x430] ss:$8 sps:$4 sm:$0xff]  }
 0x36c   :  { %8726 = vmatpush2.bf16.msra.mxu1 %v12829_v44  ;;  %8684 = vmatprep.subr.bf16.mxu0 %v12834_v45  ;;  %v12895_v44 = vld [vmem:[%s17550_s1 + $0x530] ss:$8 sps:$4 sm:$0xff]   ;;  %v12900_v45 = vld [vmem:[%s17550_s1 + $0x424] ss:$8 sps:$4 sm:$0xff]  }
 0x36d   :  { %8727 = vmatprep.subr.bf16.mxu1 %v12837_v46  ;;  %v12903_v46 = vld [vmem:[%s17550_s1 + $0x524] ss:$8 sps:$4 sm:$0xff]  }
 0x36f   :  { %8685 = vmatpush2.bf16.msra.mxu0 %v12832_v35  ;;  %v16447_v35 = vpop.f32.mrf.mxu0 }
 0x370   :  { %8728 = vmatpush2.bf16.msra.mxu1 %v12835_v43  ;;  %8686 = vmatprep.subr.bf16.mxu0 %v12840_v47  ;;  %v16449_v43 = vpop.f32.mrf.mxu1  ;;  %v12898_v47 = vld [vmem:[%s17550_s1 + $0x420] ss:$8 sps:$4 sm:$0xff]  }
 0x371   :  { %8729 = vmatprep.subr.bf16.mxu1 %v12843_v48  ;;  %v12901_v48 = vld [vmem:[%s17550_s1 + $0x520] ss:$8 sps:$4 sm:$0xff]  }
 0x373   :  { %8687 = vmatpush2.bf16.msra.mxu0 %v12838_v51  ;;  %v12906_v51 = vld [vmem:[%s17550_s1 + $0x414] ss:$8 sps:$4 sm:$0xff]  }
 0x374   :  { %8730 = vmatpush2.bf16.msra.mxu1 %v12841_v52  ;;  %8688 = vmatprep.subr.bf16.mxu0 %v12846_v53  ;;  %v12909_v52 = vld [vmem:[%s17550_s1 + $0x514] ss:$8 sps:$4 sm:$0xff]   ;;  %v16463_v53 = vpop.f32.mrf.mxu0 }
 0x375   :  { %8731 = vmatprep.subr.bf16.mxu1 %v12849_v54  ;;  %v16465_v54 = vpop.f32.mrf.mxu1 }
 0x377   :  { %8689 = vmatpush2.bf16.msra.mxu0 %v12844_v57  ;;  %v12904_v57 = vld [vmem:[%s17550_s1 + $0x410] ss:$8 sps:$4 sm:$0xff]  }
 0x378   :  { %8732 = vmatpush2.bf16.msra.mxu1 %v12847_v63  ;;  %8690 = vmatprep.subr.bf16.mxu0 %v12852_v1  ;;  %v12907_v63 = vld [vmem:[%s17550_s1 + $0x510] ss:$8 sps:$4 sm:$0xff]   ;;  %v16473_v1 = vpop.f32.mrf.mxu0 }
 0x379   :  { %8733 = vmatprep.subr.bf16.mxu1 %v12855_v2  ;;  %v16475_v2 = vpop.f32.mrf.mxu1 }
 0x37b   :  { %8691 = vmatpush2.bf16.msra.mxu0 %v12850_v3  ;;  %v12912_v3 = vld [vmem:[%s17550_s1 + $0x404] ss:$8 sps:$4 sm:$0xff]  }
 0x37c   :  { %8734 = vmatpush2.bf16.msra.mxu1 %v12853_v59  ;;  %8692 = vmatprep.subr.bf16.mxu0 %v12858_v33  ;;  %v12915_v59 = vld [vmem:[%s17550_s1 + $0x504] ss:$8 sps:$4 sm:$0xff]   ;;  %v12910_v33 = vld [vmem:[%s17550_s1 + $0x400] ss:$8 sps:$4 sm:$0xff]  }
 0x37d   :  { %8735 = vmatprep.subr.bf16.mxu1 %v12861_v34  ;;  %v12913_v34 = vld [vmem:[%s17550_s1 + $0x500] ss:$8 sps:$4 sm:$0xff]  }
 0x37f   :  { %8693 = vmatpush2.bf16.msra.mxu0 %v12856_v41  ;;  %v16489_v41 = vpop.f32.mrf.mxu0 }
 0x380   :  { %8736 = vmatpush2.bf16.msra.mxu1 %v12859_v42  ;;  %8748 = vmatprep.subr.bf16.mxu0 %v12870_v8  ;;  %v16491_v42 = vpop.f32.mrf.mxu1  ;;  %v12918_v8 = vld [vmem:[%s17550_s1 + $0x4f4] ss:$8 sps:$4 sm:$0xff]  }
 0x381   :  { %8791 = vmatprep.subr.bf16.mxu1 %v12873_v9  ;;  %v12921_v9 = vld [vmem:[%s17550_s1 + $0x5f4] ss:$8 sps:$4 sm:$0xff]  }
 0x382   :  { %8695 = vmatmul.mubr.bf16.vlgmr.msra.gmra.mxu0 %v12862_v12  ;;  %v12916_v12 = vld [vmem:[%s17550_s1 + $0x4f0] ss:$8 sps:$4 sm:$0xff]  }
 0x383   :  { %8738 = vmatmul.mubr.bf16.vlgmr.msra.gmra.mxu1 %v12865_v49  ;;  %8749 = vmatpush1.bf16.msra.mxu0 %v12868_v50  ;;  %v12919_v49 = vld [vmem:[%s17550_s1 + $0x5f0] ss:$8 sps:$4 sm:$0xff]   ;;  %v16505_v50 = vpop.f32.mrf.mxu0 }
 0x384   :  { %8792 = vmatpush1.bf16.msra.mxu1 %v12871_v55  ;;  %8750 = vmatprep.subr.bf16.mxu0 %v12876_v4  ;;  %v16507_v55 = vpop.f32.mrf.mxu1  ;;  %v12924_v4 = vld [vmem:[%s17550_s1 + $0x4e4] ss:$8 sps:$4 sm:$0xff]  }
 0x385   :  { %8793 = vmatprep.subr.bf16.mxu1 %v12879_v58  ;;  %8780 = vmatprep.mubr.bf16.mxu0 %v12966_v10  ;;  %v12927_v58 = vld [vmem:[%s17550_s1 + $0x5e4] ss:$8 sps:$4 sm:$0xff]   ;;  %v12922_v10 = vld [vmem:[%s17550_s1 + $0x4e0] ss:$8 sps:$4 sm:$0xff]  }
 0x386   :  { %8823 = vmatprep.mubr.bf16.mxu1 %v12969_v13  ;;  %v12925_v13 = vld [vmem:[%s17550_s1 + $0x5e0] ss:$8 sps:$4 sm:$0xff]  }
 0x387   :  { %8751 = vmatpush1.bf16.msra.mxu0 %v12874_v14  ;;  %v16521_v14 = vpop.f32.mrf.mxu0 }
 0x388   :  { %8794 = vmatpush1.bf16.msra.mxu1 %v12877_v15  ;;  %8752 = vmatprep.subr.bf16.mxu0 %v12882_v11  ;;  %v16523_v15 = vpop.f32.mrf.mxu1  ;;  %v12930_v11 = vld [vmem:[%s17550_s1 + $0x4d4] ss:$8 sps:$4 sm:$0xff]  }
 0x389   :  { %8795 = vmatprep.subr.bf16.mxu1 %v12885_v20  ;;  %v12933_v20 = vld [vmem:[%s17550_s1 + $0x5d4] ss:$8 sps:$4 sm:$0xff]  }
 0x38b   :  { %8753 = vmatpush1.bf16.msra.mxu0 %v12880_v23  ;;  %v5826_v23 = vpop.f32.mrf.mxu0 }
 0x38c   :  { %8796 = vmatpush1.bf16.msra.mxu1 %v12883_v24  ;;  %8754 = vmatprep.subr.bf16.mxu0 %v12888_v29  ;;  %v16531_v24 = vpop.f32.mrf.mxu1  ;;  %v12928_v29 = vld [vmem:[%s17550_s1 + $0x4d0] ss:$8 sps:$4 sm:$0xff]  }
 0x38d   :  { %8797 = vmatprep.subr.bf16.mxu1 %v12891_v30  ;;  %v12931_v30 = vld [vmem:[%s17550_s1 + $0x5d0] ss:$8 sps:$4 sm:$0xff]  }
 0x38f   :  { %8755 = vmatpush1.bf16.msra.mxu0 %v12886_v21  ;;  %v12936_v21 = vld [vmem:[%s17550_s1 + $0x4c4] ss:$8 sps:$4 sm:$0xff]  }
 0x390   :  { %8798 = vmatpush1.bf16.msra.mxu1 %v12889_v32  ;;  %8756 = vmatprep.subr.bf16.mxu0 %v12894_v36  ;;  %v12939_v32 = vld [vmem:[%s17550_s1 + $0x5c4] ss:$8 sps:$4 sm:$0xff]   ;;  %v5612_v36 = vadd.f32 %v16347_v6, %v16345_v60  ;;  %v12942_v60 = vld [vmem:[%s17550_s1 + $0x4b4] ss:$8 sps:$4 sm:$0xff]  }
 0x391   :  { %8799 = vmatprep.subr.bf16.mxu1 %v12897_v37  ;;  %v5828_v37 = vpop.f32.mrf.mxu0  ;;  %v12945_v6 = vld [vmem:[%s17550_s1 + $0x5b4] ss:$8 sps:$4 sm:$0xff]  }
 0x393   :  { %8757 = vmatpush1.bf16.msra.mxu0 %v12892_v40  ;;  %v16547_v40 = vpop.f32.mrf.mxu1 }
 0x394   :  { %8800 = vmatpush1.bf16.msra.mxu1 %v12895_v44  ;;  %8758 = vmatprep.subr.bf16.mxu0 %v12900_v45  ;;  %v5614_v44 = vadd.f32 %v16369_v62, %v16367_v56  ;;  %v5655_v45 = vadd.f32 %v16415_v17, %v5612_v36  ;;  %v5616_v56 = vadd.f32 %v16391_v16, %v16389_v18  ;;  %v5830_v17 = vpop.f32.mrf.mxu0  ;;  %v12943_v18 = vld [vmem:[%s17550_s1 + $0x5b0] ss:$8 sps:$4 sm:$0xff]   ;;  %v12948_v16 = vld [vmem:[%s17550_s1 + $0x4a4] ss:$8 sps:$4 sm:$0xff]  }
 0x395   :  { %8801 = vmatprep.subr.bf16.mxu1 %v12903_v46  ;;  %v12934_v46 = vld [vmem:[%s17550_s1 + $0x4c0] ss:$8 sps:$4 sm:$0xff]  }
 0x396   :  { %v5657_v62 = vadd.f32 %v16431_v38, %v5614_v44 }
 0x397   :  { %8759 = vmatpush1.bf16.msra.mxu0 %v12898_v47  ;;  %v12937_v47 = vld [vmem:[%s17550_s1 + $0x5c0] ss:$8 sps:$4 sm:$0xff]  }
 0x398   :  { %8802 = vmatpush1.bf16.msra.mxu1 %v12901_v48  ;;  %8760 = vmatprep.subr.bf16.mxu0 %v12906_v51  ;;  %v16567_v48 = vpop.f32.mrf.mxu1  ;;  %v5618_v51 = vadd.f32 %v16407_v28, %v16405_v25  ;;  %v12951_v25 = vld [vmem:[%s17550_s1 + $0x5a4] ss:$8 sps:$4 sm:$0xff]   ;;  %v5700_v28 = vadd.f32 %v16433_v39, %v5657_v62  ;;  %v12949_v39 = vld [vmem:[%s17550_s1 + $0x5a0] ss:$8 sps:$4 sm:$0xff]  }
 0x399   :  { %8803 = vmatprep.subr.bf16.mxu1 %v12909_v52  ;;  %v5698_v52 = vadd.f32 %v16417_v31, %v5655_v45  ;;  %v12964_v45 = vld [vmem:[%s17551_s0 + $0x50] ss:$144 sps:$4 sm:$0xff]  }
 0x39a   :  { %v5661_v31 = vadd.f32 %v16463_v53, %v5618_v51 }
 0x39b   :  { %8761 = vmatpush1.bf16.msra.mxu0 %v12904_v57  ;;  %v5659_v57 = vadd.f32 %v16447_v35, %v5616_v56  ;;  %v5741_v38 = vadd.f32 %v16473_v1, %v5698_v52  ;;  %v5832_v35 = vpop.f32.mrf.mxu0  ;;  %v12957_v1 = vld [vmem:[%s17550_s1 + $0x594] ss:$8 sps:$4 sm:$0xff]  }
 0x39c   :  { %8804 = vmatpush1.bf16.msra.mxu1 %v12907_v63  ;;  %8762 = vmatprep.subr.bf16.mxu0 %v12912_v3  ;;  %v12940_v63 = vld [vmem:[%s17550_s1 + $0x4b0] ss:$8 sps:$4 sm:$0xff]   ;;  %v5875_v3 = vpop.f32.mrf.mxu1 }
 0x39d   :  { %8805 = vmatprep.subr.bf16.mxu1 %v12915_v59  ;;  %v5702_v59 = vadd.f32 %v16449_v43, %v5659_v57  ;;  %v12954_v43 = vld [vmem:[%s17550_s1 + $0x494] ss:$8 sps:$4 sm:$0xff]  }
 0x39e   :  { %v5955_v53 = vpop.f32.mrf.mxu1 }
 0x39f   :  { %8763 = vmatpush1.bf16.msra.mxu0 %v12910_v33  ;;  %v5743_v33 = vadd.f32 %v16489_v41, %v5700_v28  ;;  %v5704_v41 = vadd.f32 %v16465_v54, %v5661_v31 }
 0x3a0   :  { %8806 = vmatpush1.bf16.msra.mxu1 %v12913_v34  ;;  %8764 = vmatprep.subr.bf16.mxu0 %v12918_v8  ;;  %v12946_v34 = vld [vmem:[%s17550_s1 + $0x4a0] ss:$8 sps:$4 sm:$0xff]   ;;  %v5912_v8 = vpop.f32.mrf.mxu0 }
 0x3a1   :  { %8807 = vmatprep.subr.bf16.mxu1 %v12921_v9  ;;  %v5784_v9 = vadd.f32 %v16475_v2, %v5741_v38  ;;  %v12960_v2 = vld [vmem:[%s17550_s1 + $0x484] ss:$8 sps:$4 sm:$0xff]  }
 0x3a2   :  { %v5914_v54 = vpop.f32.mrf.mxu0 }
 0x3a3   :  { %8765 = vmatpush2.bf16.msra.mxu0 %v12916_v12  ;;  %v5745_v12 = vadd.f32 %v16505_v50, %v5702_v59 }
 0x3a4   :  { %8808 = vmatpush2.bf16.msra.mxu1 %v12919_v49  ;;  %8766 = vmatprep.subr.bf16.mxu0 %v12924_v4  ;;  %v5786_v49 = vadd.f32 %v16491_v42, %v5743_v33  ;;  %v5747_v4 = vadd.f32 %v16521_v14, %v5704_v41  ;;  %v12963_v42 = vld [vmem:[%s17550_s1 + $0x584] ss:$8 sps:$4 sm:$0xff]  }
 0x3a5   :  { %8809 = vmatprep.subr.bf16.mxu1 %v12927_v58  ;;  %v5827_v58 = vadd.f32 %v5826_v23, %v5784_v9  ;;  %v5788_v50 = vadd.f32 %v16507_v55, %v5745_v12  ;;  %v12972_v55 = vld [vmem:[%s17550_s1 + $0x674] ss:$8 sps:$4 sm:$0xff]  }
 0x3a6   :  { %v5829_v14 = vadd.f32 %v5828_v37, %v5786_v49  ;;  %v12982_v49 = vld [vmem:[%s17550_s1 + $0x650] ss:$8 sps:$4 sm:$0xff]  }
 0x3a7   :  { %8767 = vmatpush2.bf16.msra.mxu0 %v12922_v10  ;;  %v12952_v10 = vld [vmem:[%s17550_s1 + $0x490] ss:$8 sps:$4 sm:$0xff]   ;;  %v5870_v23 = vadd.f32 %v16531_v24, %v5827_v58 }
 0x3a8   :  { %8810 = vmatpush2.bf16.msra.mxu1 %v12925_v13  ;;  %8768 = vmatprep.subr.bf16.mxu0 %v12930_v11  ;;  %v12955_v13 = vld [vmem:[%s17550_s1 + $0x590] ss:$8 sps:$4 sm:$0xff]   ;;  %v5957_v11 = vpop.f32.mrf.mxu1  ;;  %v5872_v24 = vadd.f32 %v16547_v40, %v5829_v14 }
 0x3a9   :  { %8811 = vmatprep.subr.bf16.mxu1 %v12933_v20  ;;  %v5790_v20 = vadd.f32 %v16523_v15, %v5747_v4  ;;  %v12975_v15 = vld [vmem:[%s17550_s1 + $0x774] ss:$8 sps:$4 sm:$0xff]   ;;  %v5913_v44 = vadd.f32 %v5912_v8, %v5870_v23  ;;  %v12973_v40 = vld [vmem:[%s17550_s1 + $0x770] ss:$8 sps:$4 sm:$0xff]  }
 0x3aa   :  { %v5959_v36 = vpop.f32.mrf.mxu1  ;;  %v12985_v4 = vld [vmem:[%s17550_s1 + $0x750] ss:$8 sps:$4 sm:$0xff]  }
 0x3ab   :  { %8769 = vmatpush2.bf16.msra.mxu0 %v12928_v29  ;;  %v5831_v29 = vadd.f32 %v5830_v17, %v5788_v50  ;;  %v5833_v37 = vadd.f32 %v5832_v35, %v5790_v20  ;;  %v12978_v17 = vld [vmem:[%s17550_s1 + $0x664] ss:$8 sps:$4 sm:$0xff]   ;;  %v5956_v52 = vadd.f32 %v5955_v53, %v5913_v44  ;;  %v12976_v35 = vld [vmem:[%s17550_s1 + $0x660] ss:$8 sps:$4 sm:$0xff]  }
 0x3ac   :  { %8812 = vmatpush2.bf16.msra.mxu1 %v12931_v30  ;;  %8770 = vmatprep.subr.bf16.mxu0 %v12936_v21  ;;  %v12958_v30 = vld [vmem:[%s17550_s1 + $0x480] ss:$8 sps:$4 sm:$0xff]   ;;  %v5961_v62 = vpop.f32.mrf.mxu1 }
 0x3ad   :  { %8813 = vmatprep.subr.bf16.mxu1 %v12939_v32  ;;  %v12961_v21 = vld [vmem:[%s17550_s1 + $0x580] ss:$8 sps:$4 sm:$0xff]   ;;  %v5916_v32 = vpop.f32.mrf.mxu0  ;;  %v5876_v51 = vadd.f32 %v5875_v3, %v5833_v37 }
 0x3ae   :  { %v12979_v3 = vld [vmem:[%s17550_s1 + $0x760] ss:$8 sps:$4 sm:$0xff]  }
 0x3af   :  { %8771 = vmatpush2.bf16.msra.mxu0 %v12934_v46  ;;  %v12967_v46 = vld [vmem:[%s17551_s0 + $0x58] ss:$144 sps:$4 sm:$0xff]   ;;  %v5918_v56 = vpop.f32.mrf.mxu0 }
 0x3b0   :  { %8814 = vmatpush2.bf16.msra.mxu1 %v12937_v47  ;;  %8772 = vmatprep.subr.bf16.mxu0 %v12942_v60  ;;  %v5874_v47 = vadd.f32 %v16567_v48, %v5831_v29  ;;  %v5915_v60 = vadd.f32 %v5914_v54, %v5872_v24  ;;  %v12981_v48 = vld [vmem:[%s17550_s1 + $0x764] ss:$8 sps:$4 sm:$0xff]   ;;  %v5919_v31 = vadd.f32 %v5918_v56, %v5876_v51  ;;  %v12988_v29 = vld [vmem:[%s17550_s1 + $0x640] ss:$8 sps:$4 sm:$0xff]  }
 0x3b1   :  { %8815 = vmatprep.subr.bf16.mxu1 %v12945_v6  ;;  %v12970_v6 = vld [vmem:[%s17550_s1 + $0x670] ss:$8 sps:$4 sm:$0xff]   ;;  %v12993_v54 = vld [vmem:[%s17550_s1 + $0x744] ss:$8 sps:$4 sm:$0xff]  }
 0x3b2   :  { %v5917_v57 = vadd.f32 %v5916_v32, %v5874_v47  ;;  %v5958_v28 = vadd.f32 %v5957_v11, %v5915_v60  ;;  %v5962_v9 = vadd.f32 %v5961_v62, %v5919_v31  ;;  %v12996_v32 = vld [vmem:[%s17550_s1 + $0x634] ss:$8 sps:$4 sm:$0xff]   ;;  %v12994_v60 = vld [vmem:[%s17550_s1 + $0x630] ss:$8 sps:$4 sm:$0xff]   ;;  %v13005_v56 = vld [vmem:[%s17550_s1 + $0x724] ss:$8 sps:$4 sm:$0xff]  }
 0x3b3   :  { %8773 = vmatpush2.bf16.msra.mxu0 %v12940_v63  ;;  %v13068_v63 = vld [vmem:[%s17551_s0 + $0x64] ss:$144 sps:$4 sm:$0xff]  }
 0x3b4   :  { %8816 = vmatpush2.bf16.msra.mxu1 %v12943_v18  ;;  %8774 = vmatprep.subr.bf16.mxu0 %v12948_v16  ;;  %v13071_v18 = vld [vmem:[%s17551_s0 + $0x6c] ss:$144 sps:$4 sm:$0xff]   ;;  %v5960_v8 = vadd.f32 %v5959_v36, %v5917_v57 }
 0x3b5   :  { %8817 = vmatprep.subr.bf16.mxu1 %v12951_v25  ;;  %v12999_v36 = vld [vmem:[%s17550_s1 + $0x734] ss:$8 sps:$4 sm:$0xff]  }
 0x3b6   :  { %v13011_v31 = vld [vmem:[%s17550_s1 + $0x714] ss:$8 sps:$4 sm:$0xff]  }
 0x3b7   :  { %8775 = vmatpush2.bf16.msra.mxu0 %v12946_v34  ;;  %v12984_v34 = vld [vmem:[%s17550_s1 + $0x654] ss:$8 sps:$4 sm:$0xff]  }
 0x3b8   :  { %8818 = vmatpush2.bf16.msra.mxu1 %v12949_v39  ;;  %8776 = vmatprep.subr.bf16.mxu0 %v12954_v43  ;;  %v12987_v39 = vld [vmem:[%s17550_s1 + $0x754] ss:$8 sps:$4 sm:$0xff]  }
 0x3b9   :  { %8819 = vmatprep.subr.bf16.mxu1 %v12957_v1 }
 0x3bb   :  { %8777 = vmatpush2.bf16.msra.mxu0 %v12952_v10 }
 0x3bc   :  { %8820 = vmatpush2.bf16.msra.mxu1 %v12955_v13  ;;  %8778 = vmatprep.subr.bf16.mxu0 %v12960_v2  ;;  %v12990_v13 = vld [vmem:[%s17550_s1 + $0x644] ss:$8 sps:$4 sm:$0xff]  }
 0x3bd   :  { %8821 = vmatprep.subr.bf16.mxu1 %v12963_v42 }
 0x3bf   :  { %8779 = vmatpush2.bf16.msra.mxu0 %v12958_v30  ;;  %v12991_v30 = vld [vmem:[%s17550_s1 + $0x740] ss:$8 sps:$4 sm:$0xff]  }
 0x3c0   :  { %8822 = vmatpush2.bf16.msra.mxu1 %v12961_v21  ;;  %8834 = vmatprep.subr.bf16.mxu0 %v12972_v55 }
 0x3c1   :  { %8877 = vmatprep.subr.bf16.mxu1 %v12975_v15 }
 0x3c2   :  { %v5998_v16 = vpop.f32.mrf.mxu0  ;;  %8781 = vmatmul.mubr.bf16.vlgmr.msra.gmra.mxu0 %v12964_v45 }
 0x3c3   :  { %v6041_v25 = vpop.f32.mrf.mxu1  ;;  %8824 = vmatmul.mubr.bf16.vlgmr.msra.gmra.mxu1 %v12967_v46  ;;  %v5999_v38 = vadd.f32 %v5998_v16, %v5956_v52  ;;  %8835 = vmatpush1.bf16.msra.mxu0 %v12970_v6  ;;  %v12997_v6 = vld [vmem:[%s17550_s1 + $0x730] ss:$8 sps:$4 sm:$0xff]   ;;  %v13000_v16 = vld [vmem:[%s17550_s1 + $0x620] ss:$8 sps:$4 sm:$0xff]  }
 0x3c4   :  { %8878 = vmatpush1.bf16.msra.mxu1 %v12973_v40  ;;  %v6000_v59 = vpop.f32.mrf.mxu0  ;;  %8836 = vmatprep.subr.bf16.mxu0 %v12978_v17  ;;  %v13002_v40 = vld [vmem:[%s17550_s1 + $0x624] ss:$8 sps:$4 sm:$0xff]  }
 0x3c5   :  { %v6043_v33 = vpop.f32.mrf.mxu1  ;;  %8879 = vmatprep.subr.bf16.mxu1 %v12981_v48  ;;  %v6001_v53 = vadd.f32 %v6000_v59, %v5958_v28  ;;  %8866 = vmatprep.mubr.bf16.mxu0 %v13068_v63  ;;  %v16672_v43 = vadd.f32 %v6041_v25, %v5999_v38  ;;  %v13003_v25 = vld [vmem:[%s17550_s1 + $0x720] ss:$8 sps:$4 sm:$0xff]   ;;  %v13008_v28 = vld [vmem:[%s17550_s1 + $0x614] ss:$8 sps:$4 sm:$0xff]  }
 0x3c6   :  { %8909 = vmatprep.mubr.bf16.mxu1 %v13071_v18  ;;  %v6002_v1 = vpop.f32.mrf.mxu0 }
 0x3c7   :  { %v6045_v41 = vpop.f32.mrf.mxu1  ;;  %v6003_v12 = vadd.f32 %v6002_v1, %v5960_v8  ;;  %8837 = vmatpush1.bf16.msra.mxu0 %v12976_v35  ;;  %v16680_v58 = vadd.f32 %v6043_v33, %v6001_v53  ;;  %v6090_v42 = vmul.f32 %v16672_v43, %v16672_v43  ;;  %v13006_v8 = vld [vmem:[%s17550_s1 + $0x610] ss:$8 sps:$4 sm:$0xff]   ;;  %v13014_v1 = vld [vmem:[%s17550_s1 + $0x604] ss:$8 sps:$4 sm:$0xff]  }
 0x3c8   :  { %8880 = vmatpush1.bf16.msra.mxu1 %v12979_v3  ;;  %v6004_v10 = vpop.f32.mrf.mxu0  ;;  %8838 = vmatprep.subr.bf16.mxu0 %v12984_v34  ;;  %v13009_v53 = vld [vmem:[%s17550_s1 + $0x710] ss:$8 sps:$4 sm:$0xff]  }
 0x3c9   :  { %8881 = vmatprep.subr.bf16.mxu1 %v12987_v39  ;;  %v16688_v11 = vadd.f32 %v6045_v41, %v6003_v12  ;;  %v6005_v2 = vadd.f32 %v6004_v10, %v5962_v9  ;;  %v6047_v50 = vpop.f32.mrf.mxu1  ;;  %v6091_v21 = vmul.f32 %v16680_v58, %v16680_v58  ;;  %v13017_v41 = vld [vmem:[%s17550_s1 + $0x704] ss:$8 sps:$4 sm:$0xff]  }
 0x3cb   :  { %v6055_v14 = vadd.f32 %v16688_v11, %v16672_v43  ;;  %v6092_v20 = vmul.f32 %v16688_v11, %v16688_v11  ;;  %v16696_v23 = vadd.f32 %v6047_v50, %v6005_v2  ;;  %8839 = vmatpush1.bf16.msra.mxu0 %v12982_v49  ;;  %v13015_v2 = vld [vmem:[%s17550_s1 + $0x700] ss:$8 sps:$4 sm:$0xff]   ;;  %v13023_v50 = vld [vmem:[%s17550_s1 + $0x7f4] ss:$8 sps:$4 sm:$0xff]  }
 0x3cc   :  { %8882 = vmatpush1.bf16.msra.mxu1 %v12985_v4  ;;  %8840 = vmatprep.subr.bf16.mxu0 %v12990_v13 }
 0x3cd   :  { %8883 = vmatprep.subr.bf16.mxu1 %v12993_v54  ;;  %v6056_v55 = vrot.slane %v6055_v14, 4  ;;  %v6094_v15 = vadd.f32 %v6092_v20, %v6090_v42  ;;  %v6062_v24 = vadd.f32 %v16696_v23, %v16680_v58  ;;  %v6093_v37 = vmul.f32 %v16696_v23, %v16696_v23  ;;  %v13012_v54 = vld [vmem:[%s17550_s1 + $0x600] ss:$8 sps:$4 sm:$0xff]   ;;  %v13020_v42 = vld [vmem:[%s17550_s1 + $0x6f4] ss:$8 sps:$4 sm:$0xff]  }
 0x3cf   :  { %v6057_v44 = vadd.f32 %v6056_v55, %v6055_v14  ;;  %v6095_v45 = vrot.slane %v6094_v15, 4  ;;  %v6063_v46 = vrot.slane %v6062_v24, 4  ;;  %v6101_v47 = vadd.f32 %v6093_v37, %v6091_v21  ;;  %8841 = vmatpush1.bf16.msra.mxu0 %v12988_v29  ;;  %v13018_v21 = vld [vmem:[%s17550_s1 + $0x6f0] ss:$8 sps:$4 sm:$0xff]   ;;  %v13026_v55 = vld [vmem:[%s17550_s1 + $0x6e4] ss:$8 sps:$4 sm:$0xff]  }
 0x3d0   :  { %8884 = vmatpush1.bf16.msra.mxu1 %v12991_v30  ;;  %8842 = vmatprep.subr.bf16.mxu0 %v12996_v32  ;;  %v13021_v32 = vld [vmem:[%s17550_s1 + $0x7f0] ss:$8 sps:$4 sm:$0xff]  }
 0x3d1   :  { %8885 = vmatprep.subr.bf16.mxu1 %v12999_v36  ;;  %v6058_v62 = vrot.slane %v6057_v44, 2  ;;  %v6096_v17 = vadd.f32 %v6095_v45, %v6094_v15  ;;  %v6064_v48 = vadd.f32 %v6063_v46, %v6062_v24  ;;  %v6102_v51 = vrot.slane %v6101_v47, 4  ;;  %v6054_v36 = vld [vmem:[#allocation3] sm:$0x3]  ;;  %v13029_v15 = vld [vmem:[%s17550_s1 + $0x7e4] ss:$8 sps:$4 sm:$0xff]  }
 0x3d2   :  { %v13024_v46 = vld [vmem:[%s17550_s1 + $0x6e0] ss:$8 sps:$4 sm:$0xff]  }
 0x3d3   :  { %v6059_v52 = vadd.f32 %v6058_v62, %v6057_v44  ;;  %v6097_v57 = vrot.slane %v6096_v17, 2  ;;  %v6065_v63 = vrot.slane %v6064_v48, 2  ;;  %v6103_v18 = vadd.f32 %v6102_v51, %v6101_v47  ;;  %8843 = vmatpush1.bf16.msra.mxu0 %v12994_v60  ;;  %v6089_v44 = vld [vmem:[#allocation4] sm:$0x3]  ;;  %v13032_v60 = vld [vmem:[%s17550_s1 + $0x6d4] ss:$8 sps:$4 sm:$0xff]  }
 0x3d4   :  { %8886 = vmatpush1.bf16.msra.mxu1 %v12997_v6  ;;  %8844 = vmatprep.subr.bf16.mxu0 %v13002_v40  ;;  %v13027_v47 = vld [vmem:[%s17550_s1 + $0x7e0] ss:$8 sps:$4 sm:$0xff]   ;;  %v13035_v6 = vld [vmem:[%s17550_s1 + $0x7d4] ss:$8 sps:$4 sm:$0xff]   ;;  %v13030_v40 = vld [vmem:[%s17550_s1 + $0x6d0] ss:$8 sps:$4 sm:$0xff]  }
 0x3d5   :  { %8887 = vmatprep.subr.bf16.mxu1 %v13005_v56  ;;  %v6060_v38 = vrot.slane %v6059_v52, 1  ;;  %v6098_v35 = vadd.f32 %v6097_v57, %v6096_v17  ;;  %v6066_v3 = vadd.f32 %v6065_v63, %v6064_v48  ;;  %v6104_v59 = vrot.slane %v6103_v18, 2  ;;  %v13033_v56 = vld [vmem:[%s17550_s1 + $0x7d0] ss:$8 sps:$4 sm:$0xff]   ;;  %v13038_v62 = vld [vmem:[%s17550_s1 + $0x6c4] ss:$8 sps:$4 sm:$0xff]  }
 0x3d6   :  { %v13041_v17 = vld [vmem:[%s17550_s1 + $0x7c4] ss:$8 sps:$4 sm:$0xff]   ;;  %v13036_v48 = vld [vmem:[%s17550_s1 + $0x6c0] ss:$8 sps:$4 sm:$0xff]   ;;  %v13047_v57 = vld [vmem:[%s17550_s1 + $0x7b4] ss:$8 sps:$4 sm:$0xff]  }
 0x3d7   :  { %v6099_v33 = vrot.slane %v6098_v35, 1  ;;  %v6067_v34 = vrot.slane %v6066_v3, 1  ;;  %v6105_v39 = vadd.f32 %v6104_v59, %v6103_v18  ;;  %8845 = vmatpush1.bf16.msra.mxu0 %v13000_v16  ;;  %v6061_v9 = vadd.f32 %v6060_v38, %v6059_v52  ;;  %v13039_v51 = vld [vmem:[%s17550_s1 + $0x7c0] ss:$8 sps:$4 sm:$0xff]   ;;  %v13044_v52 = vld [vmem:[%s17550_s1 + $0x6b4] ss:$8 sps:$4 sm:$0xff]  }
 0x3d8   :  { %8888 = vmatpush1.bf16.msra.mxu1 %v13003_v25  ;;  %8846 = vmatprep.subr.bf16.mxu0 %v13008_v28  ;;  %v13042_v63 = vld [vmem:[%s17550_s1 + $0x6b0] ss:$8 sps:$4 sm:$0xff]   ;;  %v13050_v16 = vld [vmem:[%s17550_s1 + $0x6a4] ss:$8 sps:$4 sm:$0xff]   ;;  %v13048_v28 = vld [vmem:[%s17550_s1 + $0x6a0] ss:$8 sps:$4 sm:$0xff]  }
 0x3d9   :  { %8889 = vmatprep.subr.bf16.mxu1 %v13011_v31  ;;  %v6068_v12 = vadd.f32 %v6067_v34, %v6066_v3  ;;  %v6106_v49 = vrot.slane %v6105_v39, 1  ;;  %v6100_v4 = vadd.f32 %v6099_v33, %v6098_v35  ;;  %v13045_v18 = vld [vmem:[%s17550_s1 + $0x7b0] ss:$8 sps:$4 sm:$0xff]   ;;  %v13053_v25 = vld [vmem:[%s17550_s1 + $0x7a4] ss:$8 sps:$4 sm:$0xff]  }
 0x3da   :  { %v13051_v31 = vld [vmem:[%s17550_s1 + $0x7a0] ss:$8 sps:$4 sm:$0xff]   ;;  %v13056_v38 = vld [vmem:[%s17550_s1 + $0x694] ss:$8 sps:$4 sm:$0xff]   ;;  %v13054_v3 = vld [vmem:[%s17550_s1 + $0x690] ss:$8 sps:$4 sm:$0xff]  }
 0x3db   :  { %v6071_v10 = vcombine.low %v6061_v9, %v6068_v12  ;;  %v6107_v13 = vadd.f32 %v6106_v49, %v6105_v39  ;;  %8847 = vmatpush1.bf16.msra.mxu0 %v13006_v8  ;;  %v13059_v35 = vld [vmem:[%s17550_s1 + $0x794] ss:$8 sps:$4 sm:$0xff]   ;;  %v13057_v59 = vld [vmem:[%s17550_s1 + $0x790] ss:$8 sps:$4 sm:$0xff]   ;;  %v13062_v33 = vld [vmem:[%s17550_s1 + $0x684] ss:$8 sps:$4 sm:$0xff]  }
 0x3dc   :  { %8890 = vmatpush1.bf16.msra.mxu1 %v13009_v53  ;;  %8848 = vmatprep.subr.bf16.mxu0 %v13014_v1  ;;  %v13065_v34 = vld [vmem:[%s17550_s1 + $0x784] ss:$8 sps:$4 sm:$0xff]   ;;  %v13060_v39 = vld [vmem:[%s17550_s1 + $0x680] ss:$8 sps:$4 sm:$0xff]   ;;  %v13074_v53 = vld [vmem:[%s17550_s1 + $0x874] ss:$8 sps:$4 sm:$0xff]  }
 0x3dd   :  { %8891 = vmatprep.subr.bf16.mxu1 %v13017_v41  ;;  %v6078_v14 = vrot.slane %v6071_v10, %v15417_v19  ;;  %v6110_v20 = vcombine.low %v6100_v4, %v6107_v13  ;;  %v13063_v8 = vld [vmem:[%s17550_s1 + $0x780] ss:$8 sps:$4 sm:$0xff]   ;;  %v13077_v1 = vld [vmem:[%s17550_s1 + $0x974] ss:$8 sps:$4 sm:$0xff]   ;;  %v13072_v12 = vld [vmem:[%s17550_s1 + $0x870] ss:$8 sps:$4 sm:$0xff]  }
 0x3de   :  { %v13066_v41 = vld [vmem:[%s17551_s0 + $0x60] ss:$144 sps:$4 sm:$0xff]   ;;  %v13069_v9 = vld [vmem:[%s17551_s0 + $0x68] ss:$144 sps:$4 sm:$0xff]   ;;  %v13080_v4 = vld [vmem:[%s17550_s1 + $0x864] ss:$8 sps:$4 sm:$0xff]  }
 0x3df   :  { %v6085_v29 = vrot.slane %v6078_v14, %v15417_v19  ;;  %v6117_v30 = vrot.slane %v6110_v20, %v15417_v19  ;;  %8849 = vmatpush1.bf16.msra.mxu0 %v13012_v54  ;;  %v13075_v49 = vld [vmem:[%s17550_s1 + $0x970] ss:$8 sps:$4 sm:$0xff]   ;;  %v13083_v10 = vld [vmem:[%s17550_s1 + $0x964] ss:$8 sps:$4 sm:$0xff]   ;;  %v13089_v14 = vld [vmem:[%s17550_s1 + $0x954] ss:$8 sps:$4 sm:$0xff]  }
 0x3e0   :  { %8892 = vmatpush1.bf16.msra.mxu1 %v13015_v2  ;;  %8850 = vmatprep.subr.bf16.mxu0 %v13020_v42  ;;  %v13170_v13 = vld [vmem:[%s17551_s0 + $0x74] ss:$144 sps:$4 sm:$0xff]   ;;  %v13173_v54 = vld [vmem:[%s17551_s0 + $0x7c] ss:$144 sps:$4 sm:$0xff]   ;;  %v13078_v2 = vld [vmem:[%s17550_s1 + $0x860] ss:$8 sps:$4 sm:$0xff]  }
 0x3e1   :  { %8893 = vmatprep.subr.bf16.mxu1 %v13023_v50  ;;  %v6087_v24 = vadd.f32 %v6085_v29, %v6054_v36  ;;  %v6124_v37 = vrot.slane %v6117_v30, %v15417_v19  ;;  %v13081_v42 = vld [vmem:[%s17550_s1 + $0x960] ss:$8 sps:$4 sm:$0xff]   ;;  %v13086_v50 = vld [vmem:[%s17550_s1 + $0x854] ss:$8 sps:$4 sm:$0xff]   ;;  %v13084_v20 = vld [vmem:[%s17550_s1 + $0x850] ss:$8 sps:$4 sm:$0xff]  }
 0x3e2   :  { %v13087_v29 = vld [vmem:[%s17550_s1 + $0x950] ss:$8 sps:$4 sm:$0xff]   ;;  %v13092_v30 = vld [vmem:[%s17550_s1 + $0x844] ss:$8 sps:$4 sm:$0xff]   ;;  %v13093_v36 = vld [vmem:[%s17550_s1 + $0x940] ss:$8 sps:$4 sm:$0xff]  }
 0x3e3   :  { %6088 = vst.msk [vmem:[#allocation3] sm:$0x3] %vm14894_vm0, %v6087_v24  ;;  %v6126_v45 = vadd.f32 %v6124_v37, %v6089_v44  ;;  %8851 = vmatpush2.bf16.msra.mxu0 %v13018_v21  ;;  %v13095_v21 = vld [vmem:[%s17550_s1 + $0x944] ss:$8 sps:$4 sm:$0xff]   ;;  %v13096_v24 = vld [vmem:[%s17550_s1 + $0x830] ss:$8 sps:$4 sm:$0xff]  }
 0x3e4   :  { %8894 = vmatpush2.bf16.msra.mxu1 %v13021_v32  ;;  %8852 = vmatprep.subr.bf16.mxu0 %v13026_v55  ;;  %v13090_v32 = vld [vmem:[%s17550_s1 + $0x840] ss:$8 sps:$4 sm:$0xff]   ;;  %v13098_v55 = vld [vmem:[%s17550_s1 + $0x834] ss:$8 sps:$4 sm:$0xff]   ;;  %v13099_v37 = vld [vmem:[%s17550_s1 + $0x930] ss:$8 sps:$4 sm:$0xff]  }
 0x3e5   :  { %8895 = vmatprep.subr.bf16.mxu1 %v13029_v15  ;;  %6127 = vst.msk [vmem:[#allocation4] sm:$0x3] %vm14894_vm0, %v6126_v45  ;;  %v13101_v15 = vld [vmem:[%s17550_s1 + $0x934] ss:$8 sps:$4 sm:$0xff]   ;;  %v13104_v44 = vld [vmem:[%s17550_s1 + $0x824] ss:$8 sps:$4 sm:$0xff]  }
 0x3e6   :  { %v13107_v45 = vld [vmem:[%s17550_s1 + $0x924] ss:$8 sps:$4 sm:$0xff]  }
 0x3e7   :  { %8853 = vmatpush2.bf16.msra.mxu0 %v13024_v46  ;;  %v13102_v46 = vld [vmem:[%s17550_s1 + $0x820] ss:$8 sps:$4 sm:$0xff]  }
 0x3e8   :  { %8896 = vmatpush2.bf16.msra.mxu1 %v13027_v47  ;;  %8854 = vmatprep.subr.bf16.mxu0 %v13032_v60  ;;  %v13105_v47 = vld [vmem:[%s17550_s1 + $0x920] ss:$8 sps:$4 sm:$0xff]   ;;  %v13110_v60 = vld [vmem:[%s17550_s1 + $0x814] ss:$8 sps:$4 sm:$0xff]  }
 0x3e9   :  { %8897 = vmatprep.subr.bf16.mxu1 %v13035_v6  ;;  %v13113_v6 = vld [vmem:[%s17550_s1 + $0x914] ss:$8 sps:$4 sm:$0xff]  }
 0x3eb   :  { %8855 = vmatpush2.bf16.msra.mxu0 %v13030_v40  ;;  %v13108_v40 = vld [vmem:[%s17550_s1 + $0x810] ss:$8 sps:$4 sm:$0xff]  }
 0x3ec   :  { %8898 = vmatpush2.bf16.msra.mxu1 %v13033_v56  ;;  %8856 = vmatprep.subr.bf16.mxu0 %v13038_v62  ;;  %v13111_v56 = vld [vmem:[%s17550_s1 + $0x910] ss:$8 sps:$4 sm:$0xff]   ;;  %v13116_v62 = vld [vmem:[%s17550_s1 + $0x804] ss:$8 sps:$4 sm:$0xff]  }
 0x3ed   :  { %8899 = vmatprep.subr.bf16.mxu1 %v13041_v17  ;;  %v13119_v17 = vld [vmem:[%s17550_s1 + $0x904] ss:$8 sps:$4 sm:$0xff]  }
 0x3ef   :  { %8857 = vmatpush2.bf16.msra.mxu0 %v13036_v48  ;;  %v13114_v48 = vld [vmem:[%s17550_s1 + $0x800] ss:$8 sps:$4 sm:$0xff]  }
 0x3f0   :  { %8900 = vmatpush2.bf16.msra.mxu1 %v13039_v51  ;;  %8858 = vmatprep.subr.bf16.mxu0 %v13044_v52  ;;  %v13117_v51 = vld [vmem:[%s17550_s1 + $0x900] ss:$8 sps:$4 sm:$0xff]   ;;  %v13122_v52 = vld [vmem:[%s17550_s1 + $0x8f4] ss:$8 sps:$4 sm:$0xff]  }
 0x3f1   :  { %8901 = vmatprep.subr.bf16.mxu1 %v13047_v57  ;;  %v13125_v57 = vld [vmem:[%s17550_s1 + $0x9f4] ss:$8 sps:$4 sm:$0xff]  }
 0x3f3   :  { %8859 = vmatpush2.bf16.msra.mxu0 %v13042_v63  ;;  %v13120_v63 = vld [vmem:[%s17550_s1 + $0x8f0] ss:$8 sps:$4 sm:$0xff]  }
 0x3f4   :  { %8902 = vmatpush2.bf16.msra.mxu1 %v13045_v18  ;;  %8860 = vmatprep.subr.bf16.mxu0 %v13050_v16  ;;  %v13123_v18 = vld [vmem:[%s17550_s1 + $0x9f0] ss:$8 sps:$4 sm:$0xff]   ;;  %v13128_v16 = vld [vmem:[%s17550_s1 + $0x8e4] ss:$8 sps:$4 sm:$0xff]  }
 0x3f5   :  { %8903 = vmatprep.subr.bf16.mxu1 %v13053_v25  ;;  %v13131_v25 = vld [vmem:[%s17550_s1 + $0x9e4] ss:$8 sps:$4 sm:$0xff]  }
 0x3f7   :  { %8861 = vmatpush2.bf16.msra.mxu0 %v13048_v28  ;;  %v13126_v28 = vld [vmem:[%s17550_s1 + $0x8e0] ss:$8 sps:$4 sm:$0xff]  }
 0x3f8   :  { %8904 = vmatpush2.bf16.msra.mxu1 %v13051_v31  ;;  %8862 = vmatprep.subr.bf16.mxu0 %v13056_v38  ;;  %v13129_v31 = vld [vmem:[%s17550_s1 + $0x9e0] ss:$8 sps:$4 sm:$0xff]   ;;  %v13134_v38 = vld [vmem:[%s17550_s1 + $0x8d4] ss:$8 sps:$4 sm:$0xff]  }
 0x3f9   :  { %8905 = vmatprep.subr.bf16.mxu1 %v13059_v35  ;;  %v13137_v35 = vld [vmem:[%s17550_s1 + $0x9d4] ss:$8 sps:$4 sm:$0xff]  }
 0x3fb   :  { %8863 = vmatpush2.bf16.msra.mxu0 %v13054_v3  ;;  %v13132_v3 = vld [vmem:[%s17550_s1 + $0x8d0] ss:$8 sps:$4 sm:$0xff]  }
 0x3fc   :  { %8906 = vmatpush2.bf16.msra.mxu1 %v13057_v59  ;;  %8864 = vmatprep.subr.bf16.mxu0 %v13062_v33  ;;  %v13135_v59 = vld [vmem:[%s17550_s1 + $0x9d0] ss:$8 sps:$4 sm:$0xff]   ;;  %v13140_v33 = vld [vmem:[%s17550_s1 + $0x8c4] ss:$8 sps:$4 sm:$0xff]  }
 0x3fd   :  { %8907 = vmatprep.subr.bf16.mxu1 %v13065_v34  ;;  %v13143_v34 = vld [vmem:[%s17550_s1 + $0x9c4] ss:$8 sps:$4 sm:$0xff]  }
 0x3ff   :  { %8865 = vmatpush2.bf16.msra.mxu0 %v13060_v39  ;;  %v13138_v39 = vld [vmem:[%s17550_s1 + $0x8c0] ss:$8 sps:$4 sm:$0xff]  }
 0x400   :  { %8908 = vmatpush2.bf16.msra.mxu1 %v13063_v8  ;;  %8920 = vmatprep.subr.bf16.mxu0 %v13074_v53  ;;  %v13141_v8 = vld [vmem:[%s17550_s1 + $0x9c0] ss:$8 sps:$4 sm:$0xff]   ;;  %v13146_v53 = vld [vmem:[%s17550_s1 + $0x8b4] ss:$8 sps:$4 sm:$0xff]  }
 0x401   :  { %8963 = vmatprep.subr.bf16.mxu1 %v13077_v1  ;;  %v13149_v1 = vld [vmem:[%s17550_s1 + $0x9b4] ss:$8 sps:$4 sm:$0xff]  }
 0x402   :  { %8867 = vmatmul.mubr.bf16.vlgmr.msra.gmra.mxu0 %v13066_v41  ;;  %v13144_v41 = vld [vmem:[%s17550_s1 + $0x8b0] ss:$8 sps:$4 sm:$0xff]  }
 0x403   :  { %8910 = vmatmul.mubr.bf16.vlgmr.msra.gmra.mxu1 %v13069_v9  ;;  %8921 = vmatpush1.bf16.msra.mxu0 %v13072_v12  ;;  %v13147_v9 = vld [vmem:[%s17550_s1 + $0x9b0] ss:$8 sps:$4 sm:$0xff]   ;;  %v13152_v12 = vld [vmem:[%s17550_s1 + $0x8a4] ss:$8 sps:$4 sm:$0xff]  }
 0x404   :  { %8964 = vmatpush1.bf16.msra.mxu1 %v13075_v49  ;;  %8922 = vmatprep.subr.bf16.mxu0 %v13080_v4  ;;  %v13155_v49 = vld [vmem:[%s17550_s1 + $0x9a4] ss:$8 sps:$4 sm:$0xff]   ;;  %v13150_v4 = vld [vmem:[%s17550_s1 + $0x8a0] ss:$8 sps:$4 sm:$0xff]  }
 0x405   :  { %8965 = vmatprep.subr.bf16.mxu1 %v13083_v10  ;;  %8952 = vmatprep.mubr.bf16.mxu0 %v13170_v13  ;;  %v13153_v10 = vld [vmem:[%s17550_s1 + $0x9a0] ss:$8 sps:$4 sm:$0xff]   ;;  %v13158_v13 = vld [vmem:[%s17550_s1 + $0x894] ss:$8 sps:$4 sm:$0xff]  }
 0x406   :  { %8995 = vmatprep.mubr.bf16.mxu1 %v13173_v54  ;;  %v13161_v54 = vld [vmem:[%s17550_s1 + $0x994] ss:$8 sps:$4 sm:$0xff]  }
 0x407   :  { %8923 = vmatpush1.bf16.msra.mxu0 %v13078_v2  ;;  %v13156_v2 = vld [vmem:[%s17550_s1 + $0x890] ss:$8 sps:$4 sm:$0xff]  }
 0x408   :  { %8966 = vmatpush1.bf16.msra.mxu1 %v13081_v42  ;;  %8924 = vmatprep.subr.bf16.mxu0 %v13086_v50  ;;  %v13159_v42 = vld [vmem:[%s17550_s1 + $0x990] ss:$8 sps:$4 sm:$0xff]   ;;  %v13164_v50 = vld [vmem:[%s17550_s1 + $0x884] ss:$8 sps:$4 sm:$0xff]  }
 0x409   :  { %8967 = vmatprep.subr.bf16.mxu1 %v13089_v14  ;;  %v13167_v14 = vld [vmem:[%s17550_s1 + $0x984] ss:$8 sps:$4 sm:$0xff]  }
 0x40b   :  { %8925 = vmatpush1.bf16.msra.mxu0 %v13084_v20  ;;  %v13162_v20 = vld [vmem:[%s17550_s1 + $0x880] ss:$8 sps:$4 sm:$0xff]  }
 0x40c   :  { %8968 = vmatpush1.bf16.msra.mxu1 %v13087_v29  ;;  %8926 = vmatprep.subr.bf16.mxu0 %v13092_v30  ;;  %v13165_v29 = vld [vmem:[%s17550_s1 + $0x980] ss:$8 sps:$4 sm:$0xff]   ;;  %v13176_v30 = vld [vmem:[%s17550_s1 + $0xa74] ss:$8 sps:$4 sm:$0xff]  }
 0x40d   :  { %8969 = vmatprep.subr.bf16.mxu1 %v13095_v21  ;;  %v13179_v21 = vld [vmem:[%s17550_s1 + $0xb74] ss:$8 sps:$4 sm:$0xff]  }
 0x40f   :  { %8927 = vmatpush1.bf16.msra.mxu0 %v13090_v32  ;;  %v13168_v32 = vld [vmem:[%s17551_s0 + $0x70] ss:$144 sps:$4 sm:$0xff]  }
 0x410   :  { %8970 = vmatpush1.bf16.msra.mxu1 %v13093_v36  ;;  %8928 = vmatprep.subr.bf16.mxu0 %v13098_v55  ;;  %v13171_v36 = vld [vmem:[%s17551_s0 + $0x78] ss:$144 sps:$4 sm:$0xff]  }
 0x411   :  { %8971 = vmatprep.subr.bf16.mxu1 %v13101_v15  ;;  %v13174_v55 = vld [vmem:[%s17550_s1 + $0xa70] ss:$8 sps:$4 sm:$0xff]  }
 0x412   :  { %v13177_v15 = vld [vmem:[%s17550_s1 + $0xb70] ss:$8 sps:$4 sm:$0xff]  }
 0x413   :  { %8929 = vmatpush1.bf16.msra.mxu0 %v13096_v24  ;;  %v13182_v24 = vld [vmem:[%s17550_s1 + $0xa64] ss:$8 sps:$4 sm:$0xff]  }
 0x414   :  { %8972 = vmatpush1.bf16.msra.mxu1 %v13099_v37  ;;  %8930 = vmatprep.subr.bf16.mxu0 %v13104_v44  ;;  %v13185_v37 = vld [vmem:[%s17550_s1 + $0xb64] ss:$8 sps:$4 sm:$0xff]  }
 0x415   :  { %8973 = vmatprep.subr.bf16.mxu1 %v13107_v45  ;;  %v13272_v44 = vld [vmem:[%s17551_s0 + $0x84] ss:$144 sps:$4 sm:$0xff]   ;;  %v13275_v45 = vld [vmem:[%s17551_s0 + $0x8c] ss:$144 sps:$4 sm:$0xff]  }
 0x417   :  { %8931 = vmatpush1.bf16.msra.mxu0 %v13102_v46  ;;  %v13180_v46 = vld [vmem:[%s17550_s1 + $0xa60] ss:$8 sps:$4 sm:$0xff]  }
 0x418   :  { %8974 = vmatpush1.bf16.msra.mxu1 %v13105_v47  ;;  %8932 = vmatprep.subr.bf16.mxu0 %v13110_v60  ;;  %v13183_v47 = vld [vmem:[%s17550_s1 + $0xb60] ss:$8 sps:$4 sm:$0xff]   ;;  %v13188_v60 = vld [vmem:[%s17550_s1 + $0xa54] ss:$8 sps:$4 sm:$0xff]  }
 0x419   :  { %8975 = vmatprep.subr.bf16.mxu1 %v13113_v6  ;;  %v13191_v6 = vld [vmem:[%s17550_s1 + $0xb54] ss:$8 sps:$4 sm:$0xff]  }
 0x41b   :  { %8933 = vmatpush1.bf16.msra.mxu0 %v13108_v40  ;;  %v13186_v40 = vld [vmem:[%s17550_s1 + $0xa50] ss:$8 sps:$4 sm:$0xff]  }
 0x41c   :  { %8976 = vmatpush1.bf16.msra.mxu1 %v13111_v56  ;;  %8934 = vmatprep.subr.bf16.mxu0 %v13116_v62  ;;  %v13189_v56 = vld [vmem:[%s17550_s1 + $0xb50] ss:$8 sps:$4 sm:$0xff]   ;;  %v13194_v62 = vld [vmem:[%s17550_s1 + $0xa44] ss:$8 sps:$4 sm:$0xff]  }
 0x41d   :  { %8977 = vmatprep.subr.bf16.mxu1 %v13119_v17  ;;  %v13197_v17 = vld [vmem:[%s17550_s1 + $0xb44] ss:$8 sps:$4 sm:$0xff]  }
 0x41f   :  { %8935 = vmatpush1.bf16.msra.mxu0 %v13114_v48  ;;  %v13192_v48 = vld [vmem:[%s17550_s1 + $0xa40] ss:$8 sps:$4 sm:$0xff]  }
 0x420   :  { %8978 = vmatpush1.bf16.msra.mxu1 %v13117_v51  ;;  %8936 = vmatprep.subr.bf16.mxu0 %v13122_v52  ;;  %v13195_v51 = vld [vmem:[%s17550_s1 + $0xb40] ss:$8 sps:$4 sm:$0xff]   ;;  %v13200_v52 = vld [vmem:[%s17550_s1 + $0xa34] ss:$8 sps:$4 sm:$0xff]  }
 0x421   :  { %8979 = vmatprep.subr.bf16.mxu1 %v13125_v57  ;;  %v13203_v57 = vld [vmem:[%s17550_s1 + $0xb34] ss:$8 sps:$4 sm:$0xff]  }
 0x423   :  { %8937 = vmatpush2.bf16.msra.mxu0 %v13120_v63  ;;  %v13198_v63 = vld [vmem:[%s17550_s1 + $0xa30] ss:$8 sps:$4 sm:$0xff]  }
 0x424   :  { %8980 = vmatpush2.bf16.msra.mxu1 %v13123_v18  ;;  %8938 = vmatprep.subr.bf16.mxu0 %v13128_v16  ;;  %v13201_v18 = vld [vmem:[%s17550_s1 + $0xb30] ss:$8 sps:$4 sm:$0xff]   ;;  %v13206_v16 = vld [vmem:[%s17550_s1 + $0xa24] ss:$8 sps:$4 sm:$0xff]  }
 0x425   :  { %8981 = vmatprep.subr.bf16.mxu1 %v13131_v25  ;;  %v13209_v25 = vld [vmem:[%s17550_s1 + $0xb24] ss:$8 sps:$4 sm:$0xff]  }
 0x427   :  { %8939 = vmatpush2.bf16.msra.mxu0 %v13126_v28  ;;  %v13204_v28 = vld [vmem:[%s17550_s1 + $0xa20] ss:$8 sps:$4 sm:$0xff]  }
 0x428   :  { %8982 = vmatpush2.bf16.msra.mxu1 %v13129_v31  ;;  %8940 = vmatprep.subr.bf16.mxu0 %v13134_v38  ;;  %v13207_v31 = vld [vmem:[%s17550_s1 + $0xb20] ss:$8 sps:$4 sm:$0xff]   ;;  %v13212_v38 = vld [vmem:[%s17550_s1 + $0xa14] ss:$8 sps:$4 sm:$0xff]  }
 0x429   :  { %8983 = vmatprep.subr.bf16.mxu1 %v13137_v35  ;;  %v13215_v35 = vld [vmem:[%s17550_s1 + $0xb14] ss:$8 sps:$4 sm:$0xff]  }
 0x42b   :  { %8941 = vmatpush2.bf16.msra.mxu0 %v13132_v3  ;;  %v13210_v3 = vld [vmem:[%s17550_s1 + $0xa10] ss:$8 sps:$4 sm:$0xff]  }
 0x42c   :  { %8984 = vmatpush2.bf16.msra.mxu1 %v13135_v59  ;;  %8942 = vmatprep.subr.bf16.mxu0 %v13140_v33  ;;  %v13213_v59 = vld [vmem:[%s17550_s1 + $0xb10] ss:$8 sps:$4 sm:$0xff]   ;;  %v13218_v33 = vld [vmem:[%s17550_s1 + $0xa04] ss:$8 sps:$4 sm:$0xff]  }
 0x42d   :  { %8985 = vmatprep.subr.bf16.mxu1 %v13143_v34  ;;  %v13221_v34 = vld [vmem:[%s17550_s1 + $0xb04] ss:$8 sps:$4 sm:$0xff]  }
 0x42f   :  { %8943 = vmatpush2.bf16.msra.mxu0 %v13138_v39  ;;  %v13216_v39 = vld [vmem:[%s17550_s1 + $0xa00] ss:$8 sps:$4 sm:$0xff]  }
 0x430   :  { %8986 = vmatpush2.bf16.msra.mxu1 %v13141_v8  ;;  %8944 = vmatprep.subr.bf16.mxu0 %v13146_v53  ;;  %v13219_v8 = vld [vmem:[%s17550_s1 + $0xb00] ss:$8 sps:$4 sm:$0xff]   ;;  %v13224_v53 = vld [vmem:[%s17550_s1 + $0xaf4] ss:$8 sps:$4 sm:$0xff]  }
 0x431   :  { %8987 = vmatprep.subr.bf16.mxu1 %v13149_v1  ;;  %v13227_v1 = vld [vmem:[%s17550_s1 + $0xbf4] ss:$8 sps:$4 sm:$0xff]  }
 0x433   :  { %8945 = vmatpush2.bf16.msra.mxu0 %v13144_v41  ;;  %v13222_v41 = vld [vmem:[%s17550_s1 + $0xaf0] ss:$8 sps:$4 sm:$0xff]  }
 0x434   :  { %8988 = vmatpush2.bf16.msra.mxu1 %v13147_v9  ;;  %8946 = vmatprep.subr.bf16.mxu0 %v13152_v12  ;;  %v13225_v9 = vld [vmem:[%s17550_s1 + $0xbf0] ss:$8 sps:$4 sm:$0xff]   ;;  %v13230_v12 = vld [vmem:[%s17550_s1 + $0xae4] ss:$8 sps:$4 sm:$0xff]  }
 0x435   :  { %8989 = vmatprep.subr.bf16.mxu1 %v13155_v49  ;;  %v13233_v49 = vld [vmem:[%s17550_s1 + $0xbe4] ss:$8 sps:$4 sm:$0xff]  }
 0x437   :  { %8947 = vmatpush2.bf16.msra.mxu0 %v13150_v4  ;;  %v13228_v4 = vld [vmem:[%s17550_s1 + $0xae0] ss:$8 sps:$4 sm:$0xff]  }
 0x438   :  { %8990 = vmatpush2.bf16.msra.mxu1 %v13153_v10  ;;  %8948 = vmatprep.subr.bf16.mxu0 %v13158_v13  ;;  %v13231_v10 = vld [vmem:[%s17550_s1 + $0xbe0] ss:$8 sps:$4 sm:$0xff]   ;;  %v13236_v13 = vld [vmem:[%s17550_s1 + $0xad4] ss:$8 sps:$4 sm:$0xff]  }
 0x439   :  { %8991 = vmatprep.subr.bf16.mxu1 %v13161_v54  ;;  %v13239_v54 = vld [vmem:[%s17550_s1 + $0xbd4] ss:$8 sps:$4 sm:$0xff]  }
 0x43b   :  { %8949 = vmatpush2.bf16.msra.mxu0 %v13156_v2  ;;  %v13234_v2 = vld [vmem:[%s17550_s1 + $0xad0] ss:$8 sps:$4 sm:$0xff]  }
 0x43c   :  { %8992 = vmatpush2.bf16.msra.mxu1 %v13159_v42  ;;  %8950 = vmatprep.subr.bf16.mxu0 %v13164_v50  ;;  %v13237_v42 = vld [vmem:[%s17550_s1 + $0xbd0] ss:$8 sps:$4 sm:$0xff]   ;;  %v13242_v50 = vld [vmem:[%s17550_s1 + $0xac4] ss:$8 sps:$4 sm:$0xff]  }
 0x43d   :  { %8993 = vmatprep.subr.bf16.mxu1 %v13167_v14  ;;  %v13245_v14 = vld [vmem:[%s17550_s1 + $0xbc4] ss:$8 sps:$4 sm:$0xff]  }
 0x43f   :  { %8951 = vmatpush2.bf16.msra.mxu0 %v13162_v20  ;;  %v13240_v20 = vld [vmem:[%s17550_s1 + $0xac0] ss:$8 sps:$4 sm:$0xff]  }
 0x440   :  { %8994 = vmatpush2.bf16.msra.mxu1 %v13165_v29  ;;  %9006 = vmatprep.subr.bf16.mxu0 %v13176_v30  ;;  %v13243_v29 = vld [vmem:[%s17550_s1 + $0xbc0] ss:$8 sps:$4 sm:$0xff]   ;;  %v13248_v30 = vld [vmem:[%s17550_s1 + $0xab4] ss:$8 sps:$4 sm:$0xff]  }
 0x441   :  { %9049 = vmatprep.subr.bf16.mxu1 %v13179_v21  ;;  %v13251_v21 = vld [vmem:[%s17550_s1 + $0xbb4] ss:$8 sps:$4 sm:$0xff]  }
 0x442   :  { %8953 = vmatmul.mubr.bf16.vlgmr.msra.gmra.mxu0 %v13168_v32  ;;  %v13246_v32 = vld [vmem:[%s17550_s1 + $0xab0] ss:$8 sps:$4 sm:$0xff]  }
 0x443   :  { %8996 = vmatmul.mubr.bf16.vlgmr.msra.gmra.mxu1 %v13171_v36  ;;  %9007 = vmatpush1.bf16.msra.mxu0 %v13174_v55  ;;  %v13249_v36 = vld [vmem:[%s17550_s1 + $0xbb0] ss:$8 sps:$4 sm:$0xff]   ;;  %v13254_v55 = vld [vmem:[%s17550_s1 + $0xaa4] ss:$8 sps:$4 sm:$0xff]  }
 0x444   :  { %9050 = vmatpush1.bf16.msra.mxu1 %v13177_v15  ;;  %9008 = vmatprep.subr.bf16.mxu0 %v13182_v24  ;;  %v13257_v15 = vld [vmem:[%s17550_s1 + $0xba4] ss:$8 sps:$4 sm:$0xff]   ;;  %v13252_v24 = vld [vmem:[%s17550_s1 + $0xaa0] ss:$8 sps:$4 sm:$0xff]  }
 0x445   :  { %9051 = vmatprep.subr.bf16.mxu1 %v13185_v37  ;;  %9038 = vmatprep.mubr.bf16.mxu0 %v13272_v44  ;;  %v13255_v37 = vld [vmem:[%s17550_s1 + $0xba0] ss:$8 sps:$4 sm:$0xff]   ;;  %v13260_v44 = vld [vmem:[%s17550_s1 + $0xa94] ss:$8 sps:$4 sm:$0xff]  }
 0x446   :  { %9081 = vmatprep.mubr.bf16.mxu1 %v13275_v45  ;;  %v13263_v45 = vld [vmem:[%s17550_s1 + $0xb94] ss:$8 sps:$4 sm:$0xff]  }
 0x447   :  { %9009 = vmatpush1.bf16.msra.mxu0 %v13180_v46  ;;  %v13258_v46 = vld [vmem:[%s17550_s1 + $0xa90] ss:$8 sps:$4 sm:$0xff]  }
 0x448   :  { %9052 = vmatpush1.bf16.msra.mxu1 %v13183_v47  ;;  %9010 = vmatprep.subr.bf16.mxu0 %v13188_v60  ;;  %v13261_v47 = vld [vmem:[%s17550_s1 + $0xb90] ss:$8 sps:$4 sm:$0xff]   ;;  %v13266_v60 = vld [vmem:[%s17550_s1 + $0xa84] ss:$8 sps:$4 sm:$0xff]  }
 0x449   :  { %9053 = vmatprep.subr.bf16.mxu1 %v13191_v6  ;;  %v13269_v6 = vld [vmem:[%s17550_s1 + $0xb84] ss:$8 sps:$4 sm:$0xff]  }
 0x44b   :  { %9011 = vmatpush1.bf16.msra.mxu0 %v13186_v40  ;;  %v13264_v40 = vld [vmem:[%s17550_s1 + $0xa80] ss:$8 sps:$4 sm:$0xff]  }
 0x44c   :  { %9054 = vmatpush1.bf16.msra.mxu1 %v13189_v56  ;;  %9012 = vmatprep.subr.bf16.mxu0 %v13194_v62  ;;  %v13267_v56 = vld [vmem:[%s17550_s1 + $0xb80] ss:$8 sps:$4 sm:$0xff]  }
 0x44d   :  { %9055 = vmatprep.subr.bf16.mxu1 %v13197_v17  ;;  %v13270_v62 = vld [vmem:[%s17551_s0 + $0x80] ss:$144 sps:$4 sm:$0xff]   ;;  %v13273_v17 = vld [vmem:[%s17551_s0 + $0x88] ss:$144 sps:$4 sm:$0xff]  }
 0x44f   :  { %9013 = vmatpush1.bf16.msra.mxu0 %v13192_v48  ;;  %v13276_v48 = vld [vmem:[%s17552_s2 + $0xf8] sm:$0xff]  }
 0x450   :  { %9056 = vmatpush1.bf16.msra.mxu1 %v13195_v51  ;;  %9014 = vmatprep.subr.bf16.mxu0 %v13200_v52  ;;  %v13277_v51 = vld [vmem:[%s17552_s2 + $0xb8] sm:$0xff]  }
 0x451   :  { %9057 = vmatprep.subr.bf16.mxu1 %v13203_v57  ;;  %v13278_v52 = vld [vmem:[%s17552_s2 + $0x78] sm:$0xff]  }
 0x452   :  { %v13279_v57 = vld [vmem:[%s17552_s2 + $0x38] sm:$0xff]  }
 0x453   :  { %9015 = vmatpush1.bf16.msra.mxu0 %v13198_v63  ;;  %v13280_v63 = vld [vmem:[%s17552_s2 + $0xf0] sm:$0xff]  }
 0x454   :  { %9058 = vmatpush1.bf16.msra.mxu1 %v13201_v18  ;;  %9016 = vmatprep.subr.bf16.mxu0 %v13206_v16  ;;  %v13281_v18 = vld [vmem:[%s17552_s2 + $0xb0] sm:$0xff]  }
 0x455   :  { %9059 = vmatprep.subr.bf16.mxu1 %v13209_v25  ;;  %v13282_v16 = vld [vmem:[%s17552_s2 + $0x70] sm:$0xff]  }
 0x456   :  { %v13283_v25 = vld [vmem:[%s17552_s2 + $0x30] sm:$0xff]  }
 0x457   :  { %9017 = vmatpush1.bf16.msra.mxu0 %v13204_v28  ;;  %v13284_v28 = vld [vmem:[%s17552_s2 + $0xe8] sm:$0xff]  }
 0x458   :  { %9060 = vmatpush1.bf16.msra.mxu1 %v13207_v31  ;;  %9018 = vmatprep.subr.bf16.mxu0 %v13212_v38  ;;  %v13285_v31 = vld [vmem:[%s17552_s2 + $0xa8] sm:$0xff]  }
 0x459   :  { %9061 = vmatprep.subr.bf16.mxu1 %v13215_v35  ;;  %v13286_v38 = vld [vmem:[%s17552_s2 + $0x68] sm:$0xff]  }
 0x45a   :  { %v13287_v35 = vld [vmem:[%s17552_s2 + $0x28] sm:$0xff]  }
 0x45b   :  { %9019 = vmatpush1.bf16.msra.mxu0 %v13210_v3  ;;  %v17312_v3 = vpop.f32.mrf.mxu0 }
 0x45c   :  { %9062 = vmatpush1.bf16.msra.mxu1 %v13213_v59  ;;  %9020 = vmatprep.subr.bf16.mxu0 %v13218_v33  ;;  %v17314_v59 = vpop.f32.mrf.mxu1  ;;  %v13288_v33 = vld [vmem:[%s17552_s2 + $0xe0] sm:$0xff]  }
 0x45d   :  { %9063 = vmatprep.subr.bf16.mxu1 %v13221_v34  ;;  %v13289_v34 = vld [vmem:[%s17552_s2 + $0xa0] sm:$0xff]  }
 0x45f   :  { %9021 = vmatpush1.bf16.msra.mxu0 %v13216_v39  ;;  %v13290_v39 = vld [vmem:[%s17552_s2 + $0x60] sm:$0xff]  }
 0x460   :  { %9064 = vmatpush1.bf16.msra.mxu1 %v13219_v8  ;;  %9022 = vmatprep.subr.bf16.mxu0 %v13224_v53  ;;  %v13291_v8 = vld [vmem:[%s17552_s2 + $0x20] sm:$0xff]   ;;  %v17328_v53 = vpop.f32.mrf.mxu0 }
 0x461   :  { %9065 = vmatprep.subr.bf16.mxu1 %v13227_v1  ;;  %v8655_v1 = vpop.f32.mrf.mxu1 }
 0x463   :  { %9023 = vmatpush2.bf16.msra.mxu0 %v13222_v41  ;;  %v13292_v41 = vld [vmem:[%s17552_s2 + $0xd8] sm:$0xff]  }
 0x464   :  { %9066 = vmatpush2.bf16.msra.mxu1 %v13225_v9  ;;  %9024 = vmatprep.subr.bf16.mxu0 %v13230_v12  ;;  %v13293_v9 = vld [vmem:[%s17552_s2 + $0x98] sm:$0xff]  }
 0x465   :  { %9067 = vmatprep.subr.bf16.mxu1 %v13233_v49  ;;  %v13294_v12 = vld [vmem:[%s17552_s2 + $0x58] sm:$0xff]  }
 0x466   :  { %v13295_v49 = vld [vmem:[%s17552_s2 + $0x18] sm:$0xff]  }
 0x467   :  { %9025 = vmatpush2.bf16.msra.mxu0 %v13228_v4  ;;  %v8614_v4 = vpop.f32.mrf.mxu0 }
 0x468   :  { %9068 = vmatpush2.bf16.msra.mxu1 %v13231_v10  ;;  %9026 = vmatprep.subr.bf16.mxu0 %v13236_v13  ;;  %v8657_v10 = vpop.f32.mrf.mxu1  ;;  %v13296_v13 = vld [vmem:[%s17552_s2 + $0xd0] sm:$0xff]  }
 0x469   :  { %9069 = vmatprep.subr.bf16.mxu1 %v13239_v54  ;;  %v13297_v54 = vld [vmem:[%s17552_s2 + $0x90] sm:$0xff]  }
 0x46b   :  { %9027 = vmatpush2.bf16.msra.mxu0 %v13234_v2  ;;  %v13298_v2 = vld [vmem:[%s17552_s2 + $0x50] sm:$0xff]  }
 0x46c   :  { %9070 = vmatpush2.bf16.msra.mxu1 %v13237_v42  ;;  %9028 = vmatprep.subr.bf16.mxu0 %v13242_v50  ;;  %v13299_v42 = vld [vmem:[%s17552_s2 + $0x10] sm:$0xff]   ;;  %v8616_v50 = vpop.f32.mrf.mxu0 }
 0x46d   :  { %9071 = vmatprep.subr.bf16.mxu1 %v13245_v14  ;;  %v8659_v14 = vpop.f32.mrf.mxu1 }
 0x46f   :  { %9029 = vmatpush2.bf16.msra.mxu0 %v13240_v20  ;;  %v13300_v20 = vld [vmem:[%s17552_s2 + $0xc8] sm:$0xff]  }
 0x470   :  { %9072 = vmatpush2.bf16.msra.mxu1 %v13243_v29  ;;  %9030 = vmatprep.subr.bf16.mxu0 %v13248_v30  ;;  %v13301_v29 = vld [vmem:[%s17552_s2 + $0x88] sm:$0xff]   ;;  %v8696_v30 = vpop.f32.mrf.mxu0 }
 0x471   :  { %9073 = vmatprep.subr.bf16.mxu1 %v13251_v21  ;;  %v8739_v21 = vpop.f32.mrf.mxu1 }
 0x473   :  { %9031 = vmatpush2.bf16.msra.mxu0 %v13246_v32  ;;  %v13302_v32 = vld [vmem:[%s17552_s2 + $0x48] sm:$0xff]  }
 0x474   :  { %9074 = vmatpush2.bf16.msra.mxu1 %v13249_v36  ;;  %9032 = vmatprep.subr.bf16.mxu0 %v13254_v55  ;;  %v13303_v36 = vld [vmem:[%s17552_s2 + $0x8] sm:$0xff]   ;;  %v13304_v55 = vld [vmem:[%s17552_s2 + $0xc0] sm:$0xff]  }
 0x475   :  { %9075 = vmatprep.subr.bf16.mxu1 %v13257_v15  ;;  %v13305_v15 = vld [vmem:[%s17552_s2 + $0x80] sm:$0xff]  }
 0x477   :  { %9033 = vmatpush2.bf16.msra.mxu0 %v13252_v24  ;;  %v8698_v24 = vpop.f32.mrf.mxu0 }
 0x478   :  { %9076 = vmatpush2.bf16.msra.mxu1 %v13255_v37  ;;  %9034 = vmatprep.subr.bf16.mxu0 %v13260_v44  ;;  %v8741_v37 = vpop.f32.mrf.mxu1  ;;  %v13306_v44 = vld [vmem:[%s17552_s2 + $0x40] sm:$0xff]  }
 0x479   :  { %9077 = vmatprep.subr.bf16.mxu1 %v13263_v45  ;;  %v13307_v45 = vld [vmem:[%s17552_s2] sm:$0xff]  }
 0x47b   :  { %9035 = vmatpush2.bf16.msra.mxu0 %v13258_v46  ;;  %v13308_v46 = vld [vmem:[%s17552_s2 + $0x178] sm:$0xff]  }
 0x47c   :  { %9078 = vmatpush2.bf16.msra.mxu1 %v13261_v47  ;;  %9036 = vmatprep.subr.bf16.mxu0 %v13266_v60  ;;  %v8700_v47 = vpop.f32.mrf.mxu0  ;;  %v8743_v60 = vpop.f32.mrf.mxu1 }
 0x47d   :  { %9079 = vmatprep.subr.bf16.mxu1 %v13269_v6 }
 0x47e   :  { %v8702_v6 = vpop.f32.mrf.mxu0 }
 0x47f   :  { %9037 = vmatpush2.bf16.msra.mxu0 %v13264_v40  ;;  %v8745_v40 = vpop.f32.mrf.mxu1 }
 0x480   :  { %9080 = vmatpush2.bf16.msra.mxu1 %v13267_v56  ;;  %11330 = vmatprep.subr.bf16.mxu0 %v13276_v48 }
 0x481   :  { %11352 = vmatprep.subr.bf16.mxu1 %v13278_v52 }
 0x482   :  { %9039 = vmatmul.mubr.bf16.vlgmr.msra.gmra.mxu0 %v13270_v62  ;;  %v8782_v56 = vpop.f32.mrf.mxu0 }
 0x483   :  { %9082 = vmatmul.mubr.bf16.vlgmr.msra.gmra.mxu1 %v13273_v17  ;;  %11331 = vmatpush3.bf16.msra.mxu0 %v13277_v51  ;;  %v8825_v62 = vpop.f32.mrf.mxu1 }
 0x484   :  { %11353 = vmatpush3.bf16.msra.mxu1 %v13279_v57  ;;  %11332 = vmatprep.subr.bf16.mxu0 %v13280_v63  ;;  %v8784_v17 = vpop.f32.mrf.mxu0 }
 0x485   :  { %11354 = vmatprep.subr.bf16.mxu1 %v13282_v16  ;;  %v8827_v48 = vpop.f32.mrf.mxu1 }
 0x486   :  { %v8786_v51 = vpop.f32.mrf.mxu0 }
 0x487   :  { %11333 = vmatpush3.bf16.msra.mxu0 %v13281_v18  ;;  %v8829_v52 = vpop.f32.mrf.mxu1 }
 0x488   :  { %11355 = vmatpush3.bf16.msra.mxu1 %v13283_v25  ;;  %11334 = vmatprep.subr.bf16.mxu0 %v13284_v28  ;;  %v8788_v57 = vpop.f32.mrf.mxu0  ;;  %v8654_v25 = vadd.f32 %v17314_v59, %v17312_v3 }
 0x489   :  { %11356 = vmatprep.subr.bf16.mxu1 %v13286_v38  ;;  %v8831_v63 = vpop.f32.mrf.mxu1  ;;  %v8656_v38 = vadd.f32 %v8655_v1, %v17328_v53 }
 0x48b   :  { %11335 = vmatpush3.bf16.msra.mxu0 %v13285_v31 }
 0x48c   :  { %11357 = vmatpush3.bf16.msra.mxu1 %v13287_v35  ;;  %11336 = vmatprep.subr.bf16.mxu0 %v13288_v33  ;;  %v8697_v35 = vadd.f32 %v8696_v30, %v8654_v25  ;;  %v8658_v33 = vadd.f32 %v8657_v10, %v8614_v4 }
 0x48d   :  { %11358 = vmatprep.subr.bf16.mxu1 %v13290_v39 }
 0x48f   :  { %11337 = vmatpush3.bf16.msra.mxu0 %v13289_v34  ;;  %v8699_v34 = vadd.f32 %v8698_v24, %v8656_v38 }
 0x490   :  { %11359 = vmatpush3.bf16.msra.mxu1 %v13291_v8  ;;  %11338 = vmatprep.subr.bf16.mxu0 %v13292_v41  ;;  %v8660_v41 = vadd.f32 %v8659_v14, %v8616_v50 }
 0x491   :  { %11360 = vmatprep.subr.bf16.mxu1 %v13294_v12  ;;  %v8701_v12 = vadd.f32 %v8700_v47, %v8658_v33 }
 0x493   :  { %11339 = vmatpush3.bf16.msra.mxu0 %v13293_v9  ;;  %v8740_v9 = vadd.f32 %v8739_v21, %v8697_v35 }
 0x494   :  { %11361 = vmatpush3.bf16.msra.mxu1 %v13295_v49  ;;  %11340 = vmatprep.subr.bf16.mxu0 %v13296_v13  ;;  %v8742_v49 = vadd.f32 %v8741_v37, %v8699_v34  ;;  %v8703_v13 = vadd.f32 %v8702_v6, %v8660_v41 }
 0x495   :  { %11362 = vmatprep.subr.bf16.mxu1 %v13298_v2 }
 0x497   :  { %11341 = vmatpush3.bf16.msra.mxu0 %v13297_v54  ;;  %v8783_v54 = vadd.f32 %v8782_v56, %v8740_v9 }
 0x498   :  { %11363 = vmatpush3.bf16.msra.mxu1 %v13299_v42  ;;  %11342 = vmatprep.subr.bf16.mxu0 %v13300_v20  ;;  %v8744_v20 = vadd.f32 %v8743_v60, %v8701_v12 }
 0x499   :  { %11364 = vmatprep.subr.bf16.mxu1 %v13302_v32  ;;  %v8746_v32 = vadd.f32 %v8745_v40, %v8703_v13 }
 0x49a   :  { %v8787_v53 = vadd.f32 %v8786_v51, %v8744_v20 }
 0x49b   :  { %11343 = vmatpush3.bf16.msra.mxu0 %v13301_v29  ;;  %v8785_v29 = vadd.f32 %v8784_v17, %v8742_v49  ;;  %v8789_v4 = vadd.f32 %v8788_v57, %v8746_v32 }
 0x49c   :  { %11365 = vmatpush3.bf16.msra.mxu1 %v13303_v36  ;;  %11344 = vmatprep.subr.bf16.mxu0 %v13304_v55  ;;  %v8826_v36 = vadd.f32 %v8825_v62, %v8783_v54  ;;  %v8830_v50 = vadd.f32 %v8829_v52, %v8787_v53 }
 0x49d   :  { %11366 = vmatprep.subr.bf16.mxu1 %v13306_v44  ;;  %v8828_v1 = vadd.f32 %v8827_v48, %v8785_v29  ;;  %v8832_v21 = vadd.f32 %v8831_v63, %v8789_v4 }
 0x49f   :  { %11345 = vmatpush3.bf16.msra.mxu0 %v13305_v15 }
 0x4a0   :  { %11367 = vmatpush3.bf16.msra.mxu1 %v13307_v45  ;;  %11374 = vmatprep.subr.bf16.mxu0 %v13308_v46 }
 0x4c2   :  { %v8868_v18 = vpop.f32.mrf.mxu0 }
 0x4c3   :  { %v8911_v16 = vpop.f32.mrf.mxu1  ;;  %v8869_v10 = vadd.f32 %v8868_v18, %v8826_v36 }
 0x4c4   :  { %v8870_v28 = vpop.f32.mrf.mxu0 }
 0x4c5   :  { %v8913_v31 = vpop.f32.mrf.mxu1  ;;  %v8871_v14 = vadd.f32 %v8870_v28, %v8828_v1  ;;  %v8912_v15 = vadd.f32 %v8911_v16, %v8869_v10 }
 0x4c6   :  { %v8872_v39 = vpop.f32.mrf.mxu0 }
 0x4c7   :  { %v8915_v8 = vpop.f32.mrf.mxu1  ;;  %v8873_v24 = vadd.f32 %v8872_v39, %v8830_v50  ;;  %v8914_v45 = vadd.f32 %v8913_v31, %v8871_v14 }
 0x4c8   :  { %v8874_v2 = vpop.f32.mrf.mxu0 }
 0x4c9   :  { %v8917_v42 = vpop.f32.mrf.mxu1  ;;  %v8875_v46 = vadd.f32 %v8874_v2, %v8832_v21  ;;  %v8916_v60 = vadd.f32 %v8915_v8, %v8873_v24 }
 0x4cb   :  { %v8918_v62 = vadd.f32 %v8917_v42, %v8875_v46 }
 0x502   :  { %v8954_v3 = vpop.f32.mrf.mxu0 }
 0x503   :  { %v8997_v59 = vpop.f32.mrf.mxu1  ;;  %v8955_v47 = vadd.f32 %v8954_v3, %v8912_v15 }
 0x504   :  { %v8956_v30 = vpop.f32.mrf.mxu0 }
 0x505   :  { %v8999_v55 = vpop.f32.mrf.mxu1  ;;  %v8957_v6 = vadd.f32 %v8956_v30, %v8914_v45  ;;  %v8998_v17 = vadd.f32 %v8997_v59, %v8955_v47 }
 0x506   :  { %v8958_v37 = vpop.f32.mrf.mxu0 }
 0x507   :  { %v9001_v44 = vpop.f32.mrf.mxu1  ;;  %v8959_v48 = vadd.f32 %v8958_v37, %v8916_v60  ;;  %v9000_v18 = vadd.f32 %v8999_v55, %v8957_v6 }
 0x508   :  { %v8960_v40 = vpop.f32.mrf.mxu0 }
 0x509   :  { %v9003_v56 = vpop.f32.mrf.mxu1  ;;  %v8961_v52 = vadd.f32 %v8960_v40, %v8918_v62  ;;  %v9002_v28 = vadd.f32 %v9001_v44, %v8959_v48 }
 0x50b   :  { %v9004_v33 = vadd.f32 %v9003_v56, %v8961_v52 }
 0x542   :  { %v9040_v51 = vpop.f32.mrf.mxu0 }
 0x543   :  { %v9083_v57 = vpop.f32.mrf.mxu1  ;;  %v9041_v25 = vadd.f32 %v9040_v51, %v8998_v17 }
 0x544   :  { %v9042_v63 = vpop.f32.mrf.mxu0 }
 0x545   :  { %v9085_v16 = vpop.f32.mrf.mxu1  ;;  %v9043_v38 = vadd.f32 %v9042_v63, %v9000_v18  ;;  %v17384_v34 = vadd.f32 %v9083_v57, %v9041_v25  ;;  %v9096_v63 = vld [vmem:[#allocation3] sm:$0x3] }
 0x546   :  { %v9044_v35 = vpop.f32.mrf.mxu0 }
 0x547   :  { %v9087_v31 = vpop.f32.mrf.mxu1  ;;  %v9045_v39 = vadd.f32 %v9044_v35, %v9002_v28  ;;  %v17386_v8 = vadd.f32 %v9085_v16, %v9043_v38  ;;  %v9132_v13 = vmul.f32 %v17384_v34, %v17384_v34  ;;  %v9131_v38 = vld [vmem:[#allocation4] sm:$0x3] }
 0x548   :  { %v9046_v41 = vpop.f32.mrf.mxu0 }
 0x549   :  { %v17388_v9 = vadd.f32 %v9087_v31, %v9045_v39  ;;  %v9047_v12 = vadd.f32 %v9046_v41, %v9004_v33  ;;  %v9089_v49 = vpop.f32.mrf.mxu1  ;;  %v9133_v20 = vmul.f32 %v17386_v8, %v17386_v8 }
 0x54b   :  { %v9097_v54 = vadd.f32 %v17388_v9, %v17384_v34  ;;  %v9134_v2 = vmul.f32 %v17388_v9, %v17388_v9  ;;  %v9090_v42 = vadd.f32 %v9089_v49, %v9047_v12 }
 0x54d   :  { %v9098_v29 = vrot.slane %v9097_v54, 4  ;;  %v9136_v3 = vadd.f32 %v9134_v2, %v9132_v13  ;;  %v9104_v59 = vadd.f32 %v9090_v42, %v17386_v8  ;;  %v9135_v32 = vmul.f32 %v9090_v42, %v9090_v42 }
 0x54e   :  { %v9208_v2 = vsub.s32 1, %v15396_v7 }
 0x54f   :  { %v9099_v36 = vadd.f32 %v9098_v29, %v9097_v54  ;;  %v9137_v53 = vrot.slane %v9136_v3, 4  ;;  %v9105_v1 = vrot.slane %v9104_v59, 4  ;;  %v9143_v4 = vadd.f32 %v9135_v32, %v9133_v20 }
 0x550   :  { %v9204_v20 = vsub.s32 0, %v15396_v7 }
 0x551   :  { %v9100_v10 = vrot.slane %v9099_v36, 2  ;;  %v9138_v30 = vadd.f32 %v9137_v53, %v9136_v3  ;;  %v9106_v55 = vadd.f32 %v9105_v1, %v9104_v59  ;;  %v9144_v50 = vrot.slane %v9143_v4, 4  ;;  %v11275_v3 = vld [vmem:[%s17553_s5 + $0x1] ss:$8 sm:$0x3] }
 0x553   :  { %v9101_v14 = vadd.f32 %v9100_v10, %v9099_v36  ;;  %v9139_v21 = vrot.slane %v9138_v30, 2  ;;  %v9107_v15 = vrot.slane %v9106_v55, 2  ;;  %v9145_v24 = vadd.f32 %v9144_v50, %v9143_v4 }
 0x555   :  { %v9102_v37 = vrot.slane %v9101_v14, 1  ;;  %v9140_v44 = vadd.f32 %v9139_v21, %v9138_v30  ;;  %v9108_v45 = vadd.f32 %v9107_v15, %v9106_v55  ;;  %v9146_v46 = vrot.slane %v9145_v24, 2 }
 0x557   :  { %v9141_v47 = vrot.slane %v9140_v44, 1  ;;  %v9109_v60 = vrot.slane %v9108_v45, 1  ;;  %v9147_v6 = vadd.f32 %v9146_v46, %v9145_v24  ;;  %v9103_v40 = vadd.f32 %v9102_v37, %v9101_v14 }
 0x559   :  { %v9110_v56 = vadd.f32 %v9109_v60, %v9108_v45  ;;  %v9148_v62 = vrot.slane %v9147_v6, 1  ;;  %v9142_v17 = vadd.f32 %v9141_v47, %v9140_v44 }
 0x55b   :  { %v9113_v48 = vcombine.low %v9103_v40, %v9110_v56  ;;  %v9149_v51 = vadd.f32 %v9148_v62, %v9147_v6 }
 0x55d   :  { %v9120_v57 = vrot.slane %v9113_v48, %v15417_v19  ;;  %v9152_v18 = vcombine.low %v9142_v17, %v9149_v51  ;;  %v13309_v17 = vld [vmem:[%s17552_s2 + $0x138] sm:$0xff]  }
 0x55f   :  { %v9127_v52 = vrot.slane %v9120_v57, %v15417_v19  ;;  %v9159_v25 = vrot.slane %v9152_v18, %v15417_v19 }
 0x561   :  { %v9129_v16 = vadd.f32 %v9127_v52, %v9096_v63  ;;  %v9166_v28 = vrot.slane %v9159_v25, %v15417_v19  ;;  %v9180_v19 = vld [vmem:[%s17553_s5] ss:$8 sm:$0x3]  ;;  %v13310_v52 = vld [vmem:[%s17552_s2 + $0x170] sm:$0xff]  }
 0x563   :  { %9130 = vst.msk [vmem:[#allocation3] sm:$0x3] %vm14894_vm0, %v9129_v16  ;;  %v9168_v35 = vadd.f32 %v9166_v28, %v9131_v38  ;;  %v13311_v28 = vld [vmem:[%s17552_s2 + $0x130] sm:$0xff]   ;;  %v13312_v38 = vld [vmem:[%s17552_s2 + $0x168] sm:$0xff]  }
 0x565   :  { %9169 = vst.msk [vmem:[#allocation4] sm:$0x3] %vm14894_vm0, %v9168_v35  ;;  %v13313_v35 = vld [vmem:[%s17552_s2 + $0x128] sm:$0xff]  }
 0x56a   :  { %v9173_v31 = vld [vmem:[#allocation3] sm:$0x3] }
 0x56b   :  { %v9174_v33 = vmul.f32 0.027777778, %v9173_v31  ;;  %v13314_v31 = vld [vmem:[%s17552_s2 + $0x160] sm:$0xff]  }
 0x56c   :  { %v9175_v39 = vld [vmem:[#allocation4] sm:$0x3] }
 0x56d   :  { %v9176_v41 = vmul.f32 0.027777778, %v9175_v39  ;;  %v9177_v12 = vmul.f32 %v9174_v33, %v9174_v33  ;;  %v13316_v39 = vld [vmem:[%s17552_s2 + $0x158] sm:$0xff]  }
 0x56f   :  { %v9178_v49 = vsub.f32 %v9176_v41, %v9177_v12  ;;  %v13317_v41 = vld [vmem:[%s17552_s2 + $0x118] sm:$0xff]   ;;  %v13318_v12 = vld [vmem:[%s17552_s2 + $0x150] sm:$0xff]  }
 0x571   :  { %v9179_v13 = vmax.f32 %v9178_v49, 0.0  ;;  %v13319_v49 = vld [vmem:[%s17552_s2 + $0x110] sm:$0xff]  }
 0x573   :  { %v9183_v54 = vadd.f32 1e-05, %v9179_v13  ;;  %v13320_v13 = vld [vmem:[%s17552_s2 + $0x148] sm:$0xff]  }
 0x575   :  { %13324 = vrsqrt.f32 %v9183_v54 }
 0x582   :  { %v13325_v29 = vpop.eup %13324 }
 0x583   :  { %v9185_v61 = vmul.f32 %v13325_v29, %v9180_v19 }
 0x585   :  { %v9209_v59 = vrot.slane %v9185_v61, %v9208_v2  ;;  %v9186_v32 = vmul.f32 %v9185_v61, %v9174_v33  ;;  %v17415_v36 = vrot.slane %v9185_v61, %v9204_v20  ;;  %v13315_v33 = vld [vmem:[%s17552_s2 + $0x120] sm:$0xff]  }
 0x587   :  { %v9187_v53 = vsub.f32 %v11275_v3, %v9186_v32  ;;  %v9600_v1 = vmul.f32 %v9209_v59, %v9090_v42  ;;  %v9274_v4 = vmul.f32 %v9209_v59, %v16680_v58  ;;  %v9276_v10 = vmul.f32 %v9209_v59, %v16696_v23  ;;  %v9832_v32 = vld [vmem:[%s17554_s3 + $0x38] sm:$0xff] }
 0x588   :  { %v9213_v30 = vmul.f32 %v9209_v59, %v15341_v22  ;;  %v9215_v50 = vmul.f32 %v9209_v59, %v15360_v27  ;;  %v9273_v21 = vmul.f32 %v17415_v36, %v16672_v43  ;;  %v9275_v15 = vmul.f32 %v17415_v36, %v16688_v11  ;;  %11409 = vmatprep.subr.mxu1 %v9832_v32 }
 0x589   :  { %v9224_v55 = vrot.slane %v9187_v53, %v9208_v2  ;;  %v17421_v14 = vrot.slane %v9187_v53, %v9204_v20  ;;  %v9212_v42 = vmul.f32 %v17415_v36, %v15339_v5  ;;  %v9214_v58 = vmul.f32 %v17415_v36, %v15349_v26  ;;  %v13321_v2 = vld [vmem:[%s17552_s2 + $0x108] sm:$0xff]   ;;  %v13322_v20 = vld [vmem:[%s17552_s2 + $0x140] sm:$0xff]  }
 0x58a   :  { %v9598_v23 = vmul.f32 %v9209_v59, %v17386_v8  ;;  %v9597_v54 = vmul.f32 %v17415_v36, %v17384_v34  ;;  %v9599_v19 = vmul.f32 %v17415_v36, %v17388_v9  ;;  %v13323_v34 = vld [vmem:[%s17552_s2 + $0x100] sm:$0xff]   ;;  %v9831_v36 = vld [vmem:[%s17554_s3 + $0x30] sm:$0xff]  ;;  %v9830_v53 = vld [vmem:[%s17554_s3 + $0x28] sm:$0xff] }
 0x58b   :  { %v9278_v22 = vadd.f32 %v9274_v4, %v9224_v55  ;;  %v9280_v24 = vadd.f32 %v9276_v10, %v9224_v55  ;;  %v9228_v37 = vadd.f32 %v9224_v55, %v9213_v30  ;;  %v9230_v27 = vadd.f32 %v9224_v55, %v9215_v50  ;;  %v9828_v4 = vld [vmem:[%s17554_s3 + $0x18] sm:$0xff]  ;;  %v9827_v10 = vld [vmem:[%s17554_s3 + $0x10] sm:$0xff]  ;;  %v9826_v30 = vld [vmem:[%s17554_s3 + $0x8] sm:$0xff] }
 0x58c   :  { %v9277_v44 = vadd.f32 %v9273_v21, %v17421_v14  ;;  %v9279_v45 = vadd.f32 %v9275_v15, %v17421_v14  ;;  %v9227_v43 = vadd.f32 %v17421_v14, %v9212_v42  ;;  %v9229_v11 = vadd.f32 %v17421_v14, %v9214_v58 }
 0x58d   :  { %v9282_v46 = vmax.f32 %v9278_v22, 0.0  ;;  %v9284_v47 = vmax.f32 %v9280_v24, 0.0  ;;  %v9232_v5 = vmax.f32 %v9228_v37, 0.0  ;;  %v9234_v60 = vmax.f32 %v9230_v27, 0.0 }
 0x58e   :  { %v9281_v6 = vmax.f32 %v9277_v44, 0.0  ;;  %v9283_v26 = vmax.f32 %v9279_v45, 0.0  ;;  %v9231_v40 = vmax.f32 %v9227_v43, 0.0  ;;  %v9233_v8 = vmax.f32 %v9229_v11, 0.0 }
 0x58f   :  { %v9286_v56 = vpack.c.bf16 %v9284_v47, %v9282_v46  ;;  %v9236_v62 = vpack.c.bf16 %v9234_v60, %v9232_v5  ;;  %v9602_v48 = vadd.f32 %v9598_v23, %v9224_v55  ;;  %v9604_v51 = vadd.f32 %v9600_v1, %v9224_v55  ;;  %v9829_v1 = vld [vmem:[%s17554_s3 + $0x20] sm:$0xff] }
 0x590   :  { %v9285_v57 = vpack.c.bf16 %v9283_v26, %v9281_v6  ;;  %v9235_v18 = vpack.c.bf16 %v9233_v8, %v9231_v40  ;;  %v9601_v29 = vadd.f32 %v9597_v54, %v17421_v14  ;;  %v9603_v61 = vadd.f32 %v9599_v19, %v17421_v14  ;;  %v9825_v55 = vld [vmem:[%s17554_s3] sm:$0xff] }
 0x591   :  { %9447 = vmatprep.mubr.bf16.mxu0 %v9286_v56  ;;  %9584 = vmatprep.mubr.bf16.mxu1 %v9236_v62  ;;  %v9606_v25 = vmax.f32 %v9602_v48, 0.0  ;;  %v9608_v63 = vmax.f32 %v9604_v51, 0.0  ;;  %v9190_v44 = vadd.s32 8, %v15396_v7 }
 0x592   :  { %9448 = vmatmul.mubr.bf16.vlgmr.msra.gmra.mxu0 %v9285_v57  ;;  %9585 = vmatmul.mubr.bf16.vlgmr.msra.gmra.mxu1 %v9235_v18  ;;  %v9605_v9 = vmax.f32 %v9601_v29, 0.0  ;;  %v9607_v3 = vmax.f32 %v9603_v61, 0.0 }
 0x593   :  { %11375 = vmatpush3.bf16.msra.mxu0 %v13309_v17  ;;  %v9610_v16 = vpack.c.bf16 %v9608_v63, %v9606_v25  ;;  %11410 = vmatpush3.msra.mxu1 %v9832_v32  ;;  %vm9192_vm1 = vcmp.lt.s32.totalorder %v9190_v44, 12  ;;  %v9783_v32 = vld [vmem:[%s17553_s5 + $0x3] ss:$0 sm:$0xff] }
 0x594   :  { %11376 = vmatprep.subr.bf16.mxu0 %v13310_v52  ;;  %v9609_v59 = vpack.c.bf16 %v9607_v3, %v9605_v9  ;;  %11411 = vmatprep.subr.mxu1 %v9831_v36  ;;  %v11276_v8 = vsel %vm9192_vm1, 1.0, %v13330_v0  ;;  %v9782_v9 = vld [vmem:[%s17553_s5 + $0x2] ss:$0 sm:$0xff] }
 0x595   :  { %9771 = vmatprep.mubr.bf16.mxu0 %v9610_v16  ;;  %11412 = vmatpush3.msra.mxu1 %v9831_v36 }
 0x596   :  { %11413 = vmatprep.subr.mxu1 %v9830_v53 }
 0x597   :  { %11377 = vmatpush3.bf16.msra.mxu0 %v13311_v28  ;;  %11414 = vmatpush3.msra.mxu1 %v9830_v53 }
 0x598   :  { %11378 = vmatprep.subr.bf16.mxu0 %v13312_v38  ;;  %11415 = vmatprep.subr.mxu1 %v9829_v1 }
 0x599   :  { %11416 = vmatpush3.msra.mxu1 %v9829_v1 }
 0x59a   :  { %11417 = vmatprep.subr.mxu1 %v9828_v4 }
 0x59b   :  { %11379 = vmatpush3.bf16.msra.mxu0 %v13313_v35  ;;  %11418 = vmatpush3.msra.mxu1 %v9828_v4 }
 0x59c   :  { %11380 = vmatprep.subr.bf16.mxu0 %v13314_v31  ;;  %11419 = vmatprep.subr.mxu1 %v9827_v10 }
 0x59d   :  { %11420 = vmatpush3.msra.mxu1 %v9827_v10 }
 0x59e   :  { %11421 = vmatprep.subr.mxu1 %v9826_v30 }
 0x59f   :  { %11381 = vmatpush3.bf16.msra.mxu0 %v13315_v33  ;;  %11422 = vmatpush3.msra.mxu1 %v9826_v30 }
 0x5a0   :  { %11382 = vmatprep.subr.bf16.mxu0 %v13316_v39  ;;  %11423 = vmatprep.subr.mxu1 %v9825_v55 }
 0x5a1   :  { %11424 = vmatpush3.msra.mxu1 %v9825_v55 }
 0x5a2   :  { %11428 = vmatprep.subr.mxu1 %v13330_v0 }
 0x5a3   :  { %11383 = vmatpush3.bf16.msra.mxu0 %v13317_v41 }
 0x5a4   :  { %11384 = vmatprep.subr.bf16.mxu0 %v13318_v12 }
 0x5a7   :  { %11385 = vmatpush3.bf16.msra.mxu0 %v13319_v49 }
 0x5a8   :  { %11386 = vmatprep.subr.bf16.mxu0 %v13320_v13 }
 0x5ab   :  { %11387 = vmatpush3.bf16.msra.mxu0 %v13321_v2 }
 0x5ac   :  { %11388 = vmatprep.subr.bf16.mxu0 %v13322_v20 }
 0x5af   :  { %11389 = vmatpush3.bf16.msra.mxu0 %v13323_v34 }
 0x5b2   :  { %9772 = vmatmul.mubr.bf16.vlgmr.msra.gmra.mxu0 %v9609_v59 }
 0x652   :  { %v11346_v50 = vpop.f32.mrf.mxu0  ;;  %v11368_v14 = vpop.f32.mrf.mxu1 }
 0x654   :  { %v11347_v21 = vpop.f32.mrf.mxu0  ;;  %v11369_v15 = vpop.f32.mrf.mxu1 }
 0x655   :  { %v11348_v37 = vadd.f32 %v11347_v21, %v11346_v50  ;;  %v11370_v27 = vadd.f32 %v11369_v15, %v11368_v14  ;;  %v9957_v14 = vld [vmem:[%s17553_s5 + $0x6] ss:$0 sm:$0xff]  ;;  %v13333_v21 = vmov 0  }
 0x656   :  { %v11349_v42 = vpop.f32.mrf.mxu0  ;;  %v11371_v58 = vpop.f32.mrf.mxu1  ;;  %11439 = vset.pattern.permute.xlu0 %v13333_v21 }
 0x657   :  { %v9587_v5 = vadd.f32 %v11370_v27, %v11348_v37  ;;  %9961 = vperm.xlu0 %11439, %v9957_v14  }
 0x658   :  { %v11350_v23 = vpop.f32.mrf.mxu0  ;;  %v11372_v22 = vpop.f32.mrf.mxu1 }
 0x659   :  { %v11351_v43 = vadd.f32 %v11350_v23, %v11349_v42  ;;  %v11373_v11 = vadd.f32 %v11372_v22, %v11371_v58 }
 0x65b   :  { %v9590_v6 = vadd.f32 %v11373_v11, %v11351_v43 }
 0x672   :  { %v11390_v24 = vpop.f32.mrf.mxu0 }
 0x674   :  { %v11391_v45 = vpop.f32.mrf.mxu0 }
 0x675   :  { %v11392_v46 = vadd.f32 %v11391_v45, %v11390_v24 }
 0x676   :  { %v11393_v47 = vpop.f32.mrf.mxu0 }
 0x677   :  { %v9780_v26 = vadd.f32 %v11392_v46, %v9587_v5 }
 0x678   :  { %v11394_v60 = vpop.f32.mrf.mxu0 }
 0x679   :  { %v11395_v40 = vadd.f32 %v11394_v60, %v11393_v47  ;;  %v9796_v62 = vmul.f32 %v9780_v26, %v9780_v26  ;;  %v9787_v7 = vsel %vm9786_vm2, %v9780_v26, 0.0 }
 0x67b   :  { %v9781_v56 = vadd.f32 %v11395_v40, %v9590_v6  ;;  %v9800_v52 = vsel %vm9786_vm2, %v9796_v62, 0.0 }
 0x67d   :  { %v9785_v17 = vmul.f32 %v11276_v8, %v9781_v56  ;;  %v9797_v48 = vmul.f32 %v9781_v56, %v9781_v56 }
 0x67f   :  { %v9788_v51 = vsel %vm9786_vm2, %v9785_v17, 0.0  ;;  %v9799_v57 = vmul.f32 %v11276_v8, %v9797_v48 }
 0x680   :  { %v9789_v18 = vadd.f32 %v9788_v51, %v9787_v7 }
 0x681   :  { %v9801_v25 = vsel %vm9786_vm2, %v9799_v57, 0.0 }
 0x682   :  { %v9790_v63 = vrot.slane %v9789_v18, 4  ;;  %v9802_v16 = vadd.f32 %v9801_v25, %v9800_v52 }
 0x684   :  { %v9791_v28 = vadd.f32 %v9790_v63, %v9789_v18  ;;  %v9803_v38 = vrot.slane %v9802_v16, 4  ;;  %v9914_v63 = vld [vmem:[%s17553_s5 + $0x4] ss:$0 sm:$0xff] }
 0x686   :  { %v9792_v35 = vrot.slane %v9791_v28, 2  ;;  %v9804_v31 = vadd.f32 %v9803_v38, %v9802_v16  ;;  %v9915_v38 = vld [vmem:[%s17553_s5 + $0x5] ss:$0 sm:$0xff] }
 0x688   :  { %v9793_v33 = vadd.f32 %v9792_v35, %v9791_v28  ;;  %v9805_v39 = vrot.slane %v9804_v31, 2 }
 0x68a   :  { %v9794_v41 = vrot.slane %v9793_v33, 1  ;;  %v9806_v12 = vadd.f32 %v9805_v39, %v9804_v31 }
 0x68c   :  { %v9795_v49 = vadd.f32 %v9794_v41, %v9793_v33  ;;  %v9807_v13 = vrot.slane %v9806_v12, 1 }
 0x68e   :  { %v9808_v54 = vadd.f32 %v9807_v13, %v9806_v12  ;;  %v9809_v19 = vmul.f32 0.083333336, %v9795_v49 }
 0x690   :  { %v9810_v2 = vmul.f32 0.083333336, %v9808_v54  ;;  %v9811_v20 = vmul.f32 %v9809_v19, %v9809_v19  ;;  %v9958_v54 = vld [vmem:[%s17555_s4] sm:$0x1] }
 0x692   :  { %v9812_v29 = vsub.f32 %v9810_v2, %v9811_v20 }
 0x694   :  { %v9813_v61 = vmax.f32 %v9812_v29, 0.0 }
 0x696   :  { %v9814_v34 = vadd.f32 1e-05, %v9813_v61 }
 0x698   :  { %13326 = vrsqrt.f32 %v9814_v34 }
 0x6a5   :  { %v13327_v3 = vpop.eup %13326 }
 0x6a6   :  { %v9816_v59 = vmul.f32 %v13327_v3, %v9782_v9 }
 0x6a8   :  { %v9819_v36 = vmul.f32 %v9816_v59, %v9809_v19  ;;  %v9818_v53 = vmul.f32 %v9816_v59, %v9781_v56  ;;  %v9817_v4 = vmul.f32 %v9816_v59, %v9780_v26 }
 0x6aa   :  { %v9820_v1 = vsub.f32 %v9783_v32, %v9819_v36 }
 0x6ac   :  { %v9822_v10 = vadd.f32 %v9820_v1, %v9818_v53  ;;  %v9821_v30 = vadd.f32 %v9820_v1, %v9817_v4 }
 0x6ae   :  { %v9824_v55 = vmax.f32 %v9822_v10, 0.0  ;;  %v9823_v50 = vmax.f32 %v9821_v30, 0.0 }
 0x6b0   :  { %11425 = vmatprep.mubr.msk.f32.mxu1 %vm9786_vm2, %v9823_v50 }
 0x6b1   :  { %11426 = vmatmul.mubr.msk.f32.vlgmr.msra.gmra.mxu1 %vm9786_vm2, %v9824_v55 }
 0x6b2   :  { %11432 = vmatprep.mubr.msk.f32.mxu1 %vm13332_vm3, %v13330_v0 }
 0x6d2   :  { %v9962_v19 = vpop.permute.xlu0 %9961 }
 0x771   :  { %v11427_v15 = vpop.f32.mrf.mxu1 }
 0x772   :  { %v9917_v42 = vmul.f32 %v11427_v15, %v11276_v8  ;;  %v9929_v58 = vmul.f32 %v11427_v15, %v11427_v15 }
 0x773   :  { %v9905_v23 = vpop.f32.mrf.mxu1 }
 0x774   :  { %v9931_v22 = vmul.f32 %v11276_v8, %v9929_v58  ;;  %v9919_v24 = vsel %vm9918_vm4, %v9905_v23, 0.0  ;;  %v9920_v37 = vsel %vm9918_vm4, %v9917_v42, 0.0  ;;  %v9928_v27 = vmul.f32 %v9905_v23, %v9905_v23 }
 0x775   :  { %v9921_v44 = vadd.f32 %v9920_v37, %v9919_v24 }
 0x776   :  { %v9932_v45 = vsel %vm9918_vm4, %v9928_v27, 0.0  ;;  %v9933_v43 = vsel %vm9918_vm4, %v9931_v22, 0.0 }
 0x777   :  { %v9922_v11 = vrot.slane %v9921_v44, 4  ;;  %v9934_v46 = vadd.f32 %v9933_v43, %v9932_v45 }
 0x779   :  { %v9923_v47 = vadd.f32 %v9922_v11, %v9921_v44  ;;  %v9935_v5 = vrot.slane %v9934_v46, 4 }
 0x77b   :  { %v9924_v60 = vrot.slane %v9923_v47, 2  ;;  %v9936_v6 = vadd.f32 %v9935_v5, %v9934_v46 }
 0x77d   :  { %v9925_v26 = vadd.f32 %v9924_v60, %v9923_v47  ;;  %v9937_v40 = vrot.slane %v9936_v6, 2 }
 0x77f   :  { %v9926_v56 = vrot.slane %v9925_v26, 1  ;;  %v9938_v8 = vadd.f32 %v9937_v40, %v9936_v6 }
 0x781   :  { %v9927_v62 = vadd.f32 %v9926_v56, %v9925_v26  ;;  %v9939_v17 = vrot.slane %v9938_v8, 1 }
 0x783   :  { %v9940_v48 = vadd.f32 %v9939_v17, %v9938_v8  ;;  %v9941_v7 = vmul.f32 0.083333336, %v9927_v62 }
 0x785   :  { %v9942_v51 = vmul.f32 0.083333336, %v9940_v48  ;;  %v9943_v57 = vmul.f32 %v9941_v7, %v9941_v7 }
 0x787   :  { %v9944_v18 = vsub.f32 %v9942_v51, %v9943_v57 }
 0x789   :  { %v9945_v52 = vmax.f32 %v9944_v18, 0.0 }
 0x78b   :  { %v9946_v25 = vadd.f32 1e-05, %v9945_v52 }
 0x78d   :  { %13328 = vrsqrt.f32 %v9946_v25 }
 0x79a   :  { %v13329_v16 = vpop.eup %13328 }
 0x79b   :  { %v9948_v28 = vmul.f32 %v13329_v16, %v9914_v63 }
 0x79d   :  { %v9951_v35 = vmul.f32 %v9948_v28, %v9941_v7  ;;  %v9950_v31 = vmul.f32 %v11427_v15, %v9948_v28  ;;  %v9949_v39 = vmul.f32 %v9948_v28, %v9905_v23 }
 0x79f   :  { %v9952_v33 = vsub.f32 %v9915_v38, %v9951_v35 }
 0x7a1   :  { %v9954_v41 = vadd.f32 %v9952_v33, %v9950_v31  ;;  %v9953_v12 = vadd.f32 %v9952_v33, %v9949_v39 }
 0x7a3   :  { %v9956_v49 = vmax.f32 %v9954_v41, 0.0  ;;  %v9955_v13 = vmax.f32 %v9953_v12, 0.0 }
 0x7a5   :  { %11429 = vmatpush3.xpose.msk.msra.mxu1 %vm9918_vm4, %v9956_v49 }
 0x7a6   :  { %11430 = vmatprep.subr.mxu1 %v13330_v0 }
 0x7a9   :  { %11431 = vmatpush3.xpose.msk.msra.mxu1 %vm9918_vm4, %v9955_v13 }
 0x7ac   :  { %11433 = vmatmul.mubr.msk.f32.vlgmr.msra.gmra.mxu1 %vm9918_vm4, %v9958_v54 }
 0x86c   :  { %v10039_v2 = vpop.f32.mrf.mxu1 }
 0x86d   :  { %v10040_v20 = vadd.f32 %v10039_v2, %v9962_v19 }
 0x86e   :  { %v11434_v29 = vpop.f32.mrf.mxu1 }
 0x86f   :  { %10044 = vst.msk [vmem:[%s17556_s6] sm:$0x1] %vm10043_vm5, %v10040_v20 }

</bundles_post_ra>
